<compile_context>
chip_gen: v7x
topology: tpu7x:2x2x1
jax: 0.10.0
libtpu: 0.0.40
codegen_flags: <defaults>
</compile_context>

<pallas_src>
import jax
import jax.numpy as jnp
from jax.experimental import pallas as pl
from jax.experimental.pallas import tpu as pltpu


# ---------------------------------------------------------------------------
# Raw parameter construction (mirrors DSASPP.__init__)
# ---------------------------------------------------------------------------
def _bn_init(key, c):
    kg, kb, km, kv = jax.random.split(key, 4)
    return dict(
        gamma=1.0 + 0.1 * jax.random.normal(kg, (c,), jnp.float32),
        beta=0.1 * jax.random.normal(kb, (c,), jnp.float32),
        mean=0.1 * jax.random.normal(km, (c,), jnp.float32),
        var=jnp.abs(1.0 + 0.1 * jax.random.normal(kv, (c,), jnp.float32)),
    )


def init_dsaspp_params(key, in_channel, channel, dilation):
    """Raw (unfused) params with the same layer structure as the PyTorch module."""
    raw = {"dilations": tuple(dilation), "in_channel": in_channel,
           "channel": channel, "branches": []}
    for d in dilation:
        if d == 1:
            key, kw_, kbn = jax.random.split(key, 3)
            raw["branches"].append(dict(
                type="conv1x1",
                w=0.1 * jax.random.normal(kw_, (1, 1, in_channel, channel), jnp.float32),
                bn=_bn_init(kbn, channel)))
        else:
            key, kwd, kbd, kbn1, kwp, kbp, kbn2 = jax.random.split(key, 7)
            raw["branches"].append(dict(
                type="dsconv", d=d,
                wd=0.1 * jax.random.normal(kwd, (3, 3, in_channel, in_channel), jnp.float32),
                bd=0.1 * jax.random.normal(kbd, (in_channel,), jnp.float32),
                bn_d=_bn_init(kbn1, in_channel),
                wp=0.1 * jax.random.normal(kwp, (1, 1, in_channel, channel), jnp.float32),
                bp=0.1 * jax.random.normal(kbp, (channel,), jnp.float32),
                bn_p=_bn_init(kbn2, channel)))
    key, kwo, kbno = jax.random.split(key, 3)
    raw["out"] = dict(
        w=0.1 * jax.random.normal(kwo, (3, 3, len(dilation) * channel, channel), jnp.float32),
        bn=_bn_init(kbno, channel))
    return raw


# ---------------------------------------------------------------------------
# BN folding + dense parameter packing (2 packed operands total)
# ---------------------------------------------------------------------------
def _fold(w_hwio, conv_b, bn, eps=1e-5):
    """Fold inference-mode BN into the conv.  Returns (scaled HWIO weight, bias)."""
    scale = bn["gamma"] / jnp.sqrt(bn["var"] + eps)              # (Cout,)
    w_folded = w_hwio * scale                                    # broadcast over Cout
    cb = jnp.zeros_like(bn["mean"]) if conv_b is None else conv_b
    bias = (cb - bn["mean"]) * scale + bn["beta"]                # (Cout,)
    return w_folded, bias


def prepare_fused_params(raw, eps=1e-5):
    """Pack every folded weight/bias into two dense operands.

    w_packed : (num_mats, CP, CP) — matrix i is one (Cout, K) tap/1x1 matrix,
               zero-padded to CP = ceil8(max(Cin, C)); LHS of dot((Cout,K),(K,HWp)).
    b_packed : (CP, num_convs)    — folded per-conv bias as a sublane column.
    """
    dils = raw["dilations"]
    nb = len(dils)
    Cin, C = raw["in_channel"], raw["channel"]
    CP = ((max(Cin, C) + 7) // 8) * 8

    mats, biases = [], []

    def add_mat(w_ok):                     # w_ok: (Cout, K)
        co, k = w_ok.shape
        mats.append(jnp.zeros((CP, CP), jnp.float32).at[:co, :k].set(w_ok))
        return len(mats) - 1

    def add_bias(b):                       # b: (Cout,)
        biases.append(jnp.zeros((CP,), jnp.float32).at[:b.shape[0]].set(b))
        return len(biases) - 1

    branch_meta = []
    for br in raw["branches"]:
        if br["type"] == "conv1x1":
            wf, bf = _fold(br["w"], None, br["bn"], eps)
            branch_meta.append(("c1", add_mat(wf[0, 0].T), add_bias(bf)))
        else:
            wdf, bdf = _fold(br["wd"], br["bd"], br["bn_d"], eps)
            mi_d = len(mats)
            for kh in range(3):
                for kw in range(3):
                    add_mat(wdf[kh, kw].T)              # (Cout=Cin, K=Cin)
            ci_d = add_bias(bdf)
            wpf, bpf = _fold(br["wp"], br["bp"], br["bn_p"], eps)
            branch_meta.append(("ds", br["d"], mi_d, ci_d,
                                add_mat(wpf[0, 0].T), add_bias(bpf)))

    wof, bof = _fold(raw["out"]["w"], None, raw["out"]["bn"], eps)
    mi_o = len(mats)
    for g in range(nb):                                  # one group per concat branch
        for kh in range(3):
            for kw in range(3):
                add_mat(wof[kh, kw, g * C:(g + 1) * C, :].T)   # (Cout=C, K=C)
    ci_o = add_bias(bof)

    return dict(dilations=dils, Cin=Cin, C=C, CP=CP,
                w_packed=jnp.stack(mats),                # (num_mats, CP, CP)
                b_packed=jnp.stack(biases, axis=1),      # (CP, num_convs)
                branch_meta=tuple(branch_meta), mi_o=mi_o, ci_o=ci_o)


# ---------------------------------------------------------------------------
# Fused Pallas kernel
# ---------------------------------------------------------------------------
def dsaspp_pallas(x_nchw, fused):
    """Fused DSASPP forward. x_nchw: (N, Cin, H, W) f32 -> (N, C, H, W) f32."""
    N, Cin, H, W = x_nchw.shape
    dils = fused["dilations"]
    nb = len(dils)
    C, CP = fused["C"], fused["CP"]
    branch_meta, mi_o, ci_o = fused["branch_meta"], fused["mi_o"], fused["ci_o"]

    P = max(1, max(dils))                 # shared halo (>= 1 for the output 3x3)
    Hp, Wp = H + 2 * P, W + 2 * P
    HWP = H * Wp                          # padded-width flattened output frame
    LX = Hp * Wp + 2 * P                  # frame length (+2P keeps tap slices in-bounds)
    OFF = P * Wp + P                      # flat offset of the valid interior
    TOP_LO, TOP_HI = (P - 1) * Wp, P * Wp + P          # halo strip above the interior
    BOT_LO, BOT_HI = (P + H) * Wp, (P + H + 1) * Wp    # halo strip below the interior

    # Channel-pad to CP, spatially pad ONCE by P, flatten (channel-major, no transpose).
    xp = jnp.pad(x_nchw, ((0, 0), (0, CP - Cin), (P, P), (P, P)))
    x_flat = jnp.pad(xp.reshape(N, CP, Hp * Wp), ((0, 0), (0, 0), (0, LX - Hp * Wp)))

    # Mask of real columns of the padded-width frame (column-in-row < W).
    col_mask = ((jnp.arange(HWP, dtype=jnp.int32) % Wp) < W)
    col_mask = col_mask.astype(jnp.float32).reshape(1, HWP)

    w_packed, b_packed = fused["w_packed"], fused["b_packed"]

    def kernel(x_ref, w_ref, b_ref, m_ref, o_ref, cat_ref):
        # Zero ONLY the halo strips the output 3x3 conv reads; the rest of the
        # 1-pixel ring is rewritten (as masked zeros) by the branch slab writes
        # every grid step.  Not gated on program_id (megacore-safe).
        cat_ref[:, :, TOP_LO:TOP_HI] = jnp.zeros((nb, CP, TOP_HI - TOP_LO), jnp.float32)
        cat_ref[:, :, BOT_LO:BOT_HI] = jnp.zeros((nb, CP, BOT_HI - BOT_LO), jnp.float32)

        x = x_ref[0]                      # (CP, LX) — flat padded frame, channel major
        mask = m_ref[...]                 # (1, HWP)

        def bias(ci):                     # (CP, 1) column, broadcasts over lanes
            return b_ref[:, ci:ci + 1]

        def taps_accum(acc, src, mi0, dil):
            """acc += sum over 9 taps of dot(w_tap, contiguous shifted window of src)."""
            t = 0
            for kh in range(3):
                for kw in range(3):
                    s = (P + (kh - 1) * dil) * Wp + (P + (kw - 1) * dil)
                    win = src[:, s:s + HWP]              # (CP, HWP) contiguous slice
                    acc = acc + jnp.dot(w_ref[mi0 + t], win,
                                        preferred_element_type=jnp.float32)
                    t += 1
            return acc

        x_center = x[:, OFF:OFF + HWP]    # identity (1x1) window of the input

        # ---- branches -> concat scratch (leading-axis slab writes) ----
        for bi, meta in enumerate(branch_meta):
            if meta[0] == "c1":           # Conv1x1 + BN + ReLU
                _, mi, ci = meta
                y = jnp.dot(w_ref[mi], x_center,
                            preferred_element_type=jnp.float32) + bias(ci)
            else:                         # dense 3x3 (dil=d) + BN + ReLU, then 1x1 + BN + ReLU
                _, d, mi_d, ci_d, mi_p, ci_p = meta
                yd = jnp.maximum(taps_accum(bias(ci_d), x, mi_d, d), 0.0)
                y = jnp.dot(w_ref[mi_p], yd,
                            preferred_element_type=jnp.float32) + bias(ci_p)
            y = jnp.maximum(y, 0.0) * mask               # zero the pad columns
            cat_ref[bi, :, OFF:OFF + HWP] = y

        # ---- output Conv3x3(pad=1) + BN + ReLU over the concatenated groups ----
        acc = bias(ci_o)
        for g in range(nb):
            acc = taps_accum(acc, cat_ref[g], mi_o + 9 * g, 1)
        o_ref[0] = jnp.maximum(acc, 0.0).astype(o_ref.dtype)

    out_flat = pl.pallas_call(
        kernel,
        out_shape=jax.ShapeDtypeStruct((N, CP, HWP), jnp.float32),
        grid=(N,),
        in_specs=[
            pl.BlockSpec((1, CP, LX), lambda n: (n, 0, 0)),
            pl.BlockSpec(w_packed.shape, lambda n: (0, 0, 0)),
            pl.BlockSpec(b_packed.shape, lambda n: (0, 0)),
            pl.BlockSpec((1, HWP), lambda n: (0, 0)),
        ],
        out_specs=pl.BlockSpec((1, CP, HWP), lambda n: (n, 0, 0)),
        scratch_shapes=[pltpu.VMEM((nb, CP, LX), jnp.float32)],
        compiler_params=pltpu.CompilerParams(
            dimension_semantics=("parallel",),
            vmem_limit_bytes=48 * 1024 * 1024),
    )(x_flat, w_packed, b_packed, col_mask)

    # Un-pad: (N, CP, H*Wp) -> (N, C, H, W).  Pure XLA view/slice on a tiny array.
    return out_flat.reshape(N, CP, H, Wp)[:, :C, :, :W]


# ---------------------------------------------------------------------------
# Pure-JAX reference (unfused, raw params) for the correctness check
# ---------------------------------------------------------------------------
def _conv_bn_relu_ref(x, w, conv_b, bn, dilation, padding, eps=1e-5):
    y = jax.lax.conv_general_dilated(
        x, w, window_strides=(1, 1),
        padding=[(padding, padding), (padding, padding)],
        rhs_dilation=(dilation, dilation),
        dimension_numbers=("NHWC", "HWIO", "NHWC"))
    if conv_b is not None:
        y = y + conv_b.reshape(1, 1, 1, -1)
    y = (y - bn["mean"]) / jnp.sqrt(bn["var"] + eps) * bn["gamma"] + bn["beta"]
    return jnp.maximum(y, 0.0)


def dsaspp_ref(x_nchw, raw):
    x = jnp.transpose(x_nchw, (0, 2, 3, 1))
    outs = []
    for br in raw["branches"]:
        if br["type"] == "conv1x1":
            outs.append(_conv_bn_relu_ref(x, br["w"], None, br["bn"], 1, 0))
        else:
            d = br["d"]
            y = _conv_bn_relu_ref(x, br["wd"], br["bd"], br["bn_d"], d, d)
            y = _conv_bn_relu_ref(y, br["wp"], br["bp"], br["bn_p"], 1, 0)
            outs.append(y)
    cat = jnp.concatenate(outs, axis=-1)
    y = _conv_bn_relu_ref(cat, raw["out"]["w"], None, raw["out"]["bn"], 1, 1)
    return jnp.transpose(y, (0, 3, 1, 2))


if __name__ == "__main__":
    key = jax.random.PRNGKey(0)
    in_channel, channel = 4, 4
    dilation = (1, 2, 3, 5)
    N, H, W = 2, 16, 16

    key, kx = jax.random.split(key)
    x = jax.random.normal(kx, (N, in_channel, H, W), jnp.float32)
    raw = init_dsaspp_params(key, in_channel, channel, dilation)
    fused = prepare_fused_params(raw)

    out = jax.block_until_ready(dsaspp_pallas(x, fused))
    ref = jax.block_until_ready(dsaspp_ref(x, raw))

    assert out.shape == (N, channel, H, W), out.shape
    err = float(jnp.max(jnp.abs(out - ref)))
    assert jnp.allclose(out, ref, atol=1e-3, rtol=1e-3), err

    print("KERNEL_OK")
</pallas_src>

<mosaic_0001>
module attributes {stable_mosaic.version = 11 : i64} {
  func.func @kernel(%arg0: i32, %arg1: memref<1x8x686xf32, #tpu.memory_space<vmem>>, %arg2: memref<67x8x8xf32, #tpu.memory_space<vmem>>, %arg3: memref<8x8xf32, #tpu.memory_space<vmem>>, %arg4: memref<1x416xf32, #tpu.memory_space<vmem>>, %arg5: memref<1x8x416xf32, #tpu.memory_space<vmem>>, %arg6: memref<4x8x686xf32, #tpu.memory_space<vmem>>) attributes {dimension_semantics = [#tpu.dimension_semantics<parallel>], iteration_bounds = array<i64: 2>, scalar_prefetch = 0 : i64, scratch_operands = 1 : i64, tpu.core_type = #tpu.core_type<tc>, window_params = [{transform_indices = @transform_0, window_bounds = array<i64: 1, 8, 686>}, {pipeline_mode = #tpu.pipeline_mode<synchronous>, transform_indices = @transform_1, window_bounds = array<i64: 67, 8, 8>}, {pipeline_mode = #tpu.pipeline_mode<synchronous>, transform_indices = @transform_2, window_bounds = array<i64: 8, 8>}, {pipeline_mode = #tpu.pipeline_mode<synchronous>, transform_indices = @transform_3, window_bounds = array<i64: 1, 416>}, {transform_indices = @transform_4, window_bounds = array<i64: 1, 8, 416>}]} {
    %cst = arith.constant 0.000000e+00 : f32
    %0 = vector.broadcast %cst : f32 to vector<4x8x31xf32>
    %c0 = arith.constant 0 : index
    %c0_0 = arith.constant 0 : index
    %c104 = arith.constant 104 : index
    %1 = vector.load %arg6[%c0, %c0_0, %c104] : memref<4x8x686xf32, #tpu.memory_space<vmem>>, vector<4x8x31xf32>
    tpu.vector_store %arg6[%c0, %c0_0, %c104], %0 {strides = array<i32>} : memref<4x8x686xf32, #tpu.memory_space<vmem>>, vector<4x8x31xf32>,
    %cst_1 = arith.constant 0.000000e+00 : f32
    %2 = vector.broadcast %cst_1 : f32 to vector<4x8x26xf32>
    %c0_2 = arith.constant 0 : index
    %c0_3 = arith.constant 0 : index
    %c546 = arith.constant 546 : index
    %3 = vector.load %arg6[%c0_2, %c0_3, %c546] : memref<4x8x686xf32, #tpu.memory_space<vmem>>, vector<4x8x26xf32>
    tpu.vector_store %arg6[%c0_2, %c0_3, %c546], %2 {strides = array<i32>} : memref<4x8x686xf32, #tpu.memory_space<vmem>>, vector<4x8x26xf32>,
    %c0_4 = arith.constant 0 : index
    %c0_5 = arith.constant 0 : index
    %c0_6 = arith.constant 0 : index
    %4 = vector.load %arg1[%c0_4, %c0_5, %c0_6] : memref<1x8x686xf32, #tpu.memory_space<vmem>>, vector<1x8x686xf32>
    %5 = vector.shape_cast %4 : vector<1x8x686xf32> to vector<8x686xf32>
    %c0_7 = arith.constant 0 : index
    %c0_8 = arith.constant 0 : index
    %6 = vector.load %arg4[%c0_7, %c0_8] : memref<1x416xf32, #tpu.memory_space<vmem>>, vector<1x416xf32>
    %7 = vector.extract_strided_slice %5 {offsets = [0, 135], sizes = [8, 416], strides = [1, 1]} : vector<8x686xf32> to vector<8x416xf32>
    %c0_9 = arith.constant 0 : index
    %c0_10 = arith.constant 0 : index
    %c0_11 = arith.constant 0 : index
    %8 = vector.load %arg2[%c0_9, %c0_10, %c0_11] : memref<67x8x8xf32, #tpu.memory_space<vmem>>, vector<1x8x8xf32>
    %9 = vector.shape_cast %8 : vector<1x8x8xf32> to vector<8x8xf32>
    %cst_12 = arith.constant dense<0.000000e+00> : vector<8x416xf32>
    %10 = tpu.matmul %9, %7, %cst_12 {dimension_numbers = #tpu.dot_dimension_numbers<[1], [0], [0], [1], [0, 0, 1, 1], [], []>} : vector<8x8xf32>, vector<8x416xf32>, vector<8x416xf32> -> vector<8x416xf32>
    %c0_13 = arith.constant 0 : index
    %c0_14 = arith.constant 0 : index
    %11 = vector.load %arg3[%c0_13, %c0_14] : memref<8x8xf32, #tpu.memory_space<vmem>>, vector<8x1xf32>
    %12 = vector.broadcast %11 : vector<8x1xf32> to vector<8x416xf32>
    %13 = arith.addf %10, %12 : vector<8x416xf32>
    %cst_15 = arith.constant 0.000000e+00 : f32
    %14 = vector.broadcast %cst_15 : f32 to vector<8x416xf32>
    %15 = arith.maximumf %13, %14 : vector<8x416xf32>
    %16 = vector.broadcast %6 : vector<1x416xf32> to vector<8x416xf32>
    %17 = arith.mulf %15, %16 : vector<8x416xf32>
    %c0_16 = arith.constant 0 : index
    %c0_17 = arith.constant 0 : index
    %c135 = arith.constant 135 : index
    %18 = vector.load %arg6[%c0_16, %c0_17, %c135] : memref<4x8x686xf32, #tpu.memory_space<vmem>>, vector<1x8x416xf32>
    %19 = vector.shape_cast %18 : vector<1x8x416xf32> to vector<8x416xf32>
    %20 = vector.shape_cast %17 : vector<8x416xf32> to vector<1x8x416xf32>
    tpu.vector_store %arg6[%c0_16, %c0_17, %c135], %20 {strides = array<i32>} : memref<4x8x686xf32, #tpu.memory_space<vmem>>, vector<1x8x416xf32>,
    %c0_18 = arith.constant 0 : index
    %c1 = arith.constant 1 : index
    %21 = vector.load %arg3[%c0_18, %c1] : memref<8x8xf32, #tpu.memory_space<vmem>>, vector<8x1xf32>
    %22 = vector.extract_strided_slice %5 {offsets = [0, 81], sizes = [8, 416], strides = [1, 1]} : vector<8x686xf32> to vector<8x416xf32>
    %c1_19 = arith.constant 1 : index
    %c0_20 = arith.constant 0 : index
    %c0_21 = arith.constant 0 : index
    %23 = vector.load %arg2[%c1_19, %c0_20, %c0_21] : memref<67x8x8xf32, #tpu.memory_space<vmem>>, vector<1x8x8xf32>
    %24 = vector.shape_cast %23 : vector<1x8x8xf32> to vector<8x8xf32>
    %cst_22 = arith.constant dense<0.000000e+00> : vector<8x416xf32>
    %25 = tpu.matmul %24, %22, %cst_22 {dimension_numbers = #tpu.dot_dimension_numbers<[1], [0], [0], [1], [0, 0, 1, 1], [], []>} : vector<8x8xf32>, vector<8x416xf32>, vector<8x416xf32> -> vector<8x416xf32>
    %26 = vector.broadcast %21 : vector<8x1xf32> to vector<8x416xf32>
    %27 = arith.addf %26, %25 : vector<8x416xf32>
    %28 = vector.extract_strided_slice %5 {offsets = [0, 83], sizes = [8, 416], strides = [1, 1]} : vector<8x686xf32> to vector<8x416xf32>
    %c2 = arith.constant 2 : index
    %c0_23 = arith.constant 0 : index
    %c0_24 = arith.constant 0 : index
    %29 = vector.load %arg2[%c2, %c0_23, %c0_24] : memref<67x8x8xf32, #tpu.memory_space<vmem>>, vector<1x8x8xf32>
    %30 = vector.shape_cast %29 : vector<1x8x8xf32> to vector<8x8xf32>
    %cst_25 = arith.constant dense<0.000000e+00> : vector<8x416xf32>
    %31 = tpu.matmul %30, %28, %cst_25 {dimension_numbers = #tpu.dot_dimension_numbers<[1], [0], [0], [1], [0, 0, 1, 1], [], []>} : vector<8x8xf32>, vector<8x416xf32>, vector<8x416xf32> -> vector<8x416xf32>
    %32 = arith.addf %27, %31 : vector<8x416xf32>
    %33 = vector.extract_strided_slice %5 {offsets = [0, 85], sizes = [8, 416], strides = [1, 1]} : vector<8x686xf32> to vector<8x416xf32>
    %c3 = arith.constant 3 : index
    %c0_26 = arith.constant 0 : index
    %c0_27 = arith.constant 0 : index
    %34 = vector.load %arg2[%c3, %c0_26, %c0_27] : memref<67x8x8xf32, #tpu.memory_space<vmem>>, vector<1x8x8xf32>
    %35 = vector.shape_cast %34 : vector<1x8x8xf32> to vector<8x8xf32>
    %cst_28 = arith.constant dense<0.000000e+00> : vector<8x416xf32>
    %36 = tpu.matmul %35, %33, %cst_28 {dimension_numbers = #tpu.dot_dimension_numbers<[1], [0], [0], [1], [0, 0, 1, 1], [], []>} : vector<8x8xf32>, vector<8x416xf32>, vector<8x416xf32> -> vector<8x416xf32>
    %37 = arith.addf %32, %36 : vector<8x416xf32>
    %38 = vector.extract_strided_slice %5 {offsets = [0, 133], sizes = [8, 416], strides = [1, 1]} : vector<8x686xf32> to vector<8x416xf32>
    %c4 = arith.constant 4 : index
    %c0_29 = arith.constant 0 : index
    %c0_30 = arith.constant 0 : index
    %39 = vector.load %arg2[%c4, %c0_29, %c0_30] : memref<67x8x8xf32, #tpu.memory_space<vmem>>, vector<1x8x8xf32>
    %40 = vector.shape_cast %39 : vector<1x8x8xf32> to vector<8x8xf32>
    %cst_31 = arith.constant dense<0.000000e+00> : vector<8x416xf32>
    %41 = tpu.matmul %40, %38, %cst_31 {dimension_numbers = #tpu.dot_dimension_numbers<[1], [0], [0], [1], [0, 0, 1, 1], [], []>} : vector<8x8xf32>, vector<8x416xf32>, vector<8x416xf32> -> vector<8x416xf32>
    %42 = arith.addf %37, %41 : vector<8x416xf32>
    %43 = vector.extract_strided_slice %5 {offsets = [0, 135], sizes = [8, 416], strides = [1, 1]} : vector<8x686xf32> to vector<8x416xf32>
    %c5 = arith.constant 5 : index
    %c0_32 = arith.constant 0 : index
    %c0_33 = arith.constant 0 : index
    %44 = vector.load %arg2[%c5, %c0_32, %c0_33] : memref<67x8x8xf32, #tpu.memory_space<vmem>>, vector<1x8x8xf32>
    %45 = vector.shape_cast %44 : vector<1x8x8xf32> to vector<8x8xf32>
    %cst_34 = arith.constant dense<0.000000e+00> : vector<8x416xf32>
    %46 = tpu.matmul %45, %43, %cst_34 {dimension_numbers = #tpu.dot_dimension_numbers<[1], [0], [0], [1], [0, 0, 1, 1], [], []>} : vector<8x8xf32>, vector<8x416xf32>, vector<8x416xf32> -> vector<8x416xf32>
    %47 = arith.addf %42, %46 : vector<8x416xf32>
    %48 = vector.extract_strided_slice %5 {offsets = [0, 137], sizes = [8, 416], strides = [1, 1]} : vector<8x686xf32> to vector<8x416xf32>
    %c6 = arith.constant 6 : index
    %c0_35 = arith.constant 0 : index
    %c0_36 = arith.constant 0 : index
    %49 = vector.load %arg2[%c6, %c0_35, %c0_36] : memref<67x8x8xf32, #tpu.memory_space<vmem>>, vector<1x8x8xf32>
    %50 = vector.shape_cast %49 : vector<1x8x8xf32> to vector<8x8xf32>
    %cst_37 = arith.constant dense<0.000000e+00> : vector<8x416xf32>
    %51 = tpu.matmul %50, %48, %cst_37 {dimension_numbers = #tpu.dot_dimension_numbers<[1], [0], [0], [1], [0, 0, 1, 1], [], []>} : vector<8x8xf32>, vector<8x416xf32>, vector<8x416xf32> -> vector<8x416xf32>
    %52 = arith.addf %47, %51 : vector<8x416xf32>
    %53 = vector.extract_strided_slice %5 {offsets = [0, 185], sizes = [8, 416], strides = [1, 1]} : vector<8x686xf32> to vector<8x416xf32>
    %c7 = arith.constant 7 : index
    %c0_38 = arith.constant 0 : index
    %c0_39 = arith.constant 0 : index
    %54 = vector.load %arg2[%c7, %c0_38, %c0_39] : memref<67x8x8xf32, #tpu.memory_space<vmem>>, vector<1x8x8xf32>
    %55 = vector.shape_cast %54 : vector<1x8x8xf32> to vector<8x8xf32>
    %cst_40 = arith.constant dense<0.000000e+00> : vector<8x416xf32>
    %56 = tpu.matmul %55, %53, %cst_40 {dimension_numbers = #tpu.dot_dimension_numbers<[1], [0], [0], [1], [0, 0, 1, 1], [], []>} : vector<8x8xf32>, vector<8x416xf32>, vector<8x416xf32> -> vector<8x416xf32>
    %57 = arith.addf %52, %56 : vector<8x416xf32>
    %58 = vector.extract_strided_slice %5 {offsets = [0, 187], sizes = [8, 416], strides = [1, 1]} : vector<8x686xf32> to vector<8x416xf32>
    %c8 = arith.constant 8 : index
    %c0_41 = arith.constant 0 : index
    %c0_42 = arith.constant 0 : index
    %59 = vector.load %arg2[%c8, %c0_41, %c0_42] : memref<67x8x8xf32, #tpu.memory_space<vmem>>, vector<1x8x8xf32>
    %60 = vector.shape_cast %59 : vector<1x8x8xf32> to vector<8x8xf32>
    %cst_43 = arith.constant dense<0.000000e+00> : vector<8x416xf32>
    %61 = tpu.matmul %60, %58, %cst_43 {dimension_numbers = #tpu.dot_dimension_numbers<[1], [0], [0], [1], [0, 0, 1, 1], [], []>} : vector<8x8xf32>, vector<8x416xf32>, vector<8x416xf32> -> vector<8x416xf32>
    %62 = arith.addf %57, %61 : vector<8x416xf32>
    %63 = vector.extract_strided_slice %5 {offsets = [0, 189], sizes = [8, 416], strides = [1, 1]} : vector<8x686xf32> to vector<8x416xf32>
    %c9 = arith.constant 9 : index
    %c0_44 = arith.constant 0 : index
    %c0_45 = arith.constant 0 : index
    %64 = vector.load %arg2[%c9, %c0_44, %c0_45] : memref<67x8x8xf32, #tpu.memory_space<vmem>>, vector<1x8x8xf32>
    %65 = vector.shape_cast %64 : vector<1x8x8xf32> to vector<8x8xf32>
    %cst_46 = arith.constant dense<0.000000e+00> : vector<8x416xf32>
    %66 = tpu.matmul %65, %63, %cst_46 {dimension_numbers = #tpu.dot_dimension_numbers<[1], [0], [0], [1], [0, 0, 1, 1], [], []>} : vector<8x8xf32>, vector<8x416xf32>, vector<8x416xf32> -> vector<8x416xf32>
    %67 = arith.addf %62, %66 : vector<8x416xf32>
    %cst_47 = arith.constant 0.000000e+00 : f32
    %68 = vector.broadcast %cst_47 : f32 to vector<8x416xf32>
    %69 = arith.maximumf %67, %68 : vector<8x416xf32>
    %c10 = arith.constant 10 : index
    %c0_48 = arith.constant 0 : index
    %c0_49 = arith.constant 0 : index
    %70 = vector.load %arg2[%c10, %c0_48, %c0_49] : memref<67x8x8xf32, #tpu.memory_space<vmem>>, vector<1x8x8xf32>
    %71 = vector.shape_cast %70 : vector<1x8x8xf32> to vector<8x8xf32>
    %cst_50 = arith.constant dense<0.000000e+00> : vector<8x416xf32>
    %72 = tpu.matmul %71, %69, %cst_50 {dimension_numbers = #tpu.dot_dimension_numbers<[1], [0], [0], [1], [0, 0, 1, 1], [], []>} : vector<8x8xf32>, vector<8x416xf32>, vector<8x416xf32> -> vector<8x416xf32>
    %c0_51 = arith.constant 0 : index
    %c2_52 = arith.constant 2 : index
    %73 = vector.load %arg3[%c0_51, %c2_52] : memref<8x8xf32, #tpu.memory_space<vmem>>, vector<8x1xf32>
    %74 = vector.broadcast %73 : vector<8x1xf32> to vector<8x416xf32>
    %75 = arith.addf %72, %74 : vector<8x416xf32>
    %cst_53 = arith.constant 0.000000e+00 : f32
    %76 = vector.broadcast %cst_53 : f32 to vector<8x416xf32>
    %77 = arith.maximumf %75, %76 : vector<8x416xf32>
    %78 = vector.broadcast %6 : vector<1x416xf32> to vector<8x416xf32>
    %79 = arith.mulf %77, %78 : vector<8x416xf32>
    %c1_54 = arith.constant 1 : index
    %c0_55 = arith.constant 0 : index
    %c135_56 = arith.constant 135 : index
    %80 = vector.load %arg6[%c1_54, %c0_55, %c135_56] : memref<4x8x686xf32, #tpu.memory_space<vmem>>, vector<1x8x416xf32>
    %81 = vector.shape_cast %80 : vector<1x8x416xf32> to vector<8x416xf32>
    %82 = vector.shape_cast %79 : vector<8x416xf32> to vector<1x8x416xf32>
    tpu.vector_store %arg6[%c1_54, %c0_55, %c135_56], %82 {strides = array<i32>} : memref<4x8x686xf32, #tpu.memory_space<vmem>>, vector<1x8x416xf32>,
    %c0_57 = arith.constant 0 : index
    %c3_58 = arith.constant 3 : index
    %83 = vector.load %arg3[%c0_57, %c3_58] : memref<8x8xf32, #tpu.memory_space<vmem>>, vector<8x1xf32>
    %84 = vector.extract_strided_slice %5 {offsets = [0, 54], sizes = [8, 416], strides = [1, 1]} : vector<8x686xf32> to vector<8x416xf32>
    %c11 = arith.constant 11 : index
    %c0_59 = arith.constant 0 : index
    %c0_60 = arith.constant 0 : index
    %85 = vector.load %arg2[%c11, %c0_59, %c0_60] : memref<67x8x8xf32, #tpu.memory_space<vmem>>, vector<1x8x8xf32>
    %86 = vector.shape_cast %85 : vector<1x8x8xf32> to vector<8x8xf32>
    %cst_61 = arith.constant dense<0.000000e+00> : vector<8x416xf32>
    %87 = tpu.matmul %86, %84, %cst_61 {dimension_numbers = #tpu.dot_dimension_numbers<[1], [0], [0], [1], [0, 0, 1, 1], [], []>} : vector<8x8xf32>, vector<8x416xf32>, vector<8x416xf32> -> vector<8x416xf32>
    %88 = vector.broadcast %83 : vector<8x1xf32> to vector<8x416xf32>
    %89 = arith.addf %88, %87 : vector<8x416xf32>
    %90 = vector.extract_strided_slice %5 {offsets = [0, 57], sizes = [8, 416], strides = [1, 1]} : vector<8x686xf32> to vector<8x416xf32>
    %c12 = arith.constant 12 : index
    %c0_62 = arith.constant 0 : index
    %c0_63 = arith.constant 0 : index
    %91 = vector.load %arg2[%c12, %c0_62, %c0_63] : memref<67x8x8xf32, #tpu.memory_space<vmem>>, vector<1x8x8xf32>
    %92 = vector.shape_cast %91 : vector<1x8x8xf32> to vector<8x8xf32>
    %cst_64 = arith.constant dense<0.000000e+00> : vector<8x416xf32>
    %93 = tpu.matmul %92, %90, %cst_64 {dimension_numbers = #tpu.dot_dimension_numbers<[1], [0], [0], [1], [0, 0, 1, 1], [], []>} : vector<8x8xf32>, vector<8x416xf32>, vector<8x416xf32> -> vector<8x416xf32>
    %94 = arith.addf %89, %93 : vector<8x416xf32>
    %95 = vector.extract_strided_slice %5 {offsets = [0, 60], sizes = [8, 416], strides = [1, 1]} : vector<8x686xf32> to vector<8x416xf32>
    %c13 = arith.constant 13 : index
    %c0_65 = arith.constant 0 : index
    %c0_66 = arith.constant 0 : index
    %96 = vector.load %arg2[%c13, %c0_65, %c0_66] : memref<67x8x8xf32, #tpu.memory_space<vmem>>, vector<1x8x8xf32>
    %97 = vector.shape_cast %96 : vector<1x8x8xf32> to vector<8x8xf32>
    %cst_67 = arith.constant dense<0.000000e+00> : vector<8x416xf32>
    %98 = tpu.matmul %97, %95, %cst_67 {dimension_numbers = #tpu.dot_dimension_numbers<[1], [0], [0], [1], [0, 0, 1, 1], [], []>} : vector<8x8xf32>, vector<8x416xf32>, vector<8x416xf32> -> vector<8x416xf32>
    %99 = arith.addf %94, %98 : vector<8x416xf32>
    %100 = vector.extract_strided_slice %5 {offsets = [0, 132], sizes = [8, 416], strides = [1, 1]} : vector<8x686xf32> to vector<8x416xf32>
    %c14 = arith.constant 14 : index
    %c0_68 = arith.constant 0 : index
    %c0_69 = arith.constant 0 : index
    %101 = vector.load %arg2[%c14, %c0_68, %c0_69] : memref<67x8x8xf32, #tpu.memory_space<vmem>>, vector<1x8x8xf32>
    %102 = vector.shape_cast %101 : vector<1x8x8xf32> to vector<8x8xf32>
    %cst_70 = arith.constant dense<0.000000e+00> : vector<8x416xf32>
    %103 = tpu.matmul %102, %100, %cst_70 {dimension_numbers = #tpu.dot_dimension_numbers<[1], [0], [0], [1], [0, 0, 1, 1], [], []>} : vector<8x8xf32>, vector<8x416xf32>, vector<8x416xf32> -> vector<8x416xf32>
    %104 = arith.addf %99, %103 : vector<8x416xf32>
    %105 = vector.extract_strided_slice %5 {offsets = [0, 135], sizes = [8, 416], strides = [1, 1]} : vector<8x686xf32> to vector<8x416xf32>
    %c15 = arith.constant 15 : index
    %c0_71 = arith.constant 0 : index
    %c0_72 = arith.constant 0 : index
    %106 = vector.load %arg2[%c15, %c0_71, %c0_72] : memref<67x8x8xf32, #tpu.memory_space<vmem>>, vector<1x8x8xf32>
    %107 = vector.shape_cast %106 : vector<1x8x8xf32> to vector<8x8xf32>
    %cst_73 = arith.constant dense<0.000000e+00> : vector<8x416xf32>
    %108 = tpu.matmul %107, %105, %cst_73 {dimension_numbers = #tpu.dot_dimension_numbers<[1], [0], [0], [1], [0, 0, 1, 1], [], []>} : vector<8x8xf32>, vector<8x416xf32>, vector<8x416xf32> -> vector<8x416xf32>
    %109 = arith.addf %104, %108 : vector<8x416xf32>
    %110 = vector.extract_strided_slice %5 {offsets = [0, 138], sizes = [8, 416], strides = [1, 1]} : vector<8x686xf32> to vector<8x416xf32>
    %c16 = arith.constant 16 : index
    %c0_74 = arith.constant 0 : index
    %c0_75 = arith.constant 0 : index
    %111 = vector.load %arg2[%c16, %c0_74, %c0_75] : memref<67x8x8xf32, #tpu.memory_space<vmem>>, vector<1x8x8xf32>
    %112 = vector.shape_cast %111 : vector<1x8x8xf32> to vector<8x8xf32>
    %cst_76 = arith.constant dense<0.000000e+00> : vector<8x416xf32>
    %113 = tpu.matmul %112, %110, %cst_76 {dimension_numbers = #tpu.dot_dimension_numbers<[1], [0], [0], [1], [0, 0, 1, 1], [], []>} : vector<8x8xf32>, vector<8x416xf32>, vector<8x416xf32> -> vector<8x416xf32>
    %114 = arith.addf %109, %113 : vector<8x416xf32>
    %115 = vector.extract_strided_slice %5 {offsets = [0, 210], sizes = [8, 416], strides = [1, 1]} : vector<8x686xf32> to vector<8x416xf32>
    %c17 = arith.constant 17 : index
    %c0_77 = arith.constant 0 : index
    %c0_78 = arith.constant 0 : index
    %116 = vector.load %arg2[%c17, %c0_77, %c0_78] : memref<67x8x8xf32, #tpu.memory_space<vmem>>, vector<1x8x8xf32>
    %117 = vector.shape_cast %116 : vector<1x8x8xf32> to vector<8x8xf32>
    %cst_79 = arith.constant dense<0.000000e+00> : vector<8x416xf32>
    %118 = tpu.matmul %117, %115, %cst_79 {dimension_numbers = #tpu.dot_dimension_numbers<[1], [0], [0], [1], [0, 0, 1, 1], [], []>} : vector<8x8xf32>, vector<8x416xf32>, vector<8x416xf32> -> vector<8x416xf32>
    %119 = arith.addf %114, %118 : vector<8x416xf32>
    %120 = vector.extract_strided_slice %5 {offsets = [0, 213], sizes = [8, 416], strides = [1, 1]} : vector<8x686xf32> to vector<8x416xf32>
    %c18 = arith.constant 18 : index
    %c0_80 = arith.constant 0 : index
    %c0_81 = arith.constant 0 : index
    %121 = vector.load %arg2[%c18, %c0_80, %c0_81] : memref<67x8x8xf32, #tpu.memory_space<vmem>>, vector<1x8x8xf32>
    %122 = vector.shape_cast %121 : vector<1x8x8xf32> to vector<8x8xf32>
    %cst_82 = arith.constant dense<0.000000e+00> : vector<8x416xf32>
    %123 = tpu.matmul %122, %120, %cst_82 {dimension_numbers = #tpu.dot_dimension_numbers<[1], [0], [0], [1], [0, 0, 1, 1], [], []>} : vector<8x8xf32>, vector<8x416xf32>, vector<8x416xf32> -> vector<8x416xf32>
    %124 = arith.addf %119, %123 : vector<8x416xf32>
    %125 = vector.extract_strided_slice %5 {offsets = [0, 216], sizes = [8, 416], strides = [1, 1]} : vector<8x686xf32> to vector<8x416xf32>
    %c19 = arith.constant 19 : index
    %c0_83 = arith.constant 0 : index
    %c0_84 = arith.constant 0 : index
    %126 = vector.load %arg2[%c19, %c0_83, %c0_84] : memref<67x8x8xf32, #tpu.memory_space<vmem>>, vector<1x8x8xf32>
    %127 = vector.shape_cast %126 : vector<1x8x8xf32> to vector<8x8xf32>
    %cst_85 = arith.constant dense<0.000000e+00> : vector<8x416xf32>
    %128 = tpu.matmul %127, %125, %cst_85 {dimension_numbers = #tpu.dot_dimension_numbers<[1], [0], [0], [1], [0, 0, 1, 1], [], []>} : vector<8x8xf32>, vector<8x416xf32>, vector<8x416xf32> -> vector<8x416xf32>
    %129 = arith.addf %124, %128 : vector<8x416xf32>
    %cst_86 = arith.constant 0.000000e+00 : f32
    %130 = vector.broadcast %cst_86 : f32 to vector<8x416xf32>
    %131 = arith.maximumf %129, %130 : vector<8x416xf32>
    %c20 = arith.constant 20 : index
    %c0_87 = arith.constant 0 : index
    %c0_88 = arith.constant 0 : index
    %132 = vector.load %arg2[%c20, %c0_87, %c0_88] : memref<67x8x8xf32, #tpu.memory_space<vmem>>, vector<1x8x8xf32>
    %133 = vector.shape_cast %132 : vector<1x8x8xf32> to vector<8x8xf32>
    %cst_89 = arith.constant dense<0.000000e+00> : vector<8x416xf32>
    %134 = tpu.matmul %133, %131, %cst_89 {dimension_numbers = #tpu.dot_dimension_numbers<[1], [0], [0], [1], [0, 0, 1, 1], [], []>} : vector<8x8xf32>, vector<8x416xf32>, vector<8x416xf32> -> vector<8x416xf32>
    %c0_90 = arith.constant 0 : index
    %c4_91 = arith.constant 4 : index
    %135 = vector.load %arg3[%c0_90, %c4_91] : memref<8x8xf32, #tpu.memory_space<vmem>>, vector<8x1xf32>
    %136 = vector.broadcast %135 : vector<8x1xf32> to vector<8x416xf32>
    %137 = arith.addf %134, %136 : vector<8x416xf32>
    %cst_92 = arith.constant 0.000000e+00 : f32
    %138 = vector.broadcast %cst_92 : f32 to vector<8x416xf32>
    %139 = arith.maximumf %137, %138 : vector<8x416xf32>
    %140 = vector.broadcast %6 : vector<1x416xf32> to vector<8x416xf32>
    %141 = arith.mulf %139, %140 : vector<8x416xf32>
    %c2_93 = arith.constant 2 : index
    %c0_94 = arith.constant 0 : index
    %c135_95 = arith.constant 135 : index
    %142 = vector.load %arg6[%c2_93, %c0_94, %c135_95] : memref<4x8x686xf32, #tpu.memory_space<vmem>>, vector<1x8x416xf32>
    %143 = vector.shape_cast %142 : vector<1x8x416xf32> to vector<8x416xf32>
    %144 = vector.shape_cast %141 : vector<8x416xf32> to vector<1x8x416xf32>
    tpu.vector_store %arg6[%c2_93, %c0_94, %c135_95], %144 {strides = array<i32>} : memref<4x8x686xf32, #tpu.memory_space<vmem>>, vector<1x8x416xf32>,
    %c0_96 = arith.constant 0 : index
    %c5_97 = arith.constant 5 : index
    %145 = vector.load %arg3[%c0_96, %c5_97] : memref<8x8xf32, #tpu.memory_space<vmem>>, vector<8x1xf32>
    %146 = vector.extract_strided_slice %5 {offsets = [0, 0], sizes = [8, 416], strides = [1, 1]} : vector<8x686xf32> to vector<8x416xf32>
    %c21 = arith.constant 21 : index
    %c0_98 = arith.constant 0 : index
    %c0_99 = arith.constant 0 : index
    %147 = vector.load %arg2[%c21, %c0_98, %c0_99] : memref<67x8x8xf32, #tpu.memory_space<vmem>>, vector<1x8x8xf32>
    %148 = vector.shape_cast %147 : vector<1x8x8xf32> to vector<8x8xf32>
    %cst_100 = arith.constant dense<0.000000e+00> : vector<8x416xf32>
    %149 = tpu.matmul %148, %146, %cst_100 {dimension_numbers = #tpu.dot_dimension_numbers<[1], [0], [0], [1], [0, 0, 1, 1], [], []>} : vector<8x8xf32>, vector<8x416xf32>, vector<8x416xf32> -> vector<8x416xf32>
    %150 = vector.broadcast %145 : vector<8x1xf32> to vector<8x416xf32>
    %151 = arith.addf %150, %149 : vector<8x416xf32>
    %152 = vector.extract_strided_slice %5 {offsets = [0, 5], sizes = [8, 416], strides = [1, 1]} : vector<8x686xf32> to vector<8x416xf32>
    %c22 = arith.constant 22 : index
    %c0_101 = arith.constant 0 : index
    %c0_102 = arith.constant 0 : index
    %153 = vector.load %arg2[%c22, %c0_101, %c0_102] : memref<67x8x8xf32, #tpu.memory_space<vmem>>, vector<1x8x8xf32>
    %154 = vector.shape_cast %153 : vector<1x8x8xf32> to vector<8x8xf32>
    %cst_103 = arith.constant dense<0.000000e+00> : vector<8x416xf32>
    %155 = tpu.matmul %154, %152, %cst_103 {dimension_numbers = #tpu.dot_dimension_numbers<[1], [0], [0], [1], [0, 0, 1, 1], [], []>} : vector<8x8xf32>, vector<8x416xf32>, vector<8x416xf32> -> vector<8x416xf32>
    %156 = arith.addf %151, %155 : vector<8x416xf32>
    %157 = vector.extract_strided_slice %5 {offsets = [0, 10], sizes = [8, 416], strides = [1, 1]} : vector<8x686xf32> to vector<8x416xf32>
    %c23 = arith.constant 23 : index
    %c0_104 = arith.constant 0 : index
    %c0_105 = arith.constant 0 : index
    %158 = vector.load %arg2[%c23, %c0_104, %c0_105] : memref<67x8x8xf32, #tpu.memory_space<vmem>>, vector<1x8x8xf32>
    %159 = vector.shape_cast %158 : vector<1x8x8xf32> to vector<8x8xf32>
    %cst_106 = arith.constant dense<0.000000e+00> : vector<8x416xf32>
    %160 = tpu.matmul %159, %157, %cst_106 {dimension_numbers = #tpu.dot_dimension_numbers<[1], [0], [0], [1], [0, 0, 1, 1], [], []>} : vector<8x8xf32>, vector<8x416xf32>, vector<8x416xf32> -> vector<8x416xf32>
    %161 = arith.addf %156, %160 : vector<8x416xf32>
    %162 = vector.extract_strided_slice %5 {offsets = [0, 130], sizes = [8, 416], strides = [1, 1]} : vector<8x686xf32> to vector<8x416xf32>
    %c24 = arith.constant 24 : index
    %c0_107 = arith.constant 0 : index
    %c0_108 = arith.constant 0 : index
    %163 = vector.load %arg2[%c24, %c0_107, %c0_108] : memref<67x8x8xf32, #tpu.memory_space<vmem>>, vector<1x8x8xf32>
    %164 = vector.shape_cast %163 : vector<1x8x8xf32> to vector<8x8xf32>
    %cst_109 = arith.constant dense<0.000000e+00> : vector<8x416xf32>
    %165 = tpu.matmul %164, %162, %cst_109 {dimension_numbers = #tpu.dot_dimension_numbers<[1], [0], [0], [1], [0, 0, 1, 1], [], []>} : vector<8x8xf32>, vector<8x416xf32>, vector<8x416xf32> -> vector<8x416xf32>
    %166 = arith.addf %161, %165 : vector<8x416xf32>
    %167 = vector.extract_strided_slice %5 {offsets = [0, 135], sizes = [8, 416], strides = [1, 1]} : vector<8x686xf32> to vector<8x416xf32>
    %c25 = arith.constant 25 : index
    %c0_110 = arith.constant 0 : index
    %c0_111 = arith.constant 0 : index
    %168 = vector.load %arg2[%c25, %c0_110, %c0_111] : memref<67x8x8xf32, #tpu.memory_space<vmem>>, vector<1x8x8xf32>
    %169 = vector.shape_cast %168 : vector<1x8x8xf32> to vector<8x8xf32>
    %cst_112 = arith.constant dense<0.000000e+00> : vector<8x416xf32>
    %170 = tpu.matmul %169, %167, %cst_112 {dimension_numbers = #tpu.dot_dimension_numbers<[1], [0], [0], [1], [0, 0, 1, 1], [], []>} : vector<8x8xf32>, vector<8x416xf32>, vector<8x416xf32> -> vector<8x416xf32>
    %171 = arith.addf %166, %170 : vector<8x416xf32>
    %172 = vector.extract_strided_slice %5 {offsets = [0, 140], sizes = [8, 416], strides = [1, 1]} : vector<8x686xf32> to vector<8x416xf32>
    %c26 = arith.constant 26 : index
    %c0_113 = arith.constant 0 : index
    %c0_114 = arith.constant 0 : index
    %173 = vector.load %arg2[%c26, %c0_113, %c0_114] : memref<67x8x8xf32, #tpu.memory_space<vmem>>, vector<1x8x8xf32>
    %174 = vector.shape_cast %173 : vector<1x8x8xf32> to vector<8x8xf32>
    %cst_115 = arith.constant dense<0.000000e+00> : vector<8x416xf32>
    %175 = tpu.matmul %174, %172, %cst_115 {dimension_numbers = #tpu.dot_dimension_numbers<[1], [0], [0], [1], [0, 0, 1, 1], [], []>} : vector<8x8xf32>, vector<8x416xf32>, vector<8x416xf32> -> vector<8x416xf32>
    %176 = arith.addf %171, %175 : vector<8x416xf32>
    %177 = vector.extract_strided_slice %5 {offsets = [0, 260], sizes = [8, 416], strides = [1, 1]} : vector<8x686xf32> to vector<8x416xf32>
    %c27 = arith.constant 27 : index
    %c0_116 = arith.constant 0 : index
    %c0_117 = arith.constant 0 : index
    %178 = vector.load %arg2[%c27, %c0_116, %c0_117] : memref<67x8x8xf32, #tpu.memory_space<vmem>>, vector<1x8x8xf32>
    %179 = vector.shape_cast %178 : vector<1x8x8xf32> to vector<8x8xf32>
    %cst_118 = arith.constant dense<0.000000e+00> : vector<8x416xf32>
    %180 = tpu.matmul %179, %177, %cst_118 {dimension_numbers = #tpu.dot_dimension_numbers<[1], [0], [0], [1], [0, 0, 1, 1], [], []>} : vector<8x8xf32>, vector<8x416xf32>, vector<8x416xf32> -> vector<8x416xf32>
    %181 = arith.addf %176, %180 : vector<8x416xf32>
    %182 = vector.extract_strided_slice %5 {offsets = [0, 265], sizes = [8, 416], strides = [1, 1]} : vector<8x686xf32> to vector<8x416xf32>
    %c28 = arith.constant 28 : index
    %c0_119 = arith.constant 0 : index
    %c0_120 = arith.constant 0 : index
    %183 = vector.load %arg2[%c28, %c0_119, %c0_120] : memref<67x8x8xf32, #tpu.memory_space<vmem>>, vector<1x8x8xf32>
    %184 = vector.shape_cast %183 : vector<1x8x8xf32> to vector<8x8xf32>
    %cst_121 = arith.constant dense<0.000000e+00> : vector<8x416xf32>
    %185 = tpu.matmul %184, %182, %cst_121 {dimension_numbers = #tpu.dot_dimension_numbers<[1], [0], [0], [1], [0, 0, 1, 1], [], []>} : vector<8x8xf32>, vector<8x416xf32>, vector<8x416xf32> -> vector<8x416xf32>
    %186 = arith.addf %181, %185 : vector<8x416xf32>
    %187 = vector.extract_strided_slice %5 {offsets = [0, 270], sizes = [8, 416], strides = [1, 1]} : vector<8x686xf32> to vector<8x416xf32>
    %c29 = arith.constant 29 : index
    %c0_122 = arith.constant 0 : index
    %c0_123 = arith.constant 0 : index
    %188 = vector.load %arg2[%c29, %c0_122, %c0_123] : memref<67x8x8xf32, #tpu.memory_space<vmem>>, vector<1x8x8xf32>
    %189 = vector.shape_cast %188 : vector<1x8x8xf32> to vector<8x8xf32>
    %cst_124 = arith.constant dense<0.000000e+00> : vector<8x416xf32>
    %190 = tpu.matmul %189, %187, %cst_124 {dimension_numbers = #tpu.dot_dimension_numbers<[1], [0], [0], [1], [0, 0, 1, 1], [], []>} : vector<8x8xf32>, vector<8x416xf32>, vector<8x416xf32> -> vector<8x416xf32>
    %191 = arith.addf %186, %190 : vector<8x416xf32>
    %cst_125 = arith.constant 0.000000e+00 : f32
    %192 = vector.broadcast %cst_125 : f32 to vector<8x416xf32>
    %193 = arith.maximumf %191, %192 : vector<8x416xf32>
    %c30 = arith.constant 30 : index
    %c0_126 = arith.constant 0 : index
    %c0_127 = arith.constant 0 : index
    %194 = vector.load %arg2[%c30, %c0_126, %c0_127] : memref<67x8x8xf32, #tpu.memory_space<vmem>>, vector<1x8x8xf32>
    %195 = vector.shape_cast %194 : vector<1x8x8xf32> to vector<8x8xf32>
    %cst_128 = arith.constant dense<0.000000e+00> : vector<8x416xf32>
    %196 = tpu.matmul %195, %193, %cst_128 {dimension_numbers = #tpu.dot_dimension_numbers<[1], [0], [0], [1], [0, 0, 1, 1], [], []>} : vector<8x8xf32>, vector<8x416xf32>, vector<8x416xf32> -> vector<8x416xf32>
    %c0_129 = arith.constant 0 : index
    %c6_130 = arith.constant 6 : index
    %197 = vector.load %arg3[%c0_129, %c6_130] : memref<8x8xf32, #tpu.memory_space<vmem>>, vector<8x1xf32>
    %198 = vector.broadcast %197 : vector<8x1xf32> to vector<8x416xf32>
    %199 = arith.addf %196, %198 : vector<8x416xf32>
    %cst_131 = arith.constant 0.000000e+00 : f32
    %200 = vector.broadcast %cst_131 : f32 to vector<8x416xf32>
    %201 = arith.maximumf %199, %200 : vector<8x416xf32>
    %202 = vector.broadcast %6 : vector<1x416xf32> to vector<8x416xf32>
    %203 = arith.mulf %201, %202 : vector<8x416xf32>
    %c3_132 = arith.constant 3 : index
    %c0_133 = arith.constant 0 : index
    %c135_134 = arith.constant 135 : index
    %204 = vector.load %arg6[%c3_132, %c0_133, %c135_134] : memref<4x8x686xf32, #tpu.memory_space<vmem>>, vector<1x8x416xf32>
    %205 = vector.shape_cast %204 : vector<1x8x416xf32> to vector<8x416xf32>
    %206 = vector.shape_cast %203 : vector<8x416xf32> to vector<1x8x416xf32>
    tpu.vector_store %arg6[%c3_132, %c0_133, %c135_134], %206 {strides = array<i32>} : memref<4x8x686xf32, #tpu.memory_space<vmem>>, vector<1x8x416xf32>,
    %c0_135 = arith.constant 0 : index
    %c7_136 = arith.constant 7 : index
    %207 = vector.load %arg3[%c0_135, %c7_136] : memref<8x8xf32, #tpu.memory_space<vmem>>, vector<8x1xf32>
    %c0_137 = arith.constant 0 : index
    %c0_138 = arith.constant 0 : index
    %c0_139 = arith.constant 0 : index
    %208 = vector.load %arg6[%c0_137, %c0_138, %c0_139] : memref<4x8x686xf32, #tpu.memory_space<vmem>>, vector<1x8x686xf32>
    %209 = vector.shape_cast %208 : vector<1x8x686xf32> to vector<8x686xf32>
    %210 = vector.extract_strided_slice %209 {offsets = [0, 108], sizes = [8, 416], strides = [1, 1]} : vector<8x686xf32> to vector<8x416xf32>
    %c31 = arith.constant 31 : index
    %c0_140 = arith.constant 0 : index
    %c0_141 = arith.constant 0 : index
    %211 = vector.load %arg2[%c31, %c0_140, %c0_141] : memref<67x8x8xf32, #tpu.memory_space<vmem>>, vector<1x8x8xf32>
    %212 = vector.shape_cast %211 : vector<1x8x8xf32> to vector<8x8xf32>
    %cst_142 = arith.constant dense<0.000000e+00> : vector<8x416xf32>
    %213 = tpu.matmul %212, %210, %cst_142 {dimension_numbers = #tpu.dot_dimension_numbers<[1], [0], [0], [1], [0, 0, 1, 1], [], []>} : vector<8x8xf32>, vector<8x416xf32>, vector<8x416xf32> -> vector<8x416xf32>
    %214 = vector.broadcast %207 : vector<8x1xf32> to vector<8x416xf32>
    %215 = arith.addf %214, %213 : vector<8x416xf32>
    %216 = vector.extract_strided_slice %209 {offsets = [0, 109], sizes = [8, 416], strides = [1, 1]} : vector<8x686xf32> to vector<8x416xf32>
    %c32 = arith.constant 32 : index
    %c0_143 = arith.constant 0 : index
    %c0_144 = arith.constant 0 : index
    %217 = vector.load %arg2[%c32, %c0_143, %c0_144] : memref<67x8x8xf32, #tpu.memory_space<vmem>>, vector<1x8x8xf32>
    %218 = vector.shape_cast %217 : vector<1x8x8xf32> to vector<8x8xf32>
    %cst_145 = arith.constant dense<0.000000e+00> : vector<8x416xf32>
    %219 = tpu.matmul %218, %216, %cst_145 {dimension_numbers = #tpu.dot_dimension_numbers<[1], [0], [0], [1], [0, 0, 1, 1], [], []>} : vector<8x8xf32>, vector<8x416xf32>, vector<8x416xf32> -> vector<8x416xf32>
    %220 = arith.addf %215, %219 : vector<8x416xf32>
    %221 = vector.extract_strided_slice %209 {offsets = [0, 110], sizes = [8, 416], strides = [1, 1]} : vector<8x686xf32> to vector<8x416xf32>
    %c33 = arith.constant 33 : index
    %c0_146 = arith.constant 0 : index
    %c0_147 = arith.constant 0 : index
    %222 = vector.load %arg2[%c33, %c0_146, %c0_147] : memref<67x8x8xf32, #tpu.memory_space<vmem>>, vector<1x8x8xf32>
    %223 = vector.shape_cast %222 : vector<1x8x8xf32> to vector<8x8xf32>
    %cst_148 = arith.constant dense<0.000000e+00> : vector<8x416xf32>
    %224 = tpu.matmul %223, %221, %cst_148 {dimension_numbers = #tpu.dot_dimension_numbers<[1], [0], [0], [1], [0, 0, 1, 1], [], []>} : vector<8x8xf32>, vector<8x416xf32>, vector<8x416xf32> -> vector<8x416xf32>
    %225 = arith.addf %220, %224 : vector<8x416xf32>
    %226 = vector.extract_strided_slice %209 {offsets = [0, 134], sizes = [8, 416], strides = [1, 1]} : vector<8x686xf32> to vector<8x416xf32>
    %c34 = arith.constant 34 : index
    %c0_149 = arith.constant 0 : index
    %c0_150 = arith.constant 0 : index
    %227 = vector.load %arg2[%c34, %c0_149, %c0_150] : memref<67x8x8xf32, #tpu.memory_space<vmem>>, vector<1x8x8xf32>
    %228 = vector.shape_cast %227 : vector<1x8x8xf32> to vector<8x8xf32>
    %cst_151 = arith.constant dense<0.000000e+00> : vector<8x416xf32>
    %229 = tpu.matmul %228, %226, %cst_151 {dimension_numbers = #tpu.dot_dimension_numbers<[1], [0], [0], [1], [0, 0, 1, 1], [], []>} : vector<8x8xf32>, vector<8x416xf32>, vector<8x416xf32> -> vector<8x416xf32>
    %230 = arith.addf %225, %229 : vector<8x416xf32>
    %231 = vector.extract_strided_slice %209 {offsets = [0, 135], sizes = [8, 416], strides = [1, 1]} : vector<8x686xf32> to vector<8x416xf32>
    %c35 = arith.constant 35 : index
    %c0_152 = arith.constant 0 : index
    %c0_153 = arith.constant 0 : index
    %232 = vector.load %arg2[%c35, %c0_152, %c0_153] : memref<67x8x8xf32, #tpu.memory_space<vmem>>, vector<1x8x8xf32>
    %233 = vector.shape_cast %232 : vector<1x8x8xf32> to vector<8x8xf32>
    %cst_154 = arith.constant dense<0.000000e+00> : vector<8x416xf32>
    %234 = tpu.matmul %233, %231, %cst_154 {dimension_numbers = #tpu.dot_dimension_numbers<[1], [0], [0], [1], [0, 0, 1, 1], [], []>} : vector<8x8xf32>, vector<8x416xf32>, vector<8x416xf32> -> vector<8x416xf32>
    %235 = arith.addf %230, %234 : vector<8x416xf32>
    %236 = vector.extract_strided_slice %209 {offsets = [0, 136], sizes = [8, 416], strides = [1, 1]} : vector<8x686xf32> to vector<8x416xf32>
    %c36 = arith.constant 36 : index
    %c0_155 = arith.constant 0 : index
    %c0_156 = arith.constant 0 : index
    %237 = vector.load %arg2[%c36, %c0_155, %c0_156] : memref<67x8x8xf32, #tpu.memory_space<vmem>>, vector<1x8x8xf32>
    %238 = vector.shape_cast %237 : vector<1x8x8xf32> to vector<8x8xf32>
    %cst_157 = arith.constant dense<0.000000e+00> : vector<8x416xf32>
    %239 = tpu.matmul %238, %236, %cst_157 {dimension_numbers = #tpu.dot_dimension_numbers<[1], [0], [0], [1], [0, 0, 1, 1], [], []>} : vector<8x8xf32>, vector<8x416xf32>, vector<8x416xf32> -> vector<8x416xf32>
    %240 = arith.addf %235, %239 : vector<8x416xf32>
    %241 = vector.extract_strided_slice %209 {offsets = [0, 160], sizes = [8, 416], strides = [1, 1]} : vector<8x686xf32> to vector<8x416xf32>
    %c37 = arith.constant 37 : index
    %c0_158 = arith.constant 0 : index
    %c0_159 = arith.constant 0 : index
    %242 = vector.load %arg2[%c37, %c0_158, %c0_159] : memref<67x8x8xf32, #tpu.memory_space<vmem>>, vector<1x8x8xf32>
    %243 = vector.shape_cast %242 : vector<1x8x8xf32> to vector<8x8xf32>
    %cst_160 = arith.constant dense<0.000000e+00> : vector<8x416xf32>
    %244 = tpu.matmul %243, %241, %cst_160 {dimension_numbers = #tpu.dot_dimension_numbers<[1], [0], [0], [1], [0, 0, 1, 1], [], []>} : vector<8x8xf32>, vector<8x416xf32>, vector<8x416xf32> -> vector<8x416xf32>
    %245 = arith.addf %240, %244 : vector<8x416xf32>
    %246 = vector.extract_strided_slice %209 {offsets = [0, 161], sizes = [8, 416], strides = [1, 1]} : vector<8x686xf32> to vector<8x416xf32>
    %c38 = arith.constant 38 : index
    %c0_161 = arith.constant 0 : index
    %c0_162 = arith.constant 0 : index
    %247 = vector.load %arg2[%c38, %c0_161, %c0_162] : memref<67x8x8xf32, #tpu.memory_space<vmem>>, vector<1x8x8xf32>
    %248 = vector.shape_cast %247 : vector<1x8x8xf32> to vector<8x8xf32>
    %cst_163 = arith.constant dense<0.000000e+00> : vector<8x416xf32>
    %249 = tpu.matmul %248, %246, %cst_163 {dimension_numbers = #tpu.dot_dimension_numbers<[1], [0], [0], [1], [0, 0, 1, 1], [], []>} : vector<8x8xf32>, vector<8x416xf32>, vector<8x416xf32> -> vector<8x416xf32>
    %250 = arith.addf %245, %249 : vector<8x416xf32>
    %251 = vector.extract_strided_slice %209 {offsets = [0, 162], sizes = [8, 416], strides = [1, 1]} : vector<8x686xf32> to vector<8x416xf32>
    %c39 = arith.constant 39 : index
    %c0_164 = arith.constant 0 : index
    %c0_165 = arith.constant 0 : index
    %252 = vector.load %arg2[%c39, %c0_164, %c0_165] : memref<67x8x8xf32, #tpu.memory_space<vmem>>, vector<1x8x8xf32>
    %253 = vector.shape_cast %252 : vector<1x8x8xf32> to vector<8x8xf32>
    %cst_166 = arith.constant dense<0.000000e+00> : vector<8x416xf32>
    %254 = tpu.matmul %253, %251, %cst_166 {dimension_numbers = #tpu.dot_dimension_numbers<[1], [0], [0], [1], [0, 0, 1, 1], [], []>} : vector<8x8xf32>, vector<8x416xf32>, vector<8x416xf32> -> vector<8x416xf32>
    %255 = arith.addf %250, %254 : vector<8x416xf32>
    %c1_167 = arith.constant 1 : index
    %c0_168 = arith.constant 0 : index
    %c0_169 = arith.constant 0 : index
    %256 = vector.load %arg6[%c1_167, %c0_168, %c0_169] : memref<4x8x686xf32, #tpu.memory_space<vmem>>, vector<1x8x686xf32>
    %257 = vector.shape_cast %256 : vector<1x8x686xf32> to vector<8x686xf32>
    %258 = vector.extract_strided_slice %257 {offsets = [0, 108], sizes = [8, 416], strides = [1, 1]} : vector<8x686xf32> to vector<8x416xf32>
    %c40 = arith.constant 40 : index
    %c0_170 = arith.constant 0 : index
    %c0_171 = arith.constant 0 : index
    %259 = vector.load %arg2[%c40, %c0_170, %c0_171] : memref<67x8x8xf32, #tpu.memory_space<vmem>>, vector<1x8x8xf32>
    %260 = vector.shape_cast %259 : vector<1x8x8xf32> to vector<8x8xf32>
    %cst_172 = arith.constant dense<0.000000e+00> : vector<8x416xf32>
    %261 = tpu.matmul %260, %258, %cst_172 {dimension_numbers = #tpu.dot_dimension_numbers<[1], [0], [0], [1], [0, 0, 1, 1], [], []>} : vector<8x8xf32>, vector<8x416xf32>, vector<8x416xf32> -> vector<8x416xf32>
    %262 = arith.addf %255, %261 : vector<8x416xf32>
    %263 = vector.extract_strided_slice %257 {offsets = [0, 109], sizes = [8, 416], strides = [1, 1]} : vector<8x686xf32> to vector<8x416xf32>
    %c41 = arith.constant 41 : index
    %c0_173 = arith.constant 0 : index
    %c0_174 = arith.constant 0 : index
    %264 = vector.load %arg2[%c41, %c0_173, %c0_174] : memref<67x8x8xf32, #tpu.memory_space<vmem>>, vector<1x8x8xf32>
    %265 = vector.shape_cast %264 : vector<1x8x8xf32> to vector<8x8xf32>
    %cst_175 = arith.constant dense<0.000000e+00> : vector<8x416xf32>
    %266 = tpu.matmul %265, %263, %cst_175 {dimension_numbers = #tpu.dot_dimension_numbers<[1], [0], [0], [1], [0, 0, 1, 1], [], []>} : vector<8x8xf32>, vector<8x416xf32>, vector<8x416xf32> -> vector<8x416xf32>
    %267 = arith.addf %262, %266 : vector<8x416xf32>
    %268 = vector.extract_strided_slice %257 {offsets = [0, 110], sizes = [8, 416], strides = [1, 1]} : vector<8x686xf32> to vector<8x416xf32>
    %c42 = arith.constant 42 : index
    %c0_176 = arith.constant 0 : index
    %c0_177 = arith.constant 0 : index
    %269 = vector.load %arg2[%c42, %c0_176, %c0_177] : memref<67x8x8xf32, #tpu.memory_space<vmem>>, vector<1x8x8xf32>
    %270 = vector.shape_cast %269 : vector<1x8x8xf32> to vector<8x8xf32>
    %cst_178 = arith.constant dense<0.000000e+00> : vector<8x416xf32>
    %271 = tpu.matmul %270, %268, %cst_178 {dimension_numbers = #tpu.dot_dimension_numbers<[1], [0], [0], [1], [0, 0, 1, 1], [], []>} : vector<8x8xf32>, vector<8x416xf32>, vector<8x416xf32> -> vector<8x416xf32>
    %272 = arith.addf %267, %271 : vector<8x416xf32>
    %273 = vector.extract_strided_slice %257 {offsets = [0, 134], sizes = [8, 416], strides = [1, 1]} : vector<8x686xf32> to vector<8x416xf32>
    %c43 = arith.constant 43 : index
    %c0_179 = arith.constant 0 : index
    %c0_180 = arith.constant 0 : index
    %274 = vector.load %arg2[%c43, %c0_179, %c0_180] : memref<67x8x8xf32, #tpu.memory_space<vmem>>, vector<1x8x8xf32>
    %275 = vector.shape_cast %274 : vector<1x8x8xf32> to vector<8x8xf32>
    %cst_181 = arith.constant dense<0.000000e+00> : vector<8x416xf32>
    %276 = tpu.matmul %275, %273, %cst_181 {dimension_numbers = #tpu.dot_dimension_numbers<[1], [0], [0], [1], [0, 0, 1, 1], [], []>} : vector<8x8xf32>, vector<8x416xf32>, vector<8x416xf32> -> vector<8x416xf32>
    %277 = arith.addf %272, %276 : vector<8x416xf32>
    %278 = vector.extract_strided_slice %257 {offsets = [0, 135], sizes = [8, 416], strides = [1, 1]} : vector<8x686xf32> to vector<8x416xf32>
    %c44 = arith.constant 44 : index
    %c0_182 = arith.constant 0 : index
    %c0_183 = arith.constant 0 : index
    %279 = vector.load %arg2[%c44, %c0_182, %c0_183] : memref<67x8x8xf32, #tpu.memory_space<vmem>>, vector<1x8x8xf32>
    %280 = vector.shape_cast %279 : vector<1x8x8xf32> to vector<8x8xf32>
    %cst_184 = arith.constant dense<0.000000e+00> : vector<8x416xf32>
    %281 = tpu.matmul %280, %278, %cst_184 {dimension_numbers = #tpu.dot_dimension_numbers<[1], [0], [0], [1], [0, 0, 1, 1], [], []>} : vector<8x8xf32>, vector<8x416xf32>, vector<8x416xf32> -> vector<8x416xf32>
    %282 = arith.addf %277, %281 : vector<8x416xf32>
    %283 = vector.extract_strided_slice %257 {offsets = [0, 136], sizes = [8, 416], strides = [1, 1]} : vector<8x686xf32> to vector<8x416xf32>
    %c45 = arith.constant 45 : index
    %c0_185 = arith.constant 0 : index
    %c0_186 = arith.constant 0 : index
    %284 = vector.load %arg2[%c45, %c0_185, %c0_186] : memref<67x8x8xf32, #tpu.memory_space<vmem>>, vector<1x8x8xf32>
    %285 = vector.shape_cast %284 : vector<1x8x8xf32> to vector<8x8xf32>
    %cst_187 = arith.constant dense<0.000000e+00> : vector<8x416xf32>
    %286 = tpu.matmul %285, %283, %cst_187 {dimension_numbers = #tpu.dot_dimension_numbers<[1], [0], [0], [1], [0, 0, 1, 1], [], []>} : vector<8x8xf32>, vector<8x416xf32>, vector<8x416xf32> -> vector<8x416xf32>
    %287 = arith.addf %282, %286 : vector<8x416xf32>
    %288 = vector.extract_strided_slice %257 {offsets = [0, 160], sizes = [8, 416], strides = [1, 1]} : vector<8x686xf32> to vector<8x416xf32>
    %c46 = arith.constant 46 : index
    %c0_188 = arith.constant 0 : index
    %c0_189 = arith.constant 0 : index
    %289 = vector.load %arg2[%c46, %c0_188, %c0_189] : memref<67x8x8xf32, #tpu.memory_space<vmem>>, vector<1x8x8xf32>
    %290 = vector.shape_cast %289 : vector<1x8x8xf32> to vector<8x8xf32>
    %cst_190 = arith.constant dense<0.000000e+00> : vector<8x416xf32>
    %291 = tpu.matmul %290, %288, %cst_190 {dimension_numbers = #tpu.dot_dimension_numbers<[1], [0], [0], [1], [0, 0, 1, 1], [], []>} : vector<8x8xf32>, vector<8x416xf32>, vector<8x416xf32> -> vector<8x416xf32>
    %292 = arith.addf %287, %291 : vector<8x416xf32>
    %293 = vector.extract_strided_slice %257 {offsets = [0, 161], sizes = [8, 416], strides = [1, 1]} : vector<8x686xf32> to vector<8x416xf32>
    %c47 = arith.constant 47 : index
    %c0_191 = arith.constant 0 : index
    %c0_192 = arith.constant 0 : index
    %294 = vector.load %arg2[%c47, %c0_191, %c0_192] : memref<67x8x8xf32, #tpu.memory_space<vmem>>, vector<1x8x8xf32>
    %295 = vector.shape_cast %294 : vector<1x8x8xf32> to vector<8x8xf32>
    %cst_193 = arith.constant dense<0.000000e+00> : vector<8x416xf32>
    %296 = tpu.matmul %295, %293, %cst_193 {dimension_numbers = #tpu.dot_dimension_numbers<[1], [0], [0], [1], [0, 0, 1, 1], [], []>} : vector<8x8xf32>, vector<8x416xf32>, vector<8x416xf32> -> vector<8x416xf32>
    %297 = arith.addf %292, %296 : vector<8x416xf32>
    %298 = vector.extract_strided_slice %257 {offsets = [0, 162], sizes = [8, 416], strides = [1, 1]} : vector<8x686xf32> to vector<8x416xf32>
    %c48 = arith.constant 48 : index
    %c0_194 = arith.constant 0 : index
    %c0_195 = arith.constant 0 : index
    %299 = vector.load %arg2[%c48, %c0_194, %c0_195] : memref<67x8x8xf32, #tpu.memory_space<vmem>>, vector<1x8x8xf32>
    %300 = vector.shape_cast %299 : vector<1x8x8xf32> to vector<8x8xf32>
    %cst_196 = arith.constant dense<0.000000e+00> : vector<8x416xf32>
    %301 = tpu.matmul %300, %298, %cst_196 {dimension_numbers = #tpu.dot_dimension_numbers<[1], [0], [0], [1], [0, 0, 1, 1], [], []>} : vector<8x8xf32>, vector<8x416xf32>, vector<8x416xf32> -> vector<8x416xf32>
    %302 = arith.addf %297, %301 : vector<8x416xf32>
    %c2_197 = arith.constant 2 : index
    %c0_198 = arith.constant 0 : index
    %c0_199 = arith.constant 0 : index
    %303 = vector.load %arg6[%c2_197, %c0_198, %c0_199] : memref<4x8x686xf32, #tpu.memory_space<vmem>>, vector<1x8x686xf32>
    %304 = vector.shape_cast %303 : vector<1x8x686xf32> to vector<8x686xf32>
    %305 = vector.extract_strided_slice %304 {offsets = [0, 108], sizes = [8, 416], strides = [1, 1]} : vector<8x686xf32> to vector<8x416xf32>
    %c49 = arith.constant 49 : index
    %c0_200 = arith.constant 0 : index
    %c0_201 = arith.constant 0 : index
    %306 = vector.load %arg2[%c49, %c0_200, %c0_201] : memref<67x8x8xf32, #tpu.memory_space<vmem>>, vector<1x8x8xf32>
    %307 = vector.shape_cast %306 : vector<1x8x8xf32> to vector<8x8xf32>
    %cst_202 = arith.constant dense<0.000000e+00> : vector<8x416xf32>
    %308 = tpu.matmul %307, %305, %cst_202 {dimension_numbers = #tpu.dot_dimension_numbers<[1], [0], [0], [1], [0, 0, 1, 1], [], []>} : vector<8x8xf32>, vector<8x416xf32>, vector<8x416xf32> -> vector<8x416xf32>
    %309 = arith.addf %302, %308 : vector<8x416xf32>
    %310 = vector.extract_strided_slice %304 {offsets = [0, 109], sizes = [8, 416], strides = [1, 1]} : vector<8x686xf32> to vector<8x416xf32>
    %c50 = arith.constant 50 : index
    %c0_203 = arith.constant 0 : index
    %c0_204 = arith.constant 0 : index
    %311 = vector.load %arg2[%c50, %c0_203, %c0_204] : memref<67x8x8xf32, #tpu.memory_space<vmem>>, vector<1x8x8xf32>
    %312 = vector.shape_cast %311 : vector<1x8x8xf32> to vector<8x8xf32>
    %cst_205 = arith.constant dense<0.000000e+00> : vector<8x416xf32>
    %313 = tpu.matmul %312, %310, %cst_205 {dimension_numbers = #tpu.dot_dimension_numbers<[1], [0], [0], [1], [0, 0, 1, 1], [], []>} : vector<8x8xf32>, vector<8x416xf32>, vector<8x416xf32> -> vector<8x416xf32>
    %314 = arith.addf %309, %313 : vector<8x416xf32>
    %315 = vector.extract_strided_slice %304 {offsets = [0, 110], sizes = [8, 416], strides = [1, 1]} : vector<8x686xf32> to vector<8x416xf32>
    %c51 = arith.constant 51 : index
    %c0_206 = arith.constant 0 : index
    %c0_207 = arith.constant 0 : index
    %316 = vector.load %arg2[%c51, %c0_206, %c0_207] : memref<67x8x8xf32, #tpu.memory_space<vmem>>, vector<1x8x8xf32>
    %317 = vector.shape_cast %316 : vector<1x8x8xf32> to vector<8x8xf32>
    %cst_208 = arith.constant dense<0.000000e+00> : vector<8x416xf32>
    %318 = tpu.matmul %317, %315, %cst_208 {dimension_numbers = #tpu.dot_dimension_numbers<[1], [0], [0], [1], [0, 0, 1, 1], [], []>} : vector<8x8xf32>, vector<8x416xf32>, vector<8x416xf32> -> vector<8x416xf32>
    %319 = arith.addf %314, %318 : vector<8x416xf32>
    %320 = vector.extract_strided_slice %304 {offsets = [0, 134], sizes = [8, 416], strides = [1, 1]} : vector<8x686xf32> to vector<8x416xf32>
    %c52 = arith.constant 52 : index
    %c0_209 = arith.constant 0 : index
    %c0_210 = arith.constant 0 : index
    %321 = vector.load %arg2[%c52, %c0_209, %c0_210] : memref<67x8x8xf32, #tpu.memory_space<vmem>>, vector<1x8x8xf32>
    %322 = vector.shape_cast %321 : vector<1x8x8xf32> to vector<8x8xf32>
    %cst_211 = arith.constant dense<0.000000e+00> : vector<8x416xf32>
    %323 = tpu.matmul %322, %320, %cst_211 {dimension_numbers = #tpu.dot_dimension_numbers<[1], [0], [0], [1], [0, 0, 1, 1], [], []>} : vector<8x8xf32>, vector<8x416xf32>, vector<8x416xf32> -> vector<8x416xf32>
    %324 = arith.addf %319, %323 : vector<8x416xf32>
    %325 = vector.extract_strided_slice %304 {offsets = [0, 135], sizes = [8, 416], strides = [1, 1]} : vector<8x686xf32> to vector<8x416xf32>
    %c53 = arith.constant 53 : index
    %c0_212 = arith.constant 0 : index
    %c0_213 = arith.constant 0 : index
    %326 = vector.load %arg2[%c53, %c0_212, %c0_213] : memref<67x8x8xf32, #tpu.memory_space<vmem>>, vector<1x8x8xf32>
    %327 = vector.shape_cast %326 : vector<1x8x8xf32> to vector<8x8xf32>
    %cst_214 = arith.constant dense<0.000000e+00> : vector<8x416xf32>
    %328 = tpu.matmul %327, %325, %cst_214 {dimension_numbers = #tpu.dot_dimension_numbers<[1], [0], [0], [1], [0, 0, 1, 1], [], []>} : vector<8x8xf32>, vector<8x416xf32>, vector<8x416xf32> -> vector<8x416xf32>
    %329 = arith.addf %324, %328 : vector<8x416xf32>
    %330 = vector.extract_strided_slice %304 {offsets = [0, 136], sizes = [8, 416], strides = [1, 1]} : vector<8x686xf32> to vector<8x416xf32>
    %c54 = arith.constant 54 : index
    %c0_215 = arith.constant 0 : index
    %c0_216 = arith.constant 0 : index
    %331 = vector.load %arg2[%c54, %c0_215, %c0_216] : memref<67x8x8xf32, #tpu.memory_space<vmem>>, vector<1x8x8xf32>
    %332 = vector.shape_cast %331 : vector<1x8x8xf32> to vector<8x8xf32>
    %cst_217 = arith.constant dense<0.000000e+00> : vector<8x416xf32>
    %333 = tpu.matmul %332, %330, %cst_217 {dimension_numbers = #tpu.dot_dimension_numbers<[1], [0], [0], [1], [0, 0, 1, 1], [], []>} : vector<8x8xf32>, vector<8x416xf32>, vector<8x416xf32> -> vector<8x416xf32>
    %334 = arith.addf %329, %333 : vector<8x416xf32>
    %335 = vector.extract_strided_slice %304 {offsets = [0, 160], sizes = [8, 416], strides = [1, 1]} : vector<8x686xf32> to vector<8x416xf32>
    %c55 = arith.constant 55 : index
    %c0_218 = arith.constant 0 : index
    %c0_219 = arith.constant 0 : index
    %336 = vector.load %arg2[%c55, %c0_218, %c0_219] : memref<67x8x8xf32, #tpu.memory_space<vmem>>, vector<1x8x8xf32>
    %337 = vector.shape_cast %336 : vector<1x8x8xf32> to vector<8x8xf32>
    %cst_220 = arith.constant dense<0.000000e+00> : vector<8x416xf32>
    %338 = tpu.matmul %337, %335, %cst_220 {dimension_numbers = #tpu.dot_dimension_numbers<[1], [0], [0], [1], [0, 0, 1, 1], [], []>} : vector<8x8xf32>, vector<8x416xf32>, vector<8x416xf32> -> vector<8x416xf32>
    %339 = arith.addf %334, %338 : vector<8x416xf32>
    %340 = vector.extract_strided_slice %304 {offsets = [0, 161], sizes = [8, 416], strides = [1, 1]} : vector<8x686xf32> to vector<8x416xf32>
    %c56 = arith.constant 56 : index
    %c0_221 = arith.constant 0 : index
    %c0_222 = arith.constant 0 : index
    %341 = vector.load %arg2[%c56, %c0_221, %c0_222] : memref<67x8x8xf32, #tpu.memory_space<vmem>>, vector<1x8x8xf32>
    %342 = vector.shape_cast %341 : vector<1x8x8xf32> to vector<8x8xf32>
    %cst_223 = arith.constant dense<0.000000e+00> : vector<8x416xf32>
    %343 = tpu.matmul %342, %340, %cst_223 {dimension_numbers = #tpu.dot_dimension_numbers<[1], [0], [0], [1], [0, 0, 1, 1], [], []>} : vector<8x8xf32>, vector<8x416xf32>, vector<8x416xf32> -> vector<8x416xf32>
    %344 = arith.addf %339, %343 : vector<8x416xf32>
    %345 = vector.extract_strided_slice %304 {offsets = [0, 162], sizes = [8, 416], strides = [1, 1]} : vector<8x686xf32> to vector<8x416xf32>
    %c57 = arith.constant 57 : index
    %c0_224 = arith.constant 0 : index
    %c0_225 = arith.constant 0 : index
    %346 = vector.load %arg2[%c57, %c0_224, %c0_225] : memref<67x8x8xf32, #tpu.memory_space<vmem>>, vector<1x8x8xf32>
    %347 = vector.shape_cast %346 : vector<1x8x8xf32> to vector<8x8xf32>
    %cst_226 = arith.constant dense<0.000000e+00> : vector<8x416xf32>
    %348 = tpu.matmul %347, %345, %cst_226 {dimension_numbers = #tpu.dot_dimension_numbers<[1], [0], [0], [1], [0, 0, 1, 1], [], []>} : vector<8x8xf32>, vector<8x416xf32>, vector<8x416xf32> -> vector<8x416xf32>
    %349 = arith.addf %344, %348 : vector<8x416xf32>
    %c3_227 = arith.constant 3 : index
    %c0_228 = arith.constant 0 : index
    %c0_229 = arith.constant 0 : index
    %350 = vector.load %arg6[%c3_227, %c0_228, %c0_229] : memref<4x8x686xf32, #tpu.memory_space<vmem>>, vector<1x8x686xf32>
    %351 = vector.shape_cast %350 : vector<1x8x686xf32> to vector<8x686xf32>
    %352 = vector.extract_strided_slice %351 {offsets = [0, 108], sizes = [8, 416], strides = [1, 1]} : vector<8x686xf32> to vector<8x416xf32>
    %c58 = arith.constant 58 : index
    %c0_230 = arith.constant 0 : index
    %c0_231 = arith.constant 0 : index
    %353 = vector.load %arg2[%c58, %c0_230, %c0_231] : memref<67x8x8xf32, #tpu.memory_space<vmem>>, vector<1x8x8xf32>
    %354 = vector.shape_cast %353 : vector<1x8x8xf32> to vector<8x8xf32>
    %cst_232 = arith.constant dense<0.000000e+00> : vector<8x416xf32>
    %355 = tpu.matmul %354, %352, %cst_232 {dimension_numbers = #tpu.dot_dimension_numbers<[1], [0], [0], [1], [0, 0, 1, 1], [], []>} : vector<8x8xf32>, vector<8x416xf32>, vector<8x416xf32> -> vector<8x416xf32>
    %356 = arith.addf %349, %355 : vector<8x416xf32>
    %357 = vector.extract_strided_slice %351 {offsets = [0, 109], sizes = [8, 416], strides = [1, 1]} : vector<8x686xf32> to vector<8x416xf32>
    %c59 = arith.constant 59 : index
    %c0_233 = arith.constant 0 : index
    %c0_234 = arith.constant 0 : index
    %358 = vector.load %arg2[%c59, %c0_233, %c0_234] : memref<67x8x8xf32, #tpu.memory_space<vmem>>, vector<1x8x8xf32>
    %359 = vector.shape_cast %358 : vector<1x8x8xf32> to vector<8x8xf32>
    %cst_235 = arith.constant dense<0.000000e+00> : vector<8x416xf32>
    %360 = tpu.matmul %359, %357, %cst_235 {dimension_numbers = #tpu.dot_dimension_numbers<[1], [0], [0], [1], [0, 0, 1, 1], [], []>} : vector<8x8xf32>, vector<8x416xf32>, vector<8x416xf32> -> vector<8x416xf32>
    %361 = arith.addf %356, %360 : vector<8x416xf32>
    %362 = vector.extract_strided_slice %351 {offsets = [0, 110], sizes = [8, 416], strides = [1, 1]} : vector<8x686xf32> to vector<8x416xf32>
    %c60 = arith.constant 60 : index
    %c0_236 = arith.constant 0 : index
    %c0_237 = arith.constant 0 : index
    %363 = vector.load %arg2[%c60, %c0_236, %c0_237] : memref<67x8x8xf32, #tpu.memory_space<vmem>>, vector<1x8x8xf32>
    %364 = vector.shape_cast %363 : vector<1x8x8xf32> to vector<8x8xf32>
    %cst_238 = arith.constant dense<0.000000e+00> : vector<8x416xf32>
    %365 = tpu.matmul %364, %362, %cst_238 {dimension_numbers = #tpu.dot_dimension_numbers<[1], [0], [0], [1], [0, 0, 1, 1], [], []>} : vector<8x8xf32>, vector<8x416xf32>, vector<8x416xf32> -> vector<8x416xf32>
    %366 = arith.addf %361, %365 : vector<8x416xf32>
    %367 = vector.extract_strided_slice %351 {offsets = [0, 134], sizes = [8, 416], strides = [1, 1]} : vector<8x686xf32> to vector<8x416xf32>
    %c61 = arith.constant 61 : index
    %c0_239 = arith.constant 0 : index
    %c0_240 = arith.constant 0 : index
    %368 = vector.load %arg2[%c61, %c0_239, %c0_240] : memref<67x8x8xf32, #tpu.memory_space<vmem>>, vector<1x8x8xf32>
    %369 = vector.shape_cast %368 : vector<1x8x8xf32> to vector<8x8xf32>
    %cst_241 = arith.constant dense<0.000000e+00> : vector<8x416xf32>
    %370 = tpu.matmul %369, %367, %cst_241 {dimension_numbers = #tpu.dot_dimension_numbers<[1], [0], [0], [1], [0, 0, 1, 1], [], []>} : vector<8x8xf32>, vector<8x416xf32>, vector<8x416xf32> -> vector<8x416xf32>
    %371 = arith.addf %366, %370 : vector<8x416xf32>
    %372 = vector.extract_strided_slice %351 {offsets = [0, 135], sizes = [8, 416], strides = [1, 1]} : vector<8x686xf32> to vector<8x416xf32>
    %c62 = arith.constant 62 : index
    %c0_242 = arith.constant 0 : index
    %c0_243 = arith.constant 0 : index
    %373 = vector.load %arg2[%c62, %c0_242, %c0_243] : memref<67x8x8xf32, #tpu.memory_space<vmem>>, vector<1x8x8xf32>
    %374 = vector.shape_cast %373 : vector<1x8x8xf32> to vector<8x8xf32>
    %cst_244 = arith.constant dense<0.000000e+00> : vector<8x416xf32>
    %375 = tpu.matmul %374, %372, %cst_244 {dimension_numbers = #tpu.dot_dimension_numbers<[1], [0], [0], [1], [0, 0, 1, 1], [], []>} : vector<8x8xf32>, vector<8x416xf32>, vector<8x416xf32> -> vector<8x416xf32>
    %376 = arith.addf %371, %375 : vector<8x416xf32>
    %377 = vector.extract_strided_slice %351 {offsets = [0, 136], sizes = [8, 416], strides = [1, 1]} : vector<8x686xf32> to vector<8x416xf32>
    %c63 = arith.constant 63 : index
    %c0_245 = arith.constant 0 : index
    %c0_246 = arith.constant 0 : index
    %378 = vector.load %arg2[%c63, %c0_245, %c0_246] : memref<67x8x8xf32, #tpu.memory_space<vmem>>, vector<1x8x8xf32>
    %379 = vector.shape_cast %378 : vector<1x8x8xf32> to vector<8x8xf32>
    %cst_247 = arith.constant dense<0.000000e+00> : vector<8x416xf32>
    %380 = tpu.matmul %379, %377, %cst_247 {dimension_numbers = #tpu.dot_dimension_numbers<[1], [0], [0], [1], [0, 0, 1, 1], [], []>} : vector<8x8xf32>, vector<8x416xf32>, vector<8x416xf32> -> vector<8x416xf32>
    %381 = arith.addf %376, %380 : vector<8x416xf32>
    %382 = vector.extract_strided_slice %351 {offsets = [0, 160], sizes = [8, 416], strides = [1, 1]} : vector<8x686xf32> to vector<8x416xf32>
    %c64 = arith.constant 64 : index
    %c0_248 = arith.constant 0 : index
    %c0_249 = arith.constant 0 : index
    %383 = vector.load %arg2[%c64, %c0_248, %c0_249] : memref<67x8x8xf32, #tpu.memory_space<vmem>>, vector<1x8x8xf32>
    %384 = vector.shape_cast %383 : vector<1x8x8xf32> to vector<8x8xf32>
    %cst_250 = arith.constant dense<0.000000e+00> : vector<8x416xf32>
    %385 = tpu.matmul %384, %382, %cst_250 {dimension_numbers = #tpu.dot_dimension_numbers<[1], [0], [0], [1], [0, 0, 1, 1], [], []>} : vector<8x8xf32>, vector<8x416xf32>, vector<8x416xf32> -> vector<8x416xf32>
    %386 = arith.addf %381, %385 : vector<8x416xf32>
    %387 = vector.extract_strided_slice %351 {offsets = [0, 161], sizes = [8, 416], strides = [1, 1]} : vector<8x686xf32> to vector<8x416xf32>
    %c65 = arith.constant 65 : index
    %c0_251 = arith.constant 0 : index
    %c0_252 = arith.constant 0 : index
    %388 = vector.load %arg2[%c65, %c0_251, %c0_252] : memref<67x8x8xf32, #tpu.memory_space<vmem>>, vector<1x8x8xf32>
    %389 = vector.shape_cast %388 : vector<1x8x8xf32> to vector<8x8xf32>
    %cst_253 = arith.constant dense<0.000000e+00> : vector<8x416xf32>
    %390 = tpu.matmul %389, %387, %cst_253 {dimension_numbers = #tpu.dot_dimension_numbers<[1], [0], [0], [1], [0, 0, 1, 1], [], []>} : vector<8x8xf32>, vector<8x416xf32>, vector<8x416xf32> -> vector<8x416xf32>
    %391 = arith.addf %386, %390 : vector<8x416xf32>
    %392 = vector.extract_strided_slice %351 {offsets = [0, 162], sizes = [8, 416], strides = [1, 1]} : vector<8x686xf32> to vector<8x416xf32>
    %c66 = arith.constant 66 : index
    %c0_254 = arith.constant 0 : index
    %c0_255 = arith.constant 0 : index
    %393 = vector.load %arg2[%c66, %c0_254, %c0_255] : memref<67x8x8xf32, #tpu.memory_space<vmem>>, vector<1x8x8xf32>
    %394 = vector.shape_cast %393 : vector<1x8x8xf32> to vector<8x8xf32>
    %cst_256 = arith.constant dense<0.000000e+00> : vector<8x416xf32>
    %395 = tpu.matmul %394, %392, %cst_256 {dimension_numbers = #tpu.dot_dimension_numbers<[1], [0], [0], [1], [0, 0, 1, 1], [], []>} : vector<8x8xf32>, vector<8x416xf32>, vector<8x416xf32> -> vector<8x416xf32>
    %396 = arith.addf %391, %395 : vector<8x416xf32>
    %cst_257 = arith.constant 0.000000e+00 : f32
    %397 = vector.broadcast %cst_257 : f32 to vector<8x416xf32>
    %398 = arith.maximumf %396, %397 : vector<8x416xf32>
    %c0_258 = arith.constant 0 : index
    %c0_259 = arith.constant 0 : index
    %c0_260 = arith.constant 0 : index
    %399 = vector.load %arg5[%c0_258, %c0_259, %c0_260] : memref<1x8x416xf32, #tpu.memory_space<vmem>>, vector<1x8x416xf32>
    %400 = vector.shape_cast %399 : vector<1x8x416xf32> to vector<8x416xf32>
    %401 = vector.shape_cast %398 : vector<8x416xf32> to vector<1x8x416xf32>
    tpu.vector_store %arg5[%c0_258, %c0_259, %c0_260], %401 {strides = array<i32>} : memref<1x8x416xf32, #tpu.memory_space<vmem>>, vector<1x8x416xf32>,
    return
  }
  func.func @transform_0(%arg0: i32) -> (i32, i32, i32) {
    %c0_i32 = arith.constant 0 : i32
    %c0_i32_0 = arith.constant 0 : i32
    %c0_i32_1 = arith.constant 0 : i32
    return %arg0, %c0_i32, %c0_i32_0 : i32, i32, i32
  }
  func.func @transform_1(%arg0: i32) -> (i32, i32, i32) {
    %c0_i32 = arith.constant 0 : i32
    %c0_i32_0 = arith.constant 0 : i32
    %c0_i32_1 = arith.constant 0 : i32
    %c0_i32_2 = arith.constant 0 : i32
    return %c0_i32, %c0_i32_0, %c0_i32_1 : i32, i32, i32
  }
  func.func @transform_2(%arg0: i32) -> (i32, i32) {
    %c0_i32 = arith.constant 0 : i32
    %c0_i32_0 = arith.constant 0 : i32
    %c0_i32_1 = arith.constant 0 : i32
    return %c0_i32, %c0_i32_0 : i32, i32
  }
  func.func @transform_3(%arg0: i32) -> (i32, i32) {
    %c0_i32 = arith.constant 0 : i32
    %c0_i32_0 = arith.constant 0 : i32
    %c0_i32_1 = arith.constant 0 : i32
    return %c0_i32, %c0_i32_0 : i32, i32
  }
  func.func @transform_4(%arg0: i32) -> (i32, i32, i32) {
    %c0_i32 = arith.constant 0 : i32
    %c0_i32_0 = arith.constant 0 : i32
    %c0_i32_1 = arith.constant 0 : i32
    return %arg0, %c0_i32, %c0_i32_0 : i32, i32, i32
  }
}

</mosaic_0001>

<bundles_post_ra>
// kernel: tpu_custom_call.1
= control target key start
LH: loop header
LB: loop body
LE: loop exit
PB: predicated region body
PF: predicated region fallthrough
CT: control target
= control target key end

     0   :  { %9 = vsyncpa [#allocation4], 0  ;;  %s14069_s0 = inlined_call_operand.vmem [shape: f32[2,8,686], index: 0, kind: input, shape index: {}]   ;;  %s14070_s1 = inlined_call_operand.vmem [shape: f32[67,8,8], index: 1, kind: input, shape index: {}]   ;;  %s14071_s2 = inlined_call_operand.vmem [shape: f32[8,8], index: 2, kind: input, shape index: {}]   ;;  %s14072_s3 = inlined_call_operand.vmem [shape: f32[1,416], index: 3, kind: input, shape index: {}]   ;;  %s14073_s4 = inlined_call_operand.hbm [shape: f32[2,8,416], index: 4, kind: output, shape index: {}]  }
   0x1   :  { %11 = vsyncpa [#allocation4 + $0x1], 0  ;;  %s12233_s15 = smov 0   ;;  %s12235_s16 = smov 0  }
   0x2   :  { %s12237_s17 = smov 0   ;;  %s12239_s18 = smov 0  }
   0x3 LB: > { %s12254_s19 = sadd.s32 4294967295, %s12169_s18   ;;  %s11554_s20 = sadd.s32 4294967294, %s12169_s18   ;;  %s12169_s18 = sphi %s12239_s18, %s14106_s18   ;;  %s12165_s17 = sphi %s12237_s17, %s14105_s17   ;;  %s12161_s16 = sphi %s12235_s16, %s14104_s16   ;;  %s12157_s15 = sphi %s12233_s15, %s14103_s15  }
   0x4   : > { %s12258_s21 = sadd.s32 1, %s12169_s18   ;;  %s113_s22 = sadd.s32 1, %s12165_s17 }
   0x5   : > { %s110_s23 = ssub.s32 %s12169_s18, %s12258_s21  ;;  %p123_p0 = scmp.ne.s32.totalorder %s12165_s17, %s12161_s16 }
   0x6   : > { %p111_p1 = scmp.eq.s32.totalorder %s110_s23, 0  ;;  %p124_p2 = scmp.eq.s32.totalorder %s12254_s19, 1 }
   0x7   : > { %p129_p3 = scmp.ne.s32.totalorder %s12161_s16, %s12157_s15  ;;  %p130_p4 = scmp.eq.s32.totalorder %s11554_s20, 1 }
   0x8   : > { %s12269_s24 = scalar_select %p111_p1, %s12165_s17, %s113_s22  }
   0x9   : > { %p12271_p5 = por %p124_p2, %p123_p0  ;;  %p12275_p6 = por %p130_p4, %p129_p3 }
   0xa   : > { %p11557_p7 = scmp.ge.s32.totalorder %s12169_s18, 1  ;;  %p165_p8 = scmp.lt.s32.totalorder %s12169_s18, 3 }
   0xc   : > { %p166_p9 = pnand %p11557_p7, %p165_p8 }
   0xe   : > { %169 = sbr.rel (%p166_p9) target bundleno = 1784 (0x6f8), region = 36 }
  0x15   : > { %p191_p10 = scmp.lt.s32.totalorder %s12254_s19, 1  ;;  %v12171_v0 = vmov 1   ;;  %v14078_v1 = vmov 0.0   ;;  %s12173_s6 = smov 121   ;;  %v12360_v7 = vld [vmem:[%s14071_s2] sm:$0xff]  ;;  %v12183_v8 = vmov 0  }
  0x16   : > { %12094 = vset.pattern.permute.xlu0 %v12171_v0  ;;  %384 = vmatprep.mubr.f32.mxu1 %v14078_v1  ;;  %s12174_s7 = smov 47   ;;  %s12175_s8 = smov 45   ;;  %vm237_vm0 = vcmask 990208   ;;  %v218_v15 = vld [vmem:[%s14070_s1] sm:$0xff]  ;;  %vm245_vm1 = vcmask 64512   ;;  %vm457_vm2 = vcmask 384000  }
  0x17   : > { %s192_s27 = scalar_select %p191_p10, %s12254_s19, 1  ;;  %313 = vmatprep.mubr.f32.mxu0 %v14078_v1  ;;  %12097 = vset.pattern.permute.xlu1 %v12183_v8  ;;  %v11562_v22 = vld [vmem:[%s14070_s1 + $0x8] sm:$0xff]  ;;  %vm629_vm3 = vcmask 367616   ;;  %v11565_v30 = vld [vmem:[%s14070_s1 + $0x10] sm:$0xff]  ;;  %vm796_vm4 = vcmask 351232   ;;  %v12190_v36 = vmov 3  }
  0x18   : > { %s12176_s9 = smov 43   ;;  %s12177_s10 = smov 123   ;;  %v11568_v39 = vld [vmem:[%s14070_s1 + $0x18] sm:$0xff]  ;;  %vm963_vm5 = vcmask 1006592   ;;  %v12192_v45 = vmov 5   ;;  %v11571_v49 = vld [vmem:[%s14070_s1 + $0x20] sm:$0xff] }
  0x19   : > { %s12018_s28 = smul.u32 48, %s192_s27  ;;  %s12178_s11 = smov 119   ;;  %vm1281_vm6 = vcmask 973824   ;;  %v11574_v56 = vld [vmem:[%s14070_s1 + $0x28] sm:$0xff]  ;;  %vm1448_vm7 = vcmask 580608   ;;  %v11577_v0 = vld [vmem:[%s14070_s1 + $0x30] sm:$0xff] }
  0x1a   : > { %s12179_s12 = smov 71   ;;  %s12180_s13 = smov 69   ;;  %vm1615_vm8 = vcmask 564224   ;;  %vm1782_vm9 = vcmask 547840   ;;  %vm196_vm10 = vcmask 1048384   ;;  %vm198_vm11 = vcmask 56320  }
  0x1b   : > { %s12288_s5 = scalar_lea.vmem %s14069_s0, %s12018_s28  ;;  %s12181_s14 = smov 67   ;;  %197 = vst.msk [vmem:[#allocation2] sm:$0xff] %vm196_vm10, %v14078_v1  ;;  %200 = vst.msk [vmem:[#allocation2 + $0x30] sm:$0xff] %vm196_vm10, %v14078_v1  ;;  %vm206_vm12 = vcmask 490768   ;;  %vm2137_vm13 = vcmask 605184   ;;  %vm2465_vm14 = vcmask 556032  }
  0x1c   : > { %v12291_v2 = vld [vmem:[%s12288_s5 + $0x10] sm:$0xff]  ;;  %v12294_v3 = vld [vmem:[%s12288_s5 + $0x8] sm:$0xff]  ;;  %v12301_v4 = vld [vmem:[%s12288_s5 + $0x18] sm:$0xff]  ;;  %s12182_s23 = smov 74   ;;  %s12184_s27 = smov 68   ;;  %202 = vst.msk [vmem:[#allocation2 + $0x60] sm:$0xff] %vm196_vm10, %v14078_v1 }
  0x1d   : > { %231 = vrot.lane.b32.xlu0 %v12291_v2, %s12173_s6  ;;  %229 = vrot.lane.b32.xlu1 %v12294_v3, %s12173_s6  ;;  %v12304_v5 = vld [vmem:[%s12288_s5 + $0x20] sm:$0xff]  ;;  %s12185_s28 = smov 124   ;;  %s12186_s29 = smov 118   ;;  %v216_v48 = vld [vmem:[%s12288_s5 + $0x28] sm:$0xff]  ;;  %204 = vst.msk [vmem:[#allocation2 + $0x90] sm:$0xff] %vm196_vm10, %v14078_v1  ;;  %vm2632_vm15 = vcmask 1014784  }
  0x1e   : > { %v12313_v6 = vld [vmem:[%s12288_s5] sm:$0xff]  ;;  %s12187_s30 = smov 46   ;;  %s12189_s20 = smov 126   ;;  %199 = vst.msk [vmem:[#allocation2 + $0x8] sm:$0xff] %vm198_vm11, %v14078_v1  ;;  %201 = vst.msk [vmem:[#allocation2 + $0x38] sm:$0xff] %vm198_vm11, %v14078_v1  ;;  %vm5061_vm10 = vcmask 932864  }
  0x1f   : > { %203 = vst.msk [vmem:[#allocation2 + $0x68] sm:$0xff] %vm198_vm11, %v14078_v1  ;;  %205 = vst.msk [vmem:[#allocation2 + $0x98] sm:$0xff] %vm198_vm11, %v14078_v1 }
  0x20   : > { %207 = vst.msk [vmem:[#allocation2 + $0x20] sm:$0xff] %vm206_vm12, %v14078_v1  ;;  %208 = vst.msk [vmem:[#allocation2 + $0x50] sm:$0xff] %vm206_vm12, %v14078_v1 }
  0x21   : > { %233 = vrot.lane.b32.xlu0 %v12301_v4, %s12173_s6  ;;  %235 = vrot.lane.b32.xlu1 %v12304_v5, %s12173_s6  ;;  %209 = vst.msk [vmem:[#allocation2 + $0x80] sm:$0xff] %vm206_vm12, %v14078_v1  ;;  %210 = vst.msk [vmem:[#allocation2 + $0xb0] sm:$0xff] %vm206_vm12, %v14078_v1  ;;  %vm5603_vm12 = vcmask 154624  }
  0x25   : > { %451 = vrot.lane.b32.xlu0 %v12294_v3, %s12174_s7  ;;  %453 = vrot.lane.b32.xlu1 %v12291_v2, %s12174_s7 }
  0x29   : > { %455 = vrot.lane.b32.xlu1 %v12301_v4, %s12174_s7  ;;  %449 = vrot.lane.b32.xlu0 %v12313_v6, %s12174_s7  ;;  %s12188_s7 = smov 40  }
  0x2d   : > { %625 = vrot.lane.b32.xlu1 %v12291_v2, %s12175_s8  ;;  %623 = vrot.lane.b32.xlu0 %v12294_v3, %s12175_s8 }
  0x31   : > { %627 = vrot.lane.b32.xlu1 %v12301_v4, %s12175_s8  ;;  %621 = vrot.lane.b32.xlu0 %v12313_v6, %s12175_s8  ;;  %s12193_s8 = smov 114  }
  0x35   : > { %792 = vrot.lane.b32.xlu1 %v12291_v2, %s12176_s9  ;;  %790 = vrot.lane.b32.xlu0 %v12294_v3, %s12176_s9 }
  0x39   : > { %794 = vrot.lane.b32.xlu1 %v12301_v4, %s12176_s9  ;;  %788 = vrot.lane.b32.xlu0 %v12313_v6, %s12176_s9 }
  0x3d   : > { %959 = vrot.lane.b32.xlu1 %v12301_v4, %s12177_s10  ;;  %957 = vrot.lane.b32.xlu0 %v12291_v2, %s12177_s10 }
  0x41   : > { %961 = vrot.lane.b32.xlu1 %v12304_v5, %s12177_s10  ;;  %955 = vrot.lane.b32.xlu0 %v12294_v3, %s12177_s10 }
  0x45   : > { %1277 = vrot.lane.b32.xlu1 %v12301_v4, %s12178_s11  ;;  %1275 = vrot.lane.b32.xlu0 %v12291_v2, %s12178_s11 }
  0x49   : > { %1279 = vrot.lane.b32.xlu1 %v12304_v5, %s12178_s11  ;;  %1273 = vrot.lane.b32.xlu0 %v12294_v3, %s12178_s11 }
  0x4d   : > { %1444 = vrot.lane.b32.xlu1 %v12301_v4, %s12179_s12  ;;  %1442 = vrot.lane.b32.xlu0 %v12291_v2, %s12179_s12 }
  0x51   : > { %1446 = vrot.lane.b32.xlu1 %v12304_v5, %s12179_s12  ;;  %1440 = vrot.lane.b32.xlu0 %v12294_v3, %s12179_s12 }
  0x55   : > { %1611 = vrot.lane.b32.xlu1 %v12301_v4, %s12180_s13  ;;  %1609 = vrot.lane.b32.xlu0 %v12291_v2, %s12180_s13 }
  0x59   : > { %1613 = vrot.lane.b32.xlu1 %v12304_v5, %s12180_s13  ;;  %1607 = vrot.lane.b32.xlu0 %v12294_v3, %s12180_s13 }
  0x5d   : > { %1778 = vrot.lane.b32.xlu1 %v12301_v4, %s12181_s14  ;;  %1776 = vrot.lane.b32.xlu0 %v12291_v2, %s12181_s14 }
  0x61   : > { %1780 = vrot.lane.b32.xlu1 %v12304_v5, %s12181_s14  ;;  %1774 = vrot.lane.b32.xlu0 %v12294_v3, %s12181_s14  ;;  %s188_s14 = sand.u32 1, %s12161_s16  }
  0x65   : > { %2131 = vrot.lane.b32.xlu1 %v12294_v3, %s12182_s23  ;;  %612 = vperm.xlu0 %12094, %v12360_v7  }
  0x69   : > { %2133 = vrot.lane.b32.xlu1 %v12291_v2, %s12182_s23  ;;  %2129 = vrot.lane.b32.xlu0 %v12313_v6, %s12182_s23 }
  0x6a   : > { %12095 = vset.pattern.permute.xlu0 %v12190_v36 }
  0x6d   : > { %2135 = vrot.lane.b32.xlu1 %v12301_v4, %s12182_s23  ;;  %2301 = vrot.lane.b32.xlu0 %v12313_v6, %s12179_s12  ;;  %s12204_s12 = smov 95  }
  0x71   : > { %2459 = vrot.lane.b32.xlu1 %v12294_v3, %s12184_s27  ;;  %2461 = vrot.lane.b32.xlu0 %v12291_v2, %s12184_s27 }
  0x75   : > { %2457 = vrot.lane.b32.xlu1 %v12313_v6, %s12184_s27  ;;  %2463 = vrot.lane.b32.xlu0 %v12301_v4, %s12184_s27  ;;  %s12191_s27 = smov 116  }
  0x79   : > { %2626 = vrot.lane.b32.xlu1 %v12291_v2, %s12185_s28  ;;  %2628 = vrot.lane.b32.xlu0 %v12301_v4, %s12185_s28 }
  0x7d   : > { %2624 = vrot.lane.b32.xlu1 %v12294_v3, %s12185_s28  ;;  %2630 = vrot.lane.b32.xlu0 %v12304_v5, %s12185_s28 }
  0x81   : > { %2944 = vrot.lane.b32.xlu1 %v12291_v2, %s12186_s29  ;;  %2946 = vrot.lane.b32.xlu0 %v12301_v4, %s12186_s29 }
  0x85   : > { %2942 = vrot.lane.b32.xlu1 %v12294_v3, %s12186_s29  ;;  %2948 = vrot.lane.b32.xlu0 %v12304_v5, %s12186_s29 }
  0x89   : > { %3111 = vrot.lane.b32.xlu1 %v12291_v2, %s12187_s30  ;;  %3113 = vrot.lane.b32.xlu0 %v12301_v4, %s12187_s30 }
  0x8d   : > { %3109 = vrot.lane.b32.xlu1 %v12294_v3, %s12187_s30  ;;  %3115 = vrot.lane.b32.xlu0 %v12304_v5, %s12187_s30  ;;  %s12196_s30 = smov 20  }
  0x8f   : > { %v232_v9 = vpop.permute.xlu0 %231  ;;  %v230_v10 = vpop.permute.xlu1 %229 }
  0x90   : > { %v12409_v16 = vsel %vm237_vm0, %v230_v10, %v232_v9 }
  0x91   : > { %3276 = vrot.lane.b32.xlu1 %v12304_v5, %s12176_s9  ;;  %3434 = vrot.lane.b32.xlu0 %v12291_v2, %s12188_s7  ;;  %s12205_s9 = smov 94  }
  0x93   : > { %v234_v11 = vpop.permute.xlu0 %233  ;;  %v12395_v12 = vpop.permute.xlu1 %235 }
  0x94   : > { %320 = vmatprep.subr.mxu1 %v12395_v12  ;;  %v12399_v13 = vsel %vm237_vm0, %v232_v9, %v234_v11  ;;  %v12403_v14 = vsel %vm237_vm0, %v234_v11, %v12395_v12 }
  0x95   : > { %249 = vmatprep.subr.mxu0 %v12399_v13  ;;  %321 = vmatpush1.msra.mxu1 %v12403_v14 }
  0x96   : > { %3436 = vrot.lane.b32.xlu1 %v12301_v4, %s12188_s7  ;;  %250 = vmatpush1.msra.mxu0 %v12409_v16 }
  0x97   : > { %11561 = vmatmul.mubr.msk.f32.vlgmr.msra.gmra.mrb[0].mxu1 %vm245_vm1, %v218_v15  ;;  %v452_v17 = vpop.permute.xlu0 %451  ;;  %11560 = vmatmul.mubr.msk.f32.vlgmr.msra.gmra.mrb[0].mxu0 %vm245_vm1, %v218_v15  ;;  %v454_v18 = vpop.permute.xlu1 %453  ;;  %v11580_v15 = vld [vmem:[%s14070_s1 + $0x38] sm:$0xff] }
  0x98   : > { %v459_v19 = vsel %vm457_vm2, %v452_v17, %v454_v18  ;;  %532 = vmatprep.mubr.f32.mxu0 %v14078_v1  ;;  %603 = vmatprep.mubr.f32.mxu1 %v14078_v1 }
  0x99   : > { %468 = vmatprep.subr.mxu0 %v459_v19  ;;  %3432 = vrot.lane.b32.xlu0 %v12294_v3, %s12188_s7 }
  0x9a   : > { %3438 = vrot.lane.b32.xlu1 %v12304_v5, %s12188_s7  ;;  %s12199_s7 = smov 18  }
  0x9b   : > { %v456_v20 = vpop.permute.xlu1 %455  ;;  %v450_v21 = vpop.permute.xlu0 %449 }
  0x9c   : > { %v458_v23 = vsel %vm457_vm2, %v450_v21, %v452_v17  ;;  %539 = vmatprep.subr.mxu1 %v456_v20  ;;  %v460_v24 = vsel %vm457_vm2, %v454_v18, %v456_v20  ;;  %vm2950_vm2 = vcmask 965632  }
  0x9d   : > { %540 = vmatpush1.msra.mxu1 %v460_v24  ;;  %469 = vmatpush1.msra.mxu0 %v458_v23 }
  0x9e   : > { %3943 = vrot.lane.b32.xlu1 %v12313_v6, %s12177_s10  ;;  %11563 = vmatmul.mubr.msk.f32.vlgmr.msra.gmra.mrb[2].mxu0 %vm245_vm1, %v11562_v22 }
  0x9f   : > { %11564 = vmatmul.mubr.msk.f32.vlgmr.msra.gmra.mrb[2].mxu1 %vm245_vm1, %v11562_v22  ;;  %v626_v25 = vpop.permute.xlu1 %625  ;;  %v624_v26 = vpop.permute.xlu0 %623  ;;  %704 = vmatprep.mubr.f32.mxu0 %v14078_v1 }
  0xa0   : > { %v631_v27 = vsel %vm629_vm3, %v624_v26, %v626_v25  ;;  %775 = vmatprep.mubr.f32.mxu1 %v14078_v1  ;;  %2292 = vperm.xlu0 %12095, %v12360_v7  }
  0xa1   : > { %640 = vmatprep.subr.mxu0 %v631_v27 }
  0xa2   : > { %4099 = vrot.lane.b32.xlu1 %v12313_v6, %s12186_s29  ;;  %s12195_s29 = smov 7  }
  0xa3   : > { %v628_v28 = vpop.permute.xlu1 %627  ;;  %v622_v29 = vpop.permute.xlu0 %621 }
  0xa4   : > { %v630_v31 = vsel %vm629_vm3, %v622_v29, %v624_v26  ;;  %711 = vmatprep.subr.mxu1 %v628_v28  ;;  %v632_v32 = vsel %vm629_vm3, %v626_v25, %v628_v28  ;;  %4257 = vrot.lane.b32.xlu0 %v12291_v2, %s12189_s20  ;;  %vm3117_vm3 = vcmask 375808  }
  0xa5   : > { %712 = vmatpush1.msra.mxu1 %v632_v32  ;;  %641 = vmatpush1.msra.mxu0 %v630_v31 }
  0xa6   : > { %4259 = vrot.lane.b32.xlu1 %v12301_v4, %s12189_s20  ;;  %11566 = vmatmul.mubr.msk.f32.vlgmr.msra.gmra.mrb[2].mxu0 %vm245_vm1, %v11565_v30 }
  0xa7   : > { %11567 = vmatmul.mubr.msk.f32.vlgmr.msra.gmra.mrb[2].mxu1 %vm245_vm1, %v11565_v30  ;;  %v793_v33 = vpop.permute.xlu1 %792  ;;  %v791_v34 = vpop.permute.xlu0 %790  ;;  %871 = vmatprep.mubr.f32.mxu0 %v14078_v1 }
  0xa8   : > { %v12447_v35 = vsel %vm796_vm4, %v791_v34, %v793_v33  ;;  %942 = vmatprep.mubr.f32.mxu1 %v14078_v1  ;;  %12096 = vset.pattern.permute.xlu0 %v12192_v45 }
  0xa9   : > { %807 = vmatprep.subr.mxu0 %v12447_v35  ;;  %4255 = vrot.lane.b32.xlu0 %v12294_v3, %s12189_s20 }
  0xaa   : > { %4261 = vrot.lane.b32.xlu1 %v12304_v5, %s12189_s20  ;;  %s12200_s20 = smov 122  }
  0xab   : > { %v12454_v37 = vpop.permute.xlu1 %794  ;;  %v789_v38 = vpop.permute.xlu0 %788 }
  0xac   : > { %v797_v40 = vsel %vm796_vm4, %v789_v38, %v791_v34  ;;  %878 = vmatprep.subr.mxu1 %v12454_v37  ;;  %v12463_v41 = vsel %vm796_vm4, %v793_v33, %v12454_v37 }
  0xad   : > { %879 = vmatpush1.msra.mxu1 %v12463_v41  ;;  %808 = vmatpush1.msra.mxu0 %v797_v40 }
  0xae   : > { %4577 = vrot.lane.b32.xlu1 %v12301_v4, %s12191_s27  ;;  %11569 = vmatmul.mubr.msk.f32.vlgmr.msra.gmra.mrb[2].mxu0 %vm245_vm1, %v11568_v39 }
  0xaf   : > { %11570 = vmatmul.mubr.msk.f32.vlgmr.msra.gmra.mrb[2].mxu1 %vm245_vm1, %v11568_v39  ;;  %v12470_v42 = vpop.permute.xlu1 %959  ;;  %v958_v43 = vpop.permute.xlu0 %957  ;;  %1038 = vmatprep.mubr.f32.mxu0 %v14078_v1 }
  0xb0   : > { %v12475_v44 = vsel %vm963_vm5, %v958_v43, %v12470_v42  ;;  %1109 = vmatprep.mubr.f32.mxu1 %v14078_v1  ;;  %4575 = vrot.lane.b32.xlu0 %v12291_v2, %s12191_s27 }
  0xb1   : > { %974 = vmatprep.subr.mxu0 %v12475_v44 }
  0xb2   : > { %4579 = vrot.lane.b32.xlu1 %v12304_v5, %s12191_s27 }
  0xb3   : > { %v962_v46 = vpop.permute.xlu1 %961  ;;  %v12483_v47 = vpop.permute.xlu0 %955 }
  0xb4   : > { %1045 = vmatprep.subr.mxu1 %v962_v46  ;;  %v966_v50 = vsel %vm963_vm5, %v12470_v42, %v962_v46  ;;  %v12493_v51 = vsel %vm963_vm5, %v12483_v47, %v958_v43  ;;  %4573 = vrot.lane.b32.xlu0 %v12294_v3, %s12191_s27  ;;  %s12201_s27 = smov 120  }
  0xb5   : > { %1046 = vmatpush1.msra.mxu1 %v966_v50  ;;  %975 = vmatpush1.msra.mxu0 %v12493_v51 }
  0xb6   : > { %4897 = vrot.lane.b32.xlu1 %v216_v48, %s12178_s11  ;;  %11572 = vmatmul.mubr.msk.f32.vlgmr.msra.gmra.mrb[2].mxu0 %vm245_vm1, %v11571_v49  ;;  %s12198_s11 = smov 19  }
  0xb7   : > { %11573 = vmatmul.mubr.msk.f32.vlgmr.msra.gmra.mrb[2].mxu1 %vm245_vm1, %v11571_v49  ;;  %1125 = vmatprep.subr.mxu0 %v12399_v13  ;;  %v1278_v52 = vpop.permute.xlu1 %1277  ;;  %v1276_v53 = vpop.permute.xlu0 %1275 }
  0xb8   : > { %1196 = vmatprep.subr.mxu1 %v12395_v12  ;;  %1126 = vmatpush1.msra.mxu0 %v12409_v16  ;;  %v12505_v54 = vsel %vm1281_vm6, %v1276_v53, %v1278_v52 }
  0xb9   : > { %14086 = vst [vmem:[#allocation6_spill] sm:$0xff] %v12505_v54  ;;  %1197 = vmatpush1.msra.mxu1 %v12403_v14  ;;  %1189 = vmatprep.mubr.f32.mxu0 %v14078_v1 }
  0xba   : > { %1260 = vmatprep.mubr.f32.mxu1 %v14078_v1  ;;  %1292 = vmatprep.subr.mxu0 %v12505_v54 }
  0xbb   : > { %v12511_v55 = vpop.permute.xlu1 %1279  ;;  %v1274_v57 = vpop.permute.xlu0 %1273  ;;  %5057 = vrot.lane.b32.xlu1 %v12304_v5, %s12193_s8  ;;  %4741 = vrot.lane.b32.xlu0 %v216_v48, %s12185_s28  ;;  %s11765_s28 = sshll.u32 %s12254_s19, 9  ;;  %s11481_s19 = scalar_lea.sflag [#allocation4], %s188_s14 }
  0xbc   : > { %14087 = vst [vmem:[#allocation7_spill] sm:$0xff] %v12511_v55  ;;  %1363 = vmatprep.subr.mxu1 %v12511_v55  ;;  %v1282_v58 = vsel %vm1281_vm6, %v1274_v57, %v1276_v53  ;;  %v12524_v59 = vsel %vm1281_vm6, %v1278_v52, %v12511_v55  ;;  %s14027_s23 = scalar_lea.hbm %s14073_s4, %s11765_s28 }
  0xbd   : > { %14088 = vst [vmem:[#allocation8_spill] sm:$0xff] %v12524_v59 }
  0xbe   : > { %11575 = vmatmul.mubr.msk.f32.vlgmr.msra.gmra.mrb[2].mxu0 %vm245_vm1, %v11574_v56 }
  0xbf   : > { %11576 = vmatmul.mubr.msk.f32.vlgmr.msra.gmra.mrb[2].mxu1 %vm245_vm1, %v11574_v56  ;;  %v12528_v60 = vpop.permute.xlu1 %1444  ;;  %1293 = vmatpush1.msra.mxu0 %v1282_v58  ;;  %v1443_v61 = vpop.permute.xlu0 %1442  ;;  %v12194_v56 = vmov 2  }
  0xc0   : > { %1364 = vmatpush1.msra.mxu1 %v12524_v59  ;;  %1356 = vmatprep.mubr.f32.mxu0 %v14078_v1  ;;  %v12534_v62 = vsel %vm1448_vm7, %v1443_v61, %v12528_v60 }
  0xc1   : > { %1427 = vmatprep.mubr.f32.mxu1 %v14078_v1  ;;  %1459 = vmatprep.subr.mxu0 %v12534_v62 }
  0xc2   : > { %5059 = vrot.lane.b32.xlu1 %v216_v48, %s12193_s8  ;;  %5055 = vrot.lane.b32.xlu0 %v12301_v4, %s12193_s8  ;;  %v11583_v4 = vld [vmem:[%s14070_s1 + $0x40] sm:$0xff] }
  0xc3   : > { %v1447_v63 = vpop.permute.xlu1 %1446  ;;  %v12544_v5 = vpop.permute.xlu0 %1440 }
  0xc4   : > { %1530 = vmatprep.subr.mxu1 %v1447_v63  ;;  %v12548_v6 = vsel %vm1448_vm7, %v12544_v5, %v1443_v61  ;;  %v1451_v8 = vsel %vm1448_vm7, %v12528_v60, %v1447_v63  ;;  %v396_v61 = vlaneseq }
  0xc6   : > { %11578 = vmatmul.mubr.msk.f32.vlgmr.msra.gmra.mrb[2].mxu0 %vm245_vm1, %v11577_v0  ;;  %222 = vperm.xlu1 %12097, %v12360_v7  }
  0xc7   : > { %11579 = vmatmul.mubr.msk.f32.vlgmr.msra.gmra.mrb[2].mxu1 %vm245_vm1, %v11577_v0  ;;  %v1612_v3 = vpop.permute.xlu1 %1611  ;;  %1460 = vmatpush1.msra.mxu0 %v12548_v6  ;;  %v1610_v9 = vpop.permute.xlu0 %1609 }
  0xc8   : > { %1531 = vmatpush1.msra.mxu1 %v1451_v8  ;;  %1523 = vmatprep.mubr.f32.mxu0 %v14078_v1  ;;  %v1617_v10 = vsel %vm1615_vm8, %v1610_v9, %v1612_v3  ;;  %v397_v8 = vshrl.u32 %v396_v61, 7 }
  0xc9   : > { %1594 = vmatprep.mubr.f32.mxu1 %v14078_v1  ;;  %1626 = vmatprep.subr.mxu0 %v1617_v10  ;;  %v217_v10 = vld [vmem:[%s14072_s3] sm:$0xf] }
  0xca   : > { %5053 = vrot.lane.b32.xlu0 %v12291_v2, %s12193_s8  ;;  %v11586_v2 = vld [vmem:[%s14070_s1 + $0x48] sm:$0xff]  ;;  %12098 = vset.pattern.permute.xlu1 %v12194_v56  ;;  %s12203_s8 = smov 96  }
  0xcb   : > { %v1614_v11 = vpop.permute.xlu1 %1613  ;;  %v1608_v17 = vpop.permute.xlu0 %1607 }
  0xcc   : > { %1697 = vmatprep.subr.mxu1 %v1614_v11  ;;  %v1616_v18 = vsel %vm1615_vm8, %v1608_v17, %v1610_v9  ;;  %v1618_v19 = vsel %vm1615_vm8, %v1612_v3, %v1614_v11  ;;  %v406_v3 = vsub.s32 2, %v397_v8  ;;  %v402_v11 = vsub.s32 1, %v397_v8 }
  0xcd   : > { %v398_v17 = vsub.s32 0, %v397_v8  ;;  %vm443_vm8 = vcmask 318464  }
  0xce   : > { %11581 = vmatmul.mubr.msk.f32.vlgmr.msra.gmra.mrb[2].mxu0 %vm245_vm1, %v11580_v15  ;;  %3934 = vperm.xlu0 %12096, %v12360_v7  }
  0xcf   : > { %11582 = vmatmul.mubr.msk.f32.vlgmr.msra.gmra.mrb[2].mxu1 %vm245_vm1, %v11580_v15  ;;  %v1779_v20 = vpop.permute.xlu1 %1778  ;;  %1627 = vmatpush1.msra.mxu0 %v1616_v18  ;;  %v1777_v21 = vpop.permute.xlu0 %1776  ;;  %v12664_v61 = vrot.slane %v217_v10, %v398_v17 }
  0xd0   : > { %1698 = vmatpush1.msra.mxu1 %v1618_v19  ;;  %1690 = vmatprep.mubr.f32.mxu0 %v14078_v1  ;;  %v1784_v22 = vsel %vm1782_vm9, %v1777_v21, %v1779_v20 }
  0xd1   : > { %1761 = vmatprep.mubr.f32.mxu1 %v14078_v1  ;;  %1793 = vmatprep.subr.mxu0 %v1784_v22 }
  0xd3   : > { %v1781_v23 = vpop.permute.xlu1 %1780  ;;  %v1775_v24 = vpop.permute.xlu0 %1774 }
  0xd4   : > { %1864 = vmatprep.subr.mxu1 %v1781_v23  ;;  %v1783_v25 = vsel %vm1782_vm9, %v1775_v24, %v1777_v21  ;;  %v1785_v26 = vsel %vm1782_vm9, %v1779_v20, %v1781_v23  ;;  %vm3440_vm9 = vcmask 326656  }
  0xd6   : > { %11584 = vmatmul.mubr.msk.f32.vlgmr.msra.gmra.mrb[2].mxu0 %vm245_vm1, %v11583_v4 }
  0xd7   : > { %11585 = vmatmul.mubr.msk.f32.vlgmr.msra.gmra.mrb[2].mxu1 %vm245_vm1, %v11583_v4  ;;  %1794 = vmatpush1.msra.mxu0 %v1783_v25  ;;  %v12590_v27 = vpop.permute.xlu1 %2131  ;;  %v12660_v4 = vrot.slane %v217_v10, %v406_v3  ;;  %v12662_v25 = vrot.slane %v217_v10, %v402_v11 }
  0xd8   : > { %1865 = vmatpush1.msra.mxu1 %v1785_v26  ;;  %1857 = vmatprep.mubr.f32.mxu0 %v14078_v1 }
  0xd9   : > { %1928 = vmatprep.mubr.f32.mxu1 %v14078_v1 }
  0xdb   : > { %v12593_v28 = vpop.permute.xlu1 %2133 }
  0xde   : > { %11587 = vmatmul.mubr.msk.f32.vlgmr.msra.gmra.mrb[2].mxu0 %vm245_vm1, %v11586_v2 }
  0xdf   : > { %11588 = vmatmul.mubr.msk.f32.vlgmr.msra.gmra.mrb[2].mxu1 %vm245_vm1, %v11586_v2  ;;  %2016 = vmatprep.mubr.f32.mxu0 %v14078_v1  ;;  %v12595_v29 = vpop.permute.xlu1 %2135  ;;  %v410_v2 = vsub.s32 3, %v397_v8 }
  0xe0   : > { %2087 = vmatprep.mubr.f32.mxu1 %v14078_v1 }
  0xe3   : > { %v12597_v30 = vpop.permute.xlu1 %2459 }
  0xe4   : > { %v12641_v0 = vpop.permute.xlu0 %612 }
  0xe7   : > { %v12599_v31 = vpop.permute.xlu1 %2457 }
  0xe8   : > { %v12654_v15 = vpop.permute.xlu0 %2129 }
  0xeb   : > { %v12601_v32 = vpop.permute.xlu1 %2626 }
  0xec   : > { %v12667_v54 = vpop.permute.xlu0 %2301 }
  0xef   : > { %v12603_v33 = vpop.permute.xlu1 %2624 }
  0xf3   : > { %v12605_v34 = vpop.permute.xlu1 %2944 }
  0xf7   : > { %v12607_v36 = vpop.permute.xlu1 %2942 }
  0xfb   : > { %v12609_v38 = vpop.permute.xlu1 %3111 }
  0xff   : > { %v12611_v39 = vpop.permute.xlu1 %3109 }
 0x103   : > { %v12613_v40 = vpop.permute.xlu1 %3276 }
 0x108   : > { %v12615_v43 = vpop.permute.xlu1 %3436 }
 0x10c   : > { %v12617_v45 = vpop.permute.xlu1 %3438 }
 0x110   : > { %v12619_v46 = vpop.permute.xlu1 %3943 }
 0x114   : > { %v12621_v48 = vpop.permute.xlu1 %4099 }
 0x118   : > { %v12623_v49 = vpop.permute.xlu1 %4259 }
 0x11c   : > { %v12625_v50 = vpop.permute.xlu1 %4261 }
 0x120   : > { %v12627_v52 = vpop.permute.xlu1 %4577 }
 0x121   : > { %14089 = vst [vmem:[#allocation9_spill] sm:$0xff] %v12627_v52 }
 0x124   : > { %v12629_v53 = vpop.permute.xlu1 %4579 }
 0x125   : > { %14090 = vst [vmem:[#allocation10_spill] sm:$0xff] %v12629_v53  ;;  %v11589_v53 = vld [vmem:[%s14070_s1 + $0x50] sm:$0xff] }
 0x128   : > { %v12631_v57 = vpop.permute.xlu1 %4897 }
 0x129   : > { %14091 = vst [vmem:[#allocation11_spill] sm:$0xff] %v12631_v57 }
 0x12d   : > { %v12633_v58 = vpop.permute.xlu1 %5057 }
 0x12e   : > { %14092 = vst [vmem:[#allocation12_spill] sm:$0xff] %v12633_v58 }
 0x134   : > { %v12635_v63 = vpop.permute.xlu1 %5059 }
 0x135   : > { %14093 = vst [vmem:[#allocation13_spill] sm:$0xff] %v12635_v63 }
 0x145   : > { %v223_v9 = vpop.permute.xlu1 %222 }
 0x16a   : > { %v386_v18 = vpop.f32.mrb[0].mxu1  ;;  %v315_v19 = vpop.f32.mrb[0].mxu0 }
 0x16b   : > { %v316_v20 = vadd.f32 %v315_v19, %v223_v9  ;;  %v317_v21 = vpop.f32.mrb[1].mxu0  ;;  %v388_v22 = vpop.f32.mrb[1].mxu1  ;;  %v387_v23 = vadd.f32 %v386_v18, %v223_v9  ;;  %v12670_v18 = vrot.slane %v217_v10, %v410_v2  ;;  %v12197_v10 = vmov 4  }
 0x16c   : > { %v318_v24 = vadd.f32 %v317_v21, %v223_v9  ;;  %v389_v26 = vadd.f32 %v388_v22, %v223_v9  ;;  %v12676_v9 = vpop.permute.xlu0 %2461 }
 0x16d   : > { %v391_v56 = vmax.f32 %v316_v20, 0.0  ;;  %v393_v63 = vmax.f32 %v387_v23, 0.0 }
 0x16e   : > { %v392_v58 = vmax.f32 %v318_v24, 0.0  ;;  %v394_v1 = vmax.f32 %v389_v26, 0.0 }
 0x16f   : > { %v418_v55 = vmul.f32 %v12660_v4, %v393_v63  ;;  %v416_v3 = vmul.f32 %v12664_v61, %v391_v56  ;;  %v5406_v63 = vld [vmem:[#allocation2] sm:$0xff] }
 0x170   : > { %v417_v19 = vmul.f32 %v12662_v25, %v392_v58  ;;  %v419_v8 = vmul.f32 %v12670_v18, %v394_v1  ;;  %v12681_v58 = vpop.permute.xlu0 %2463 }
 0x171   : > { %428 = vrot.lane.b32.xlu1 %v418_v55, %s12195_s29 }
 0x172   : > { %426 = vrot.lane.b32.xlu0 %v417_v19, %s12195_s29 }
 0x174   : > { %v12686_v1 = vpop.permute.xlu0 %2628 }
 0x175   : > { %424 = vrot.lane.b32.xlu1 %v416_v3, %s12195_s29 }
 0x176   : > { %430 = vrot.lane.b32.xlu0 %v419_v8, %s12195_s29 }
 0x178   : > { %v12689_v55 = vpop.permute.xlu0 %2630 }
 0x179   : > { %1946 = vperm.xlu1 %12098, %v12360_v7  }
 0x17a   : > { %5418 = vrot.lane.b32.xlu0 %v5406_v63, %s12196_s30 }
 0x17c   : > { %v12691_v11 = vpop.permute.xlu0 %2946 }
 0x17d   : > { %12099 = vset.pattern.permute.xlu1 %v12197_v10 }
 0x17e   : > { %3604 = vperm.xlu1 %12099, %v12360_v7   ;;  %5593 = vrot.lane.b32.xlu0 %v5406_v63, %s12198_s11 }
 0x180   : > { %v12693_v17 = vpop.permute.xlu0 %2948 }
 0x182   : > { %5763 = vrot.lane.b32.xlu1 %v5406_v63, %s12199_s7 }
 0x184   : > { %v12695_v20 = vpop.permute.xlu0 %3113 }
 0x188   : > { %v12697_v21 = vpop.permute.xlu0 %3115 }
 0x18c   : > { %v12699_v22 = vpop.permute.xlu0 %3434 }
 0x190   : > { %v12701_v7 = vpop.permute.xlu0 %3432 }
 0x194   : > { %v12703_v23 = vpop.permute.xlu0 %2292 }
 0x198   : > { %v12712_v52 = vpop.permute.xlu0 %4257 }
 0x1b1   : > { %v1859_v24 = vpop.f32.mrb[2].mxu0 }
 0x1b2   : > { %v11766_v26 = vadd.f32 %v1859_v24, %v12641_v0  ;;  %v1930_v2 = vpop.f32.mrb[2].mxu1  ;;  %v1861_v56 = vpop.f32.mrb[3].mxu0 }
 0x1b3   : > { %v11768_v19 = vadd.f32 %v1930_v2, %v12641_v0  ;;  %v11767_v3 = vadd.f32 %v1861_v56, %v12641_v0  ;;  %v1932_v8 = vpop.f32.mrb[3].mxu1  ;;  %v12730_v2 = vpop.permute.xlu0 %4255  ;;  %v11604_v56 = vld [vmem:[%s14070_s1 + $0x78] sm:$0xff] }
 0x1b4   : > { %v11769_v63 = vadd.f32 %v1932_v8, %v12641_v0  ;;  %v1939_v57 = vmax.f32 %v11766_v26, 0.0  ;;  %v2139_v0 = vsel %vm2137_vm13, %v12590_v27, %v12593_v28  ;;  %v2138_v26 = vsel %vm2137_vm13, %v12654_v15, %v12590_v27 }
 0x1b5   : > { %v1940_v10 = vmax.f32 %v11767_v3, 0.0  ;;  %v1941_v24 = vmax.f32 %v11768_v19, 0.0  ;;  %v14094_v27 = vmov 0.0   ;;  %v12780_v15 = vsel %vm2632_vm15, %v12686_v1, %v12689_v55 }
 0x1b6   : > { %v1942_v59 = vmax.f32 %v11769_v63, 0.0  ;;  %v12817_v19 = vsel %vm2950_vm2, %v12607_v36, %v12605_v34  ;;  %v2953_v3 = vsel %vm2950_vm2, %v12691_v11, %v12693_v17  ;;  %v3119_v63 = vsel %vm3117_vm3, %v12609_v38, %v12695_v20 }
 0x1b7   : > { %1952 = vmatprep.subr.mxu0 %v1940_v10  ;;  %v3118_v10 = vsel %vm3117_vm3, %v12611_v39, %v12609_v38 }
 0x1b8   : > { %2023 = vmatprep.subr.mxu1 %v1942_v59  ;;  %1953 = vmatpush1.msra.mxu0 %v1939_v57  ;;  %v2140_v59 = vsel %vm2137_vm13, %v12593_v28, %v12595_v29  ;;  %v11592_v57 = vld [vmem:[%s14070_s1 + $0x58] sm:$0xff]  ;;  %v12762_v28 = vsel %vm2632_vm15, %v12601_v32, %v12686_v1  ;;  %vm5773_vm13 = vcmask 146432  }
 0x1b9   : > { %2024 = vmatpush1.msra.mxu1 %v1941_v24  ;;  %11590 = vmatmul.mubr.msk.f32.vlgmr.msra.gmra.mrb[4].mxu0 %vm245_vm1, %v11589_v53 }
 0x1ba   : > { %11591 = vmatmul.mubr.msk.f32.vlgmr.msra.gmra.mrb[4].mxu1 %vm245_vm1, %v11589_v53  ;;  %2148 = vmatprep.subr.mxu0 %v2139_v0  ;;  %v2303_v53 = vsel %vm1448_vm7, %v12667_v54, %v12544_v5  ;;  %v12747_v54 = vpop.permute.xlu0 %4575  ;;  %v2466_v5 = vsel %vm2465_vm14, %v12599_v31, %v12597_v30  ;;  %v2633_v31 = vsel %vm2632_vm15, %v12603_v33, %v12601_v32  ;;  %v11601_v33 = vld [vmem:[%s14070_s1 + $0x70] sm:$0xff]  ;;  %vm439_vm7 = vcmask 1047608  }
 0x1bb   : > { %2219 = vmatprep.subr.mxu1 %v12595_v29  ;;  %2149 = vmatpush1.msra.mxu0 %v2138_v26  ;;  %v3120_v26 = vsel %vm3117_vm3, %v12695_v20, %v12697_v21  ;;  %v11610_v20 = vld [vmem:[%s14070_s1 + $0x88] sm:$0xff]  ;;  %vm6608_vm3 = vcmask 777216  }
 0x1bc   : > { %2220 = vmatpush1.msra.mxu1 %v2140_v59  ;;  %2309 = vmatprep.subr.mxu0 %v12548_v6  ;;  %v2467_v6 = vsel %vm2465_vm14, %v12597_v30, %v12676_v9  ;;  %v11598_v30 = vld [vmem:[%s14070_s1 + $0x68] sm:$0xff] }
 0x1bd   : > { %2380 = vmatprep.subr.mxu1 %v12528_v60  ;;  %2212 = vmatprep.mubr.f32.mxu0 %v14094_v27  ;;  %v11595_v60 = vld [vmem:[%s14070_s1 + $0x60] sm:$0xff] }
 0x1be   : > { %2283 = vmatprep.mubr.f32.mxu1 %v14094_v27  ;;  %11593 = vmatmul.mubr.msk.f32.vlgmr.msra.gmra.mrb[6].mxu0 %vm245_vm1, %v11592_v57  ;;  %v12766_v29 = vpop.permute.xlu0 %4573 }
 0x1bf   : > { %11594 = vmatmul.mubr.msk.f32.vlgmr.msra.gmra.mrb[6].mxu1 %vm245_vm1, %v11592_v57  ;;  %2310 = vmatpush1.msra.mxu0 %v2303_v53  ;;  %v3442_v53 = vsel %vm3440_vm9, %v12699_v22, %v12615_v43 }
 0x1c0   : > { %2381 = vmatpush1.msra.mxu1 %v12534_v62  ;;  %2373 = vmatprep.mubr.f32.mxu0 %v14094_v27  ;;  %v2468_v62 = vsel %vm2465_vm14, %v12676_v9, %v12681_v58  ;;  %vm5941_vm14 = vcmask 998400  }
 0x1c1   : > { %2444 = vmatprep.mubr.f32.mxu1 %v14094_v27  ;;  %2547 = vmatprep.subr.mxu1 %v12681_v58  ;;  %v12802_v58 = vsel %vm2950_vm2, %v12605_v34, %v12691_v11 }
 0x1c2   : > { %2476 = vmatprep.subr.mxu0 %v2467_v6  ;;  %v12783_v9 = vpop.permute.xlu0 %4741 }
 0x1c6   : > { %11596 = vmatmul.mubr.msk.f32.vlgmr.msra.gmra.mrb[6].mxu0 %vm245_vm1, %v11595_v60  ;;  %v12791_v32 = vpop.permute.xlu0 %5055 }
 0x1c7   : > { %11597 = vmatmul.mubr.msk.f32.vlgmr.msra.gmra.mrb[6].mxu1 %vm245_vm1, %v11595_v60  ;;  %2477 = vmatpush1.msra.mxu0 %v2466_v5 }
 0x1c8   : > { %2548 = vmatpush1.msra.mxu1 %v2468_v62  ;;  %2540 = vmatprep.mubr.f32.mxu0 %v14094_v27 }
 0x1c9   : > { %2611 = vmatprep.mubr.f32.mxu1 %v14094_v27  ;;  %2643 = vmatprep.subr.mxu0 %v12762_v28 }
 0x1ca   : > { %2714 = vmatprep.subr.mxu1 %v12689_v55  ;;  %v12806_v1 = vpop.permute.xlu0 %5053 }
 0x1ce   : > { %11599 = vmatmul.mubr.msk.f32.vlgmr.msra.gmra.mrb[6].mxu0 %vm245_vm1, %v11598_v30  ;;  %v12823_v8 = vpop.permute.xlu0 %3934 }
 0x1cf   : > { %11600 = vmatmul.mubr.msk.f32.vlgmr.msra.gmra.mrb[6].mxu1 %vm245_vm1, %v11598_v30  ;;  %2644 = vmatpush1.msra.mxu0 %v2633_v31 }
 0x1d0   : > { %2715 = vmatpush1.msra.mxu1 %v12780_v15  ;;  %2794 = vmatprep.subr.mxu0 %v12399_v13 }
 0x1d1   : > { %2865 = vmatprep.subr.mxu1 %v12395_v12  ;;  %2707 = vmatprep.mubr.f32.mxu0 %v14094_v27 }
 0x1d2   : > { %2778 = vmatprep.mubr.f32.mxu1 %v14094_v27 }
 0x1d6   : > { %11602 = vmatmul.mubr.msk.f32.vlgmr.msra.gmra.mrb[6].mxu0 %vm245_vm1, %v11601_v33 }
 0x1d7   : > { %11603 = vmatmul.mubr.msk.f32.vlgmr.msra.gmra.mrb[6].mxu1 %vm245_vm1, %v11601_v33  ;;  %2795 = vmatpush1.msra.mxu0 %v12409_v16 }
 0x1d8   : > { %2866 = vmatpush1.msra.mxu1 %v12403_v14  ;;  %2858 = vmatprep.mubr.f32.mxu0 %v14094_v27 }
 0x1d9   : > { %2929 = vmatprep.mubr.f32.mxu1 %v14094_v27  ;;  %3032 = vmatprep.subr.mxu1 %v12693_v17  ;;  %v11607_v17 = vld [vmem:[%s14070_s1 + $0x80] sm:$0xff] }
 0x1da   : > { %2961 = vmatprep.subr.mxu0 %v12802_v58 }
 0x1de   : > { %11605 = vmatmul.mubr.msk.f32.vlgmr.msra.gmra.mrb[6].mxu0 %vm245_vm1, %v11604_v56 }
 0x1df   : > { %11606 = vmatmul.mubr.msk.f32.vlgmr.msra.gmra.mrb[6].mxu1 %vm245_vm1, %v11604_v56  ;;  %2962 = vmatpush1.msra.mxu0 %v12817_v19 }
 0x1e0   : > { %3033 = vmatpush1.msra.mxu1 %v2953_v3  ;;  %3025 = vmatprep.mubr.f32.mxu0 %v14094_v27 }
 0x1e1   : > { %3096 = vmatprep.mubr.f32.mxu1 %v14094_v27  ;;  %3128 = vmatprep.subr.mxu0 %v3119_v63 }
 0x1e2   : > { %3199 = vmatprep.subr.mxu1 %v12697_v21 }
 0x1e3   : > { %v429_v34 = vpop.permute.xlu1 %428 }
 0x1e4   : > { %v427_v24 = vpop.permute.xlu0 %426 }
 0x1e5   : > { %v12840_v0 = vsel %vm198_vm11, %v427_v24, %v429_v34 }
 0x1e6   : > { %11608 = vmatmul.mubr.msk.f32.vlgmr.msra.gmra.mrb[6].mxu0 %vm245_vm1, %v11607_v17 }
 0x1e7   : > { %11609 = vmatmul.mubr.msk.f32.vlgmr.msra.gmra.mrb[6].mxu1 %vm245_vm1, %v11607_v17  ;;  %3129 = vmatpush1.msra.mxu0 %v3118_v10  ;;  %v425_v59 = vpop.permute.xlu1 %424 }
 0x1e8   : > { %v12848_v57 = vsel %vm198_vm11, %v425_v59, %v427_v24  ;;  %440 = vst.msk [vmem:[#allocation2 + $0x8] sm:$0xff] %vm439_vm7, %v425_v59  ;;  %3284 = vmatprep.subr.mxu0 %v12463_v41  ;;  %3200 = vmatpush1.msra.mxu1 %v3120_v26  ;;  %v431_v38 = vpop.permute.xlu0 %430  ;;  %v3278_v41 = vsel %vm796_vm4, %v12454_v37, %v12613_v40  ;;  %vm4263_vm4 = vcmask 1031168  }
 0x1e9   : > { %v434_v39 = vsel %vm198_vm11, %v429_v34, %v431_v38  ;;  %3192 = vmatprep.mubr.f32.mxu0 %v14094_v27  ;;  %3263 = vmatprep.mubr.f32.mxu1 %v14094_v27  ;;  %v3441_v37 = vsel %vm3440_vm9, %v12701_v7, %v12699_v22  ;;  %v6932_v38 = vld [vmem:[#allocation2 + $0x30] sm:$0xff] }
 0x1ea   : > { %444 = vst.msk [vmem:[#allocation2 + $0x20] sm:$0xff] %vm443_vm8, %v434_v39  ;;  %3355 = vmatprep.subr.mxu1 %v12613_v40  ;;  %v3443_v40 = vsel %vm3440_vm9, %v12615_v43, %v12617_v45  ;;  %v11616_v43 = vld [vmem:[%s14070_s1 + $0x98] sm:$0xff]  ;;  %vm6775_vm9 = vcmask 769024  }
 0x1ee   : > { %11611 = vmatmul.mubr.msk.f32.vlgmr.msra.gmra.mrb[6].mxu0 %vm245_vm1, %v11610_v20 }
 0x1ef   : > { %11612 = vmatmul.mubr.msk.f32.vlgmr.msra.gmra.mrb[6].mxu1 %vm245_vm1, %v11610_v20  ;;  %3285 = vmatpush1.msra.mxu0 %v12447_v35  ;;  %v12866_v21 = vld [vmem:[#allocation2 + $0x8] sm:$0xff]  ;;  %v11613_v35 = vld [vmem:[%s14070_s1 + $0x90] sm:$0xff]  ;;  %v12102_v20 = vld [vmem:[%s14071_s2] sm:$0xff] }
 0x1f0   : > { %3356 = vmatpush1.msra.mxu1 %v3278_v41  ;;  %5765 = vrot.lane.b32.xlu1 %v12866_v21, %s12199_s7  ;;  %v12981_v41 = vpop.permute.xlu0 %5418 }
 0x1f1   : > { %5420 = vrot.lane.b32.xlu0 %v12866_v21, %s12196_s30  ;;  %v12875_v6 = vld [vmem:[#allocation2 + $0x20] sm:$0xff]  ;;  %3348 = vmatprep.mubr.f32.mxu0 %v14094_v27 }
 0x1f2   : > { %3419 = vmatprep.mubr.f32.mxu1 %v14094_v27  ;;  %3522 = vmatprep.subr.mxu1 %v12617_v45  ;;  %v12202_v45 = vmov 6  }
 0x1f3   : > { %3451 = vmatprep.subr.mxu0 %v3442_v53  ;;  %12100 = vset.pattern.permute.xlu1 %v12202_v45 }
 0x1f4   : > { %5426 = vrot.lane.b32.xlu1 %v12875_v6, %s12196_s30 }
 0x1f5   : > { %5595 = vrot.lane.b32.xlu0 %v12866_v21, %s12198_s11 }
 0x1f6   : > { %11614 = vmatmul.mubr.msk.f32.vlgmr.msra.gmra.mrb[6].mxu0 %vm245_vm1, %v11613_v35 }
 0x1f7   : > { %11615 = vmatmul.mubr.msk.f32.vlgmr.msra.gmra.mrb[6].mxu1 %vm245_vm1, %v11613_v35  ;;  %3452 = vmatpush1.msra.mxu0 %v3441_v37 }
 0x1f8   : > { %5601 = vrot.lane.b32.xlu1 %v12875_v6, %s12198_s11  ;;  %3523 = vmatpush1.msra.mxu1 %v3443_v40  ;;  %v1947_v22 = vpop.permute.xlu1 %1946 }
 0x1f9   : > { %5933 = vrot.lane.b32.xlu0 %v12866_v21, %s12200_s20  ;;  %3515 = vmatprep.mubr.f32.mxu0 %v14094_v27 }
 0x1fa   : > { %3586 = vmatprep.mubr.f32.mxu1 %v14094_v27 }
 0x1fc   : > { %5939 = vrot.lane.b32.xlu1 %v12875_v6, %s12200_s20 }
 0x1fd   : > { %6100 = vrot.lane.b32.xlu0 %v12866_v21, %s12173_s6  ;;  %v12976_v39 = vpop.permute.xlu1 %3604 }
 0x1fe   : > { %11617 = vmatmul.mubr.msk.f32.vlgmr.msra.gmra.mrb[6].mxu0 %vm245_vm1, %v11616_v43 }
 0x1ff   : > { %11618 = vmatmul.mubr.msk.f32.vlgmr.msra.gmra.mrb[6].mxu1 %vm245_vm1, %v11616_v43  ;;  %3674 = vmatprep.mubr.f32.mxu0 %v14094_v27 }
 0x200   : > { %6106 = vrot.lane.b32.xlu1 %v12875_v6, %s12173_s6  ;;  %3745 = vmatprep.mubr.f32.mxu1 %v14094_v27 }
 0x201   : > { %6266 = vrot.lane.b32.xlu0 %v12866_v21, %s12201_s27 }
 0x204   : > { %6272 = vrot.lane.b32.xlu1 %v12875_v6, %s12201_s27 }
 0x205   : > { %5771 = vrot.lane.b32.xlu0 %v12875_v6, %s12199_s7 }
 0x208   : > { %5422 = vrot.lane.b32.xlu1 %v12848_v57, %s12196_s30 }
 0x209   : > { %5424 = vrot.lane.b32.xlu0 %v12840_v0, %s12196_s30 }
 0x20c   : > { %5597 = vrot.lane.b32.xlu1 %v12848_v57, %s12198_s11 }
 0x20d   : > { %5599 = vrot.lane.b32.xlu0 %v12840_v0, %s12198_s11 }
 0x210   : > { %5769 = vrot.lane.b32.xlu1 %v12840_v0, %s12199_s7 }
 0x211   : > { %5767 = vrot.lane.b32.xlu0 %v12848_v57, %s12199_s7 }
 0x214   : > { %5937 = vrot.lane.b32.xlu1 %v12840_v0, %s12200_s20 }
 0x215   : > { %5935 = vrot.lane.b32.xlu0 %v12848_v57, %s12200_s20 }
 0x218   : > { %6104 = vrot.lane.b32.xlu1 %v12840_v0, %s12173_s6 }
 0x219   : > { %6102 = vrot.lane.b32.xlu0 %v12848_v57, %s12173_s6 }
 0x21c   : > { %6270 = vrot.lane.b32.xlu1 %v12840_v0, %s12201_s27 }
 0x21d   : > { %6268 = vrot.lane.b32.xlu0 %v12848_v57, %s12201_s27 }
 0x28c   : > { %v2018_v7 = vpop.f32.mrb[4].mxu0 }
 0x28d   : > { %v2089_v60 = vpop.f32.mrb[4].mxu1  ;;  %v2019_v5 = vadd.f32 %v2018_v7, %v1947_v22  ;;  %v2020_v62 = vpop.f32.mrb[5].mxu0 }
 0x28e   : > { %v2090_v30 = vadd.f32 %v2089_v60, %v1947_v22  ;;  %v2091_v31 = vpop.f32.mrb[5].mxu1  ;;  %v2021_v33 = vadd.f32 %v2020_v62, %v1947_v22 }
 0x28f   : > { %v2092_v56 = vadd.f32 %v2091_v31, %v1947_v22  ;;  %v2094_v63 = vmax.f32 %v2019_v5, 0.0 }
 0x290   : > { %v2096_v3 = vmax.f32 %v2090_v30, 0.0  ;;  %v2095_v17 = vmax.f32 %v2021_v33, 0.0 }
 0x291   : > { %v2097_v34 = vmax.f32 %v2092_v56, 0.0  ;;  %v2098_v26 = vmul.f32 %v2094_v63, %v12664_v61 }
 0x292   : > { %v2100_v10 = vmul.f32 %v2096_v3, %v12660_v4  ;;  %v2099_v59 = vmul.f32 %v2095_v17, %v12662_v25 }
 0x293   : > { %v2101_v24 = vmul.f32 %v2097_v34, %v12670_v18  ;;  %v11619_v34 = vld [vmem:[%s14070_s1 + $0xa0] sm:$0xff] }
 0x294   : > { %2110 = vrot.lane.b32.xlu1 %v2100_v10, %s12195_s29 }
 0x295   : > { %2112 = vrot.lane.b32.xlu0 %v2101_v24, %s12195_s29 }
 0x298   : > { %2106 = vrot.lane.b32.xlu1 %v2098_v26, %s12195_s29  ;;  %v12104_v26 = vld [vmem:[%s12288_s5 + $0x18] sm:$0xff] }
 0x299   : > { %2108 = vrot.lane.b32.xlu0 %v2099_v59, %s12195_s29  ;;  %v12105_v59 = vld [vmem:[%s12288_s5] sm:$0xff] }
 0x29c   : > { %6437 = vrot.lane.b32.xlu1 %v12840_v0, %s12203_s8 }
 0x29d   : > { %6435 = vrot.lane.b32.xlu0 %v12848_v57, %s12203_s8 }
 0x2a0   : > { %6439 = vrot.lane.b32.xlu1 %v12875_v6, %s12203_s8 }
 0x2a1   : > { %6433 = vrot.lane.b32.xlu0 %v12866_v21, %s12203_s8 }
 0x2a4   : > { %6604 = vrot.lane.b32.xlu1 %v12840_v0, %s12204_s12 }
 0x2a5   : > { %6602 = vrot.lane.b32.xlu0 %v12848_v57, %s12204_s12 }
 0x2a8   : > { %6606 = vrot.lane.b32.xlu1 %v12875_v6, %s12204_s12 }
 0x2a9   : > { %6600 = vrot.lane.b32.xlu0 %v12866_v21, %s12204_s12 }
 0x2ac   : > { %6771 = vrot.lane.b32.xlu1 %v12840_v0, %s12205_s9  ;;  %v12985_v0 = vpop.permute.xlu1 %5763 }
 0x2ad   : > { %6769 = vrot.lane.b32.xlu0 %v12848_v57, %s12205_s9  ;;  %v12988_v57 = vpop.permute.xlu0 %5593 }
 0x2b0   : > { %6773 = vrot.lane.b32.xlu1 %v12875_v6, %s12205_s9 }
 0x2b1   : > { %6767 = vrot.lane.b32.xlu0 %v12866_v21, %s12205_s9  ;;  %v12990_v21 = vpop.permute.xlu1 %5765  ;;  %v12992_v53 = vpop.permute.xlu0 %5420 }
 0x2b4   : > { %5225 = vperm.xlu1 %12100, %v12102_v20   ;;  %v12106_v20 = vld [vmem:[%s12288_s5 + $0x10] sm:$0xff] }
 0x2b5   : > { %6944 = vrot.lane.b32.xlu0 %v6932_v38, %s12196_s30  ;;  %v12994_v6 = vpop.permute.xlu1 %5426  ;;  %v12996_v35 = vpop.permute.xlu0 %5595 }
 0x2b8   : > { %7282 = vrot.lane.b32.xlu1 %v6932_v38, %s12199_s7 }
 0x2b9   : > { %7113 = vrot.lane.b32.xlu0 %v6932_v38, %s12198_s11  ;;  %v12998_v37 = vpop.permute.xlu1 %5601  ;;  %v13000_v40 = vpop.permute.xlu0 %5933  ;;  %v11622_v38 = vld [vmem:[%s14070_s1 + $0xa8] sm:$0xff] }
 0x2bd   : > { %v13002_v43 = vpop.permute.xlu1 %5939  ;;  %v13005_v5 = vpop.permute.xlu0 %6100 }
 0x2c1   : > { %v13013_v10 = vpop.permute.xlu1 %6106  ;;  %v13015_v24 = vpop.permute.xlu0 %6266 }
 0x2d1   : > { %v3517_v45 = vpop.f32.mrb[6].mxu0 }
 0x2d2   : > { %v11770_v22 = vadd.f32 %v3517_v45, %v12703_v23  ;;  %v3588_v7 = vpop.f32.mrb[6].mxu1  ;;  %v3519_v60 = vpop.f32.mrb[7].mxu0  ;;  %v3945_v45 = vsel %vm963_vm5, %v12619_v46, %v12483_v47  ;;  %v4265_v46 = vsel %vm4263_vm4, %v12712_v52, %v12623_v49  ;;  %vm4581_vm5 = vcmask 949248  }
 0x2d3   : > { %v11772_v62 = vadd.f32 %v3588_v7, %v12703_v23  ;;  %v11771_v30 = vadd.f32 %v3519_v60, %v12703_v23  ;;  %v3590_v31 = vpop.f32.mrb[7].mxu1  ;;  %v13036_v7 = vpop.permute.xlu0 %5771 }
 0x2d4   : > { %v11773_v33 = vadd.f32 %v3590_v31, %v12703_v23  ;;  %v3597_v3 = vmax.f32 %v11770_v22, 0.0  ;;  %v12103_v23 = vld [vmem:[%s12288_s5 + $0x8] sm:$0xff]  ;;  %v13032_v22 = vpop.permute.xlu1 %6272  ;;  %s12207_s5 = smov [#allocation3]  }
 0x2d5   : > { %v3598_v56 = vmax.f32 %v11771_v30, 0.0  ;;  %v3599_v17 = vmax.f32 %v11772_v62, 0.0  ;;  %v11634_v30 = vld [vmem:[%s14070_s1 + $0xc8] sm:$0xff] }
 0x2d6   : > { %v3600_v63 = vmax.f32 %v11773_v33, 0.0 }
 0x2d7   : > { %3610 = vmatprep.subr.mxu0 %v3598_v56  ;;  %v11637_v56 = vld [vmem:[%s14070_s1 + $0xd0] sm:$0xff] }
 0x2d8   : > { %3681 = vmatprep.subr.mxu1 %v3600_v63  ;;  %3611 = vmatpush1.msra.mxu0 %v3597_v3  ;;  %v13047_v47 = vpop.permute.xlu1 %5422 }
 0x2d9   : > { %3682 = vmatpush1.msra.mxu1 %v3599_v17  ;;  %11620 = vmatmul.mubr.msk.f32.vlgmr.msra.gmra.mrb[8].mxu0 %vm245_vm1, %v11619_v34 }
 0x2da   : > { %11621 = vmatmul.mubr.msk.f32.vlgmr.msra.gmra.mrb[8].mxu1 %vm245_vm1, %v11619_v34  ;;  %3790 = vmatprep.subr.mxu0 %v12103_v23  ;;  %v14097_v34 = vld [vmem:[#allocation8_spill] sm:$0xff]  ;;  %v14098_v23 = vld [vmem:[#allocation11_spill] sm:$0xff] }
 0x2db   : > { %3861 = vmatprep.subr.mxu1 %v12104_v26  ;;  %3791 = vmatpush1.msra.mxu0 %v12105_v59 }
 0x2dc   : > { %3862 = vmatpush1.msra.mxu1 %v12106_v20  ;;  %3951 = vmatprep.subr.mxu0 %v12493_v51  ;;  %v13049_v51 = vpop.permute.xlu0 %5424  ;;  %v14100_v20 = vld [vmem:[#allocation7_spill] sm:$0xff] }
 0x2dd   : > { %4022 = vmatprep.subr.mxu1 %v12470_v42  ;;  %3854 = vmatprep.mubr.f32.mxu0 %v14094_v27  ;;  %v11625_v42 = vld [vmem:[%s14070_s1 + $0xb0] sm:$0xff] }
 0x2de   : > { %3925 = vmatprep.mubr.f32.mxu1 %v14094_v27  ;;  %11623 = vmatmul.mubr.msk.f32.vlgmr.msra.gmra.mrb[10].mxu0 %vm245_vm1, %v11622_v38 }
 0x2df   : > { %11624 = vmatmul.mubr.msk.f32.vlgmr.msra.gmra.mrb[10].mxu1 %vm245_vm1, %v11622_v38  ;;  %3952 = vmatpush1.msra.mxu0 %v3945_v45  ;;  %v14099_v38 = vld [vmem:[#allocation6_spill] sm:$0xff]  ;;  %v4899_v45 = vsel %vm1281_vm6, %v14100_v20, %v14098_v23  ;;  %vm5428_vm6 = vcmask 162816  }
 0x2e0   : > { %4023 = vmatpush1.msra.mxu1 %v12475_v44  ;;  %4107 = vmatprep.subr.mxu0 %v12817_v19  ;;  %v4101_v44 = vsel %vm2950_vm2, %v12621_v48, %v12607_v36  ;;  %v13065_v36 = vpop.permute.xlu0 %5599  ;;  %v11628_v48 = vld [vmem:[%s14070_s1 + $0xb8] sm:$0xff]  ;;  %v4264_v19 = vsel %vm4263_vm4, %v12730_v2, %v12712_v52  ;;  %v11631_v52 = vld [vmem:[%s14070_s1 + $0xc0] sm:$0xff]  ;;  %vm6441_vm2 = vcmask 785408  }
 0x2e1   : > { %4178 = vmatprep.subr.mxu1 %v12691_v11  ;;  %4015 = vmatprep.mubr.f32.mxu0 %v14094_v27  ;;  %v13062_v11 = vpop.permute.xlu1 %5597 }
 0x2e2   : > { %4086 = vmatprep.mubr.f32.mxu1 %v14094_v27 }
 0x2e4   : > { %v13081_v62 = vpop.permute.xlu0 %5767 }
 0x2e5   : > { %v13078_v60 = vpop.permute.xlu1 %5769 }
 0x2e6   : > { %11626 = vmatmul.mubr.msk.f32.vlgmr.msra.gmra.mrb[10].mxu0 %vm245_vm1, %v11625_v42 }
 0x2e7   : > { %11627 = vmatmul.mubr.msk.f32.vlgmr.msra.gmra.mrb[10].mxu1 %vm245_vm1, %v11625_v42  ;;  %4108 = vmatpush1.msra.mxu0 %v4101_v44  ;;  %v14101_v42 = vld [vmem:[#allocation12_spill] sm:$0xff] }
 0x2e8   : > { %4179 = vmatpush1.msra.mxu1 %v12802_v58  ;;  %4274 = vmatprep.subr.mxu0 %v4265_v46  ;;  %v4266_v58 = vsel %vm4263_vm4, %v12623_v49, %v12625_v50  ;;  %v13092_v49 = vpop.permute.xlu0 %5935  ;;  %v5063_v44 = vsel %vm5061_vm10, %v12791_v32, %v14101_v42  ;;  %v14102_v46 = vld [vmem:[#allocation13_spill] sm:$0xff] }
 0x2e9   : > { %4345 = vmatprep.subr.mxu1 %v12625_v50  ;;  %4171 = vmatprep.mubr.f32.mxu0 %v14094_v27  ;;  %v13089_v2 = vpop.permute.xlu1 %5937  ;;  %v14096_v50 = vld [vmem:[#allocation10_spill] sm:$0xff] }
 0x2ea   : > { %4242 = vmatprep.mubr.f32.mxu1 %v14094_v27 }
 0x2ec   : > { %v13111_v33 = vpop.permute.xlu0 %6102 }
 0x2ed   : > { %v13109_v31 = vpop.permute.xlu1 %6104 }
 0x2ee   : > { %11629 = vmatmul.mubr.msk.f32.vlgmr.msra.gmra.mrb[10].mxu0 %vm245_vm1, %v11628_v48 }
 0x2ef   : > { %11630 = vmatmul.mubr.msk.f32.vlgmr.msra.gmra.mrb[10].mxu1 %vm245_vm1, %v11628_v48  ;;  %4275 = vmatpush1.msra.mxu0 %v4264_v19  ;;  %v11643_v19 = vld [vmem:[%s14070_s1 + $0xe0] sm:$0xff] }
 0x2f0   : > { %4346 = vmatpush1.msra.mxu1 %v4266_v58  ;;  %4425 = vmatprep.subr.mxu0 %v12399_v13  ;;  %v5062_v58 = vsel %vm5061_vm10, %v12806_v1, %v12791_v32  ;;  %v11646_v32 = vld [vmem:[%s14070_s1 + $0xe8] sm:$0xff] }
 0x2f1   : > { %4496 = vmatprep.subr.mxu1 %v12395_v12  ;;  %4338 = vmatprep.mubr.f32.mxu0 %v14094_v27  ;;  %v14095_v12 = vld [vmem:[#allocation9_spill] sm:$0xff] }
 0x2f2   : > { %4409 = vmatprep.mubr.f32.mxu1 %v14094_v27  ;;  %v4583_v13 = vsel %vm4581_vm5, %v12747_v54, %v14095_v12 }
 0x2f6   : > { %11632 = vmatmul.mubr.msk.f32.vlgmr.msra.gmra.mrb[10].mxu0 %vm245_vm1, %v11631_v52 }
 0x2f7   : > { %11633 = vmatmul.mubr.msk.f32.vlgmr.msra.gmra.mrb[10].mxu1 %vm245_vm1, %v11631_v52  ;;  %4426 = vmatpush1.msra.mxu0 %v12409_v16  ;;  %v4582_v16 = vsel %vm4581_vm5, %v12766_v29, %v12747_v54  ;;  %v13121_v54 = vpop.permute.xlu1 %6270  ;;  %v13124_v29 = vpop.permute.xlu0 %6268  ;;  %v5064_v52 = vsel %vm5061_vm10, %v14101_v42, %v14102_v46 }
 0x2f8   : > { %4497 = vmatpush1.msra.mxu1 %v12403_v14  ;;  %4592 = vmatprep.subr.mxu0 %v4583_v13  ;;  %v4584_v14 = vsel %vm4581_vm5, %v14095_v12, %v14096_v50 }
 0x2f9   : > { %4663 = vmatprep.subr.mxu1 %v14096_v50  ;;  %4489 = vmatprep.mubr.f32.mxu0 %v14094_v27 }
 0x2fa   : > { %4560 = vmatprep.mubr.f32.mxu1 %v14094_v27 }
 0x2fe   : > { %11635 = vmatmul.mubr.msk.f32.vlgmr.msra.gmra.mrb[10].mxu0 %vm245_vm1, %v11634_v30 }
 0x2ff   : > { %11636 = vmatmul.mubr.msk.f32.vlgmr.msra.gmra.mrb[10].mxu1 %vm245_vm1, %v11634_v30  ;;  %4593 = vmatpush1.msra.mxu0 %v4582_v16 }
 0x300   : > { %4664 = vmatpush1.msra.mxu1 %v4584_v14  ;;  %4749 = vmatprep.subr.mxu0 %v12780_v15  ;;  %v4743_v15 = vsel %vm2632_vm15, %v12689_v55, %v12783_v9  ;;  %v11640_v55 = vld [vmem:[%s14070_s1 + $0xd8] sm:$0xff]  ;;  %vm6274_vm15 = vcmask 982016  }
 0x301   : > { %4656 = vmatprep.mubr.f32.mxu0 %v14094_v27  ;;  %4727 = vmatprep.mubr.f32.mxu1 %v14094_v27 }
 0x302   : > { %4820 = vmatprep.subr.mxu1 %v12783_v9 }
 0x306   : > { %11638 = vmatmul.mubr.msk.f32.vlgmr.msra.gmra.mrb[10].mxu0 %vm245_vm1, %v11637_v56  ;;  %v2111_v3 = vpop.permute.xlu1 %2110 }
 0x307   : > { %11639 = vmatmul.mubr.msk.f32.vlgmr.msra.gmra.mrb[10].mxu1 %vm245_vm1, %v11637_v56  ;;  %4750 = vmatpush1.msra.mxu0 %v12762_v28  ;;  %v2113_v63 = vpop.permute.xlu0 %2112 }
 0x308   : > { %4821 = vmatpush1.msra.mxu1 %v4743_v15  ;;  %4905 = vmatprep.subr.mxu0 %v14097_v34  ;;  %v2116_v17 = vsel %vm198_vm11, %v2111_v3, %v2113_v63 }
 0x309   : > { %4976 = vmatprep.subr.mxu1 %v14098_v23  ;;  %2125 = vst.msk [vmem:[#allocation2 + $0x50] sm:$0xff] %vm443_vm8, %v2116_v17  ;;  %4813 = vmatprep.mubr.f32.mxu0 %v14094_v27 }
 0x30a   : > { %v2107_v26 = vpop.permute.xlu1 %2106  ;;  %4884 = vmatprep.mubr.f32.mxu1 %v14094_v27 }
 0x30b   : > { %2122 = vst.msk [vmem:[#allocation2 + $0x38] sm:$0xff] %vm439_vm7, %v2107_v26  ;;  %v2109_v28 = vpop.permute.xlu0 %2108 }
 0x30c   : > { %v13146_v9 = vsel %vm198_vm11, %v2107_v26, %v2109_v28  ;;  %v13149_v59 = vsel %vm198_vm11, %v2109_v28, %v2111_v3 }
 0x30e   : > { %11641 = vmatmul.mubr.msk.f32.vlgmr.msra.gmra.mrb[10].mxu0 %vm245_vm1, %v11640_v55 }
 0x30f   : > { %11642 = vmatmul.mubr.msk.f32.vlgmr.msra.gmra.mrb[10].mxu1 %vm245_vm1, %v11640_v55  ;;  %4906 = vmatpush1.msra.mxu0 %v14099_v38  ;;  %v13249_v38 = vpop.permute.xlu0 %6435 }
 0x310   : > { %4977 = vmatpush1.msra.mxu1 %v4899_v45  ;;  %5072 = vmatprep.subr.mxu0 %v5063_v44  ;;  %v13182_v12 = vld [vmem:[#allocation2 + $0x50] sm:$0xff] }
 0x311   : > { %5143 = vmatprep.subr.mxu1 %v14102_v46  ;;  %4969 = vmatprep.mubr.f32.mxu0 %v14094_v27 }
 0x312   : > { %v13162_v48 = vld [vmem:[#allocation2 + $0x38] sm:$0xff]  ;;  %5040 = vmatprep.mubr.f32.mxu1 %v14094_v27 }
 0x313   : > { %7284 = vrot.lane.b32.xlu1 %v13162_v48, %s12199_s7  ;;  %6946 = vrot.lane.b32.xlu0 %v13162_v48, %s12196_s30  ;;  %v13259_v45 = vpop.permute.xlu0 %6433 }
 0x316   : > { %11644 = vmatmul.mubr.msk.f32.vlgmr.msra.gmra.mrb[10].mxu0 %vm245_vm1, %v11643_v19 }
 0x317   : > { %11645 = vmatmul.mubr.msk.f32.vlgmr.msra.gmra.mrb[10].mxu1 %vm245_vm1, %v11643_v19  ;;  %7115 = vrot.lane.b32.xlu0 %v13162_v48, %s12198_s11  ;;  %v13269_v44 = vpop.permute.xlu0 %6602 }
 0x318   : > { %5144 = vmatpush1.msra.mxu1 %v5064_v52  ;;  %6952 = vrot.lane.b32.xlu1 %v13182_v12, %s12196_s30  ;;  %v13289_v52 = vld [vmem:[#allocation2 + $0x60] sm:$0xff] }
 0x319   : > { %5073 = vmatpush1.msra.mxu0 %v5062_v58  ;;  %5136 = vmatprep.mubr.f32.mxu0 %v14094_v27 }
 0x31a   : > { %5207 = vmatprep.mubr.f32.mxu1 %v14094_v27 }
 0x31b   : > { %7451 = vrot.lane.b32.xlu0 %v13162_v48, %s12200_s20  ;;  %v13279_v19 = vpop.permute.xlu0 %6600 }
 0x31c   : > { %7121 = vrot.lane.b32.xlu1 %v13182_v12, %s12198_s11 }
 0x31e   : > { %11647 = vmatmul.mubr.msk.f32.vlgmr.msra.gmra.mrb[10].mxu0 %vm245_vm1, %v11646_v32 }
 0x31f   : > { %11648 = vmatmul.mubr.msk.f32.vlgmr.msra.gmra.mrb[10].mxu1 %vm245_vm1, %v11646_v32  ;;  %7290 = vrot.lane.b32.xlu0 %v13182_v12, %s12199_s7  ;;  %v13291_v32 = vpop.permute.xlu0 %6769 }
 0x320   : > { %7457 = vrot.lane.b32.xlu1 %v13182_v12, %s12200_s20  ;;  %5295 = vmatprep.mubr.f32.mxu0 %v14094_v27 }
 0x321   : > { %5366 = vmatprep.mubr.f32.mxu1 %v14094_v27 }
 0x323   : > { %6950 = vrot.lane.b32.xlu0 %v13149_v59, %s12196_s30 }
 0x324   : > { %6948 = vrot.lane.b32.xlu1 %v13146_v9, %s12196_s30 }
 0x327   : > { %7119 = vrot.lane.b32.xlu0 %v13149_v59, %s12198_s11 }
 0x328   : > { %7117 = vrot.lane.b32.xlu1 %v13146_v9, %s12198_s11 }
 0x32b   : > { %7286 = vrot.lane.b32.xlu0 %v13146_v9, %s12199_s7 }
 0x32c   : > { %7288 = vrot.lane.b32.xlu1 %v13149_v59, %s12199_s7 }
 0x32f   : > { %7453 = vrot.lane.b32.xlu0 %v13146_v9, %s12200_s20 }
 0x330   : > { %7455 = vrot.lane.b32.xlu1 %v13149_v59, %s12200_s20 }
 0x3ac   : > { %v3676_v1 = vpop.f32.mrb[8].mxu0 }
 0x3ad   : > { %v3747_v13 = vpop.f32.mrb[8].mxu1  ;;  %v3677_v50 = vadd.f32 %v3676_v1, %v12976_v39  ;;  %v3678_v30 = vpop.f32.mrb[9].mxu0 }
 0x3ae   : > { %v3748_v16 = vadd.f32 %v3747_v13, %v12976_v39  ;;  %v3749_v14 = vpop.f32.mrb[9].mxu1  ;;  %v3679_v56 = vadd.f32 %v3678_v30, %v12976_v39 }
 0x3af   : > { %v3750_v3 = vadd.f32 %v3749_v14, %v12976_v39  ;;  %v3752_v63 = vmax.f32 %v3677_v50, 0.0  ;;  %v13245_v39 = vpop.permute.xlu1 %6437 }
 0x3b0   : > { %v3754_v15 = vmax.f32 %v3748_v16, 0.0  ;;  %v3753_v17 = vmax.f32 %v3679_v56, 0.0 }
 0x3b1   : > { %v3755_v34 = vmax.f32 %v3750_v3, 0.0  ;;  %v3756_v28 = vmul.f32 %v3752_v63, %v12664_v61 }
 0x3b2   : > { %v3758_v23 = vmul.f32 %v3754_v15, %v12660_v4  ;;  %v3757_v55 = vmul.f32 %v3753_v17, %v12662_v25 }
 0x3b3   : > { %v3759_v26 = vmul.f32 %v3755_v34, %v12670_v18  ;;  %v13255_v20 = vpop.permute.xlu1 %6439 }
 0x3b4   : > { %3768 = vrot.lane.b32.xlu1 %v3758_v23, %s12195_s29 }
 0x3b5   : > { %3770 = vrot.lane.b32.xlu0 %v3759_v26, %s12195_s29  ;;  %v11649_v26 = vld [vmem:[%s14070_s1 + $0xf0] sm:$0xff] }
 0x3b7   : > { %v13265_v42 = vpop.permute.xlu1 %6604 }
 0x3b8   : > { %3764 = vrot.lane.b32.xlu1 %v3756_v28, %s12195_s29 }
 0x3b9   : > { %3766 = vrot.lane.b32.xlu0 %v3757_v55, %s12195_s29 }
 0x3bb   : > { %v13275_v46 = vpop.permute.xlu1 %6606 }
 0x3bc   : > { %7621 = vrot.lane.b32.xlu1 %v13149_v59, %s12173_s6 }
 0x3bd   : > { %7619 = vrot.lane.b32.xlu0 %v13146_v9, %s12173_s6 }
 0x3bf   : > { %v13285_v58 = vpop.permute.xlu1 %6771 }
 0x3c0   : > { %7623 = vrot.lane.b32.xlu1 %v13182_v12, %s12173_s6 }
 0x3c1   : > { %7617 = vrot.lane.b32.xlu0 %v13162_v48, %s12173_s6 }
 0x3c4   : > { %7787 = vrot.lane.b32.xlu1 %v13149_v59, %s12201_s27 }
 0x3c5   : > { %7785 = vrot.lane.b32.xlu0 %v13146_v9, %s12201_s27 }
 0x3c8   : > { %7789 = vrot.lane.b32.xlu1 %v13182_v12, %s12201_s27 }
 0x3c9   : > { %7783 = vrot.lane.b32.xlu0 %v13162_v48, %s12201_s27 }
 0x3cc   : > { %7953 = vrot.lane.b32.xlu1 %v13149_v59, %s12203_s8 }
 0x3cd   : > { %7951 = vrot.lane.b32.xlu0 %v13146_v9, %s12203_s8 }
 0x3d0   : > { %7955 = vrot.lane.b32.xlu1 %v13182_v12, %s12203_s8 }
 0x3d1   : > { %7949 = vrot.lane.b32.xlu0 %v13162_v48, %s12203_s8 }
 0x3d4   : > { %8119 = vrot.lane.b32.xlu1 %v13149_v59, %s12204_s12 }
 0x3d5   : > { %8117 = vrot.lane.b32.xlu0 %v13146_v9, %s12204_s12 }
 0x3d8   : > { %8121 = vrot.lane.b32.xlu1 %v13182_v12, %s12204_s12 }
 0x3d9   : > { %8115 = vrot.lane.b32.xlu0 %v13162_v48, %s12204_s12 }
 0x3dc   : > { %8285 = vrot.lane.b32.xlu1 %v13149_v59, %s12205_s9  ;;  %v13297_v59 = vpop.permute.xlu1 %6773 }
 0x3dd   : > { %8283 = vrot.lane.b32.xlu0 %v13146_v9, %s12205_s9  ;;  %v13299_v9 = vpop.permute.xlu0 %6767 }
 0x3e0   : > { %8287 = vrot.lane.b32.xlu1 %v13182_v12, %s12205_s9  ;;  %v13301_v12 = vpop.permute.xlu1 %5225 }
 0x3e1   : > { %8281 = vrot.lane.b32.xlu0 %v13162_v48, %s12205_s9  ;;  %v13303_v1 = vpop.permute.xlu0 %6944 }
 0x3e4   : > { %8626 = vrot.lane.b32.xlu1 %v13289_v52, %s12198_s11  ;;  %v13305_v13 = vpop.permute.xlu1 %7282 }
 0x3e5   : > { %8457 = vrot.lane.b32.xlu0 %v13289_v52, %s12196_s30  ;;  %v13308_v14 = vpop.permute.xlu0 %7113 }
 0x3e8   : > { %v13316_v55 = vpop.permute.xlu1 %7284 }
 0x3f1   : > { %v5138_v48 = vpop.f32.mrb[10].mxu0 }
 0x3f2   : > { %v11774_v50 = vadd.f32 %v5138_v48, %v12823_v8  ;;  %v5209_v30 = vpop.f32.mrb[10].mxu1  ;;  %v5140_v16 = vpop.f32.mrb[11].mxu0 }
 0x3f3   : > { %v11776_v56 = vadd.f32 %v5209_v30, %v12823_v8  ;;  %v11775_v3 = vadd.f32 %v5140_v16, %v12823_v8  ;;  %v5211_v15 = vpop.f32.mrb[11].mxu1  ;;  %v13318_v48 = vpop.permute.xlu0 %6946  ;;  %v5429_v30 = vsel %vm5428_vm6, %v12981_v41, %v12992_v53  ;;  %v5431_v16 = vsel %vm5428_vm6, %v13047_v47, %v13049_v51 }
 0x3f4   : > { %v11777_v63 = vadd.f32 %v5211_v15, %v12823_v8  ;;  %v5218_v17 = vmax.f32 %v11774_v50, 0.0  ;;  %v5430_v8 = vsel %vm5428_vm6, %v12992_v53, %v13047_v47  ;;  %v5432_v50 = vsel %vm5428_vm6, %v13049_v51, %v12994_v6  ;;  %v13344_v53 = vpop.permute.xlu1 %6952 }
 0x3f5   : > { %v5219_v34 = vmax.f32 %v11775_v3, 0.0  ;;  %v5220_v28 = vmax.f32 %v11776_v56, 0.0  ;;  %v5605_v56 = vsel %vm5603_vm12, %v12996_v35, %v13062_v11  ;;  %v11652_v3 = vld [vmem:[%s14070_s1 + $0xf8] sm:$0xff]  ;;  %v5607_v41 = vsel %vm5603_vm12, %v13065_v36, %v12998_v37 }
 0x3f6   : > { %v5221_v23 = vmax.f32 %v11777_v63, 0.0  ;;  %v5604_v6 = vsel %vm5603_vm12, %v12988_v57, %v12996_v35  ;;  %v5606_v37 = vsel %vm5603_vm12, %v13062_v11, %v13065_v36  ;;  %v5775_v51 = vsel %vm5773_vm13, %v12990_v21, %v13081_v62  ;;  %v11655_v35 = vld [vmem:[%s14070_s1 + $0x100] sm:$0xff] }
 0x3f7   : > { %5231 = vmatprep.subr.mxu0 %v5219_v34  ;;  %v13351_v47 = vpop.permute.xlu0 %7115  ;;  %v5777_v57 = vsel %vm5773_vm13, %v13078_v60, %v13036_v7  ;;  %v5774_v7 = vsel %vm5773_vm13, %v12985_v0, %v12990_v21  ;;  %v5776_v15 = vsel %vm5773_vm13, %v13081_v62, %v13078_v60  ;;  %v5943_v63 = vsel %vm5941_vm14, %v13092_v49, %v13089_v2  ;;  %v11658_v21 = vld [vmem:[%s14070_s1 + $0x108] sm:$0xff] }
 0x3f8   : > { %5302 = vmatprep.subr.mxu1 %v5221_v23  ;;  %5232 = vmatpush1.msra.mxu0 %v5218_v17  ;;  %v13368_v11 = vpop.permute.xlu1 %7121  ;;  %v5942_v60 = vsel %vm5941_vm14, %v13000_v40, %v13092_v49  ;;  %v5944_v62 = vsel %vm5941_vm14, %v13089_v2, %v13002_v43  ;;  %v6109_v17 = vsel %vm237_vm0, %v13111_v33, %v13109_v31  ;;  %v11661_v40 = vld [vmem:[%s14070_s1 + $0x110] sm:$0xff] }
 0x3f9   : > { %5303 = vmatpush1.msra.mxu1 %v5220_v28  ;;  %11650 = vmatmul.mubr.msk.f32.vlgmr.msra.gmra.mrb[12].mxu0 %vm245_vm1, %v11649_v26  ;;  %v6108_v2 = vsel %vm237_vm0, %v13005_v5, %v13111_v33  ;;  %v6110_v28 = vsel %vm237_vm0, %v13109_v31, %v13013_v10  ;;  %v11664_v5 = vld [vmem:[%s14070_s1 + $0x118] sm:$0xff]  ;;  %v6275_v31 = vsel %vm6274_vm15, %v13015_v24, %v13124_v29 }
 0x3fa   : > { %11651 = vmatmul.mubr.msk.f32.vlgmr.msra.gmra.mrb[12].mxu1 %vm245_vm1, %v11649_v26  ;;  %5440 = vmatprep.subr.mxu0 %v5430_v8  ;;  %v6276_v8 = vsel %vm6274_vm15, %v13124_v29, %v13121_v54 }
 0x3fb   : > { %5511 = vmatprep.subr.mxu1 %v5432_v50  ;;  %5441 = vmatpush1.msra.mxu0 %v5429_v30  ;;  %v13370_v36 = vpop.permute.xlu0 %7451  ;;  %v6277_v50 = vsel %vm6274_vm15, %v13121_v54, %v13032_v22  ;;  %v6443_v30 = vsel %vm6441_vm2, %v13249_v38, %v13245_v39  ;;  %v6442_v54 = vsel %vm6441_vm2, %v13259_v45, %v13249_v38 }
 0x3fc   : > { %5512 = vmatpush1.msra.mxu1 %v5431_v16  ;;  %5615 = vmatprep.subr.mxu0 %v5605_v56  ;;  %v13385_v34 = vpop.permute.xlu1 %7457  ;;  %v6444_v56 = vsel %vm6441_vm2, %v13245_v39, %v13255_v20 }
 0x3fd   : > { %5686 = vmatprep.subr.mxu1 %v5607_v41  ;;  %5504 = vmatprep.mubr.f32.mxu0 %v14094_v27 }
 0x3fe   : > { %5575 = vmatprep.mubr.f32.mxu1 %v14094_v27  ;;  %11653 = vmatmul.mubr.msk.f32.vlgmr.msra.gmra.mrb[14].mxu0 %vm245_vm1, %v11652_v3 }
 0x3ff   : > { %11654 = vmatmul.mubr.msk.f32.vlgmr.msra.gmra.mrb[14].mxu1 %vm245_vm1, %v11652_v3  ;;  %5616 = vmatpush1.msra.mxu0 %v5604_v6  ;;  %v13388_v0 = vpop.permute.xlu0 %7290  ;;  %v6610_v3 = vsel %vm6608_vm3, %v13269_v44, %v13265_v42 }
 0x400   : > { %5687 = vmatpush1.msra.mxu1 %v5606_v37  ;;  %5785 = vmatprep.subr.mxu0 %v5775_v51  ;;  %v13404_v23 = vpop.permute.xlu1 %6948  ;;  %v6609_v51 = vsel %vm6608_vm3, %v13279_v19, %v13269_v44  ;;  %v6778_v19 = vsel %vm6775_vm9, %v13285_v58, %v13297_v59 }
 0x401   : > { %5856 = vmatprep.subr.mxu1 %v5777_v57  ;;  %5679 = vmatprep.mubr.f32.mxu0 %v14094_v27  ;;  %v6611_v57 = vsel %vm6608_vm3, %v13265_v42, %v13275_v46  ;;  %v11673_v42 = vld [vmem:[%s14070_s1 + $0x130] sm:$0xff] }
 0x402   : > { %5750 = vmatprep.mubr.f32.mxu1 %v14094_v27 }
 0x403   : > { %v13406_v26 = vpop.permute.xlu0 %6950 }
 0x406   : > { %11656 = vmatmul.mubr.msk.f32.vlgmr.msra.gmra.mrb[14].mxu0 %vm245_vm1, %v11655_v35 }
 0x407   : > { %11657 = vmatmul.mubr.msk.f32.vlgmr.msra.gmra.mrb[14].mxu1 %vm245_vm1, %v11655_v35  ;;  %5786 = vmatpush1.msra.mxu0 %v5774_v7  ;;  %v13420_v49 = vpop.permute.xlu0 %7119  ;;  %v6777_v35 = vsel %vm6775_vm9, %v13291_v32, %v13285_v58  ;;  %v6955_v7 = vsel %vm5428_vm6, %v13318_v48, %v13404_v23  ;;  %v11676_v58 = vld [vmem:[%s14070_s1 + $0x138] sm:$0xff] }
 0x408   : > { %5857 = vmatpush1.msra.mxu1 %v5776_v15  ;;  %5952 = vmatprep.subr.mxu0 %v5943_v63  ;;  %v6957_v15 = vsel %vm5428_vm6, %v13406_v26, %v13344_v53  ;;  %v7126_v63 = vsel %vm5603_vm12, %v13420_v49, %v13368_v11  ;;  %v7123_v11 = vsel %vm5603_vm12, %v13308_v14, %v13351_v47 }
 0x409   : > { %6023 = vmatprep.subr.mxu1 %v13002_v43  ;;  %5849 = vmatprep.mubr.f32.mxu0 %v14094_v27  ;;  %v13414_v43 = vpop.permute.xlu1 %7117 }
 0x40a   : > { %5920 = vmatprep.mubr.f32.mxu1 %v14094_v27  ;;  %v7124_v53 = vsel %vm5603_vm12, %v13351_v47, %v13414_v43  ;;  %v11682_v47 = vld [vmem:[%s14070_s1 + $0x148] sm:$0xff] }
 0x40d   : > { %v13435_v33 = vpop.permute.xlu1 %7288 }
 0x40e   : > { %11659 = vmatmul.mubr.msk.f32.vlgmr.msra.gmra.mrb[14].mxu0 %vm245_vm1, %v11658_v21 }
 0x40f   : > { %11660 = vmatmul.mubr.msk.f32.vlgmr.msra.gmra.mrb[14].mxu1 %vm245_vm1, %v11658_v21  ;;  %5953 = vmatpush1.msra.mxu0 %v5942_v60  ;;  %v7125_v60 = vsel %vm5603_vm12, %v13414_v43, %v13420_v49 }
 0x410   : > { %6024 = vmatpush1.msra.mxu1 %v5944_v62  ;;  %6118 = vmatprep.subr.mxu0 %v6109_v17 }
 0x411   : > { %6189 = vmatprep.subr.mxu1 %v13013_v10  ;;  %6016 = vmatprep.mubr.f32.mxu0 %v14094_v27  ;;  %v13437_v10 = vpop.permute.xlu0 %7286  ;;  %v13452_v16 = vpop.permute.xlu1 %7455 }
 0x412   : > { %6087 = vmatprep.mubr.f32.mxu1 %v14094_v27  ;;  %v7293_v62 = vsel %vm5773_vm13, %v13316_v55, %v13437_v10 }
 0x415   : > { %v13455_v24 = vpop.permute.xlu0 %7453 }
 0x416   : > { %11662 = vmatmul.mubr.msk.f32.vlgmr.msra.gmra.mrb[14].mxu0 %vm245_vm1, %v11661_v40  ;;  %v7460_v43 = vsel %vm5941_vm14, %v13455_v24, %v13452_v16 }
 0x417   : > { %11663 = vmatmul.mubr.msk.f32.vlgmr.msra.gmra.mrb[14].mxu1 %vm245_vm1, %v11661_v40  ;;  %6119 = vmatpush1.msra.mxu0 %v6108_v2  ;;  %v7292_v40 = vsel %vm5773_vm13, %v13305_v13, %v13316_v55  ;;  %v11685_v13 = vld [vmem:[%s14070_s1 + $0x150] sm:$0xff] }
 0x418   : > { %6190 = vmatpush1.msra.mxu1 %v6110_v28  ;;  %6285 = vmatprep.subr.mxu0 %v6276_v8  ;;  %v7459_v28 = vsel %vm5941_vm14, %v13370_v36, %v13455_v24  ;;  %v7461_v8 = vsel %vm5941_vm14, %v13452_v16, %v13385_v34  ;;  %v11688_v36 = vld [vmem:[%s14070_s1 + $0x158] sm:$0xff]  ;;  %v11691_v24 = vld [vmem:[%s14070_s1 + $0x160] sm:$0xff] }
 0x419   : > { %6356 = vmatprep.subr.mxu1 %v13032_v22  ;;  %6182 = vmatprep.mubr.f32.mxu0 %v14094_v27  ;;  %v11667_v22 = vld [vmem:[%s14070_s1 + $0x120] sm:$0xff] }
 0x41a   : > { %6253 = vmatprep.mubr.f32.mxu1 %v14094_v27 }
 0x41e   : > { %11665 = vmatmul.mubr.msk.f32.vlgmr.msra.gmra.mrb[14].mxu0 %vm245_vm1, %v11664_v5 }
 0x41f   : > { %11666 = vmatmul.mubr.msk.f32.vlgmr.msra.gmra.mrb[14].mxu1 %vm245_vm1, %v11664_v5  ;;  %6286 = vmatpush1.msra.mxu0 %v6275_v31 }
 0x420   : > { %6357 = vmatpush1.msra.mxu1 %v6277_v50  ;;  %6452 = vmatprep.subr.mxu0 %v6443_v30 }
 0x421   : > { %6523 = vmatprep.subr.mxu1 %v13255_v20  ;;  %6349 = vmatprep.mubr.f32.mxu0 %v14094_v27  ;;  %v11670_v20 = vld [vmem:[%s14070_s1 + $0x128] sm:$0xff] }
 0x422   : > { %6420 = vmatprep.mubr.f32.mxu1 %v14094_v27 }
 0x426   : > { %11668 = vmatmul.mubr.msk.f32.vlgmr.msra.gmra.mrb[14].mxu0 %vm245_vm1, %v11667_v22  ;;  %v3769_v29 = vpop.permute.xlu1 %3768 }
 0x427   : > { %11669 = vmatmul.mubr.msk.f32.vlgmr.msra.gmra.mrb[14].mxu1 %vm245_vm1, %v11667_v22  ;;  %6453 = vmatpush1.msra.mxu0 %v6442_v54  ;;  %v3771_v41 = vpop.permute.xlu0 %3770 }
 0x428   : > { %6524 = vmatpush1.msra.mxu1 %v6444_v56  ;;  %6619 = vmatprep.subr.mxu0 %v6610_v3  ;;  %v3774_v6 = vsel %vm198_vm11, %v3769_v29, %v3771_v41  ;;  %v11694_v41 = vld [vmem:[%s14070_s1 + $0x168] sm:$0xff] }
 0x429   : > { %6690 = vmatprep.subr.mxu1 %v13275_v46  ;;  %3783 = vst.msk [vmem:[#allocation2 + $0x80] sm:$0xff] %vm443_vm8, %v3774_v6  ;;  %6516 = vmatprep.mubr.f32.mxu0 %v14094_v27  ;;  %v6776_v46 = vsel %vm6775_vm9, %v13299_v9, %v13291_v32  ;;  %v6956_v9 = vsel %vm5428_vm6, %v13404_v23, %v13406_v26 }
 0x42a   : > { %v3765_v38 = vpop.permute.xlu1 %3764  ;;  %6587 = vmatprep.mubr.f32.mxu1 %v14094_v27  ;;  %v7295_v23 = vsel %vm5773_vm13, %v13435_v33, %v13388_v0  ;;  %v7294_v0 = vsel %vm5773_vm13, %v13437_v10, %v13435_v33 }
 0x42b   : > { %3780 = vst.msk [vmem:[#allocation2 + $0x68] sm:$0xff] %vm439_vm7, %v3765_v38  ;;  %v3767_v39 = vpop.permute.xlu0 %3766 }
 0x42c   : > { %v13481_v45 = vsel %vm198_vm11, %v3765_v38, %v3767_v39  ;;  %v13484_v37 = vsel %vm198_vm11, %v3767_v39, %v3769_v29 }
 0x42e   : > { %11671 = vmatmul.mubr.msk.f32.vlgmr.msra.gmra.mrb[14].mxu0 %vm245_vm1, %v11670_v20 }
 0x42f   : > { %11672 = vmatmul.mubr.msk.f32.vlgmr.msra.gmra.mrb[14].mxu1 %vm245_vm1, %v11670_v20  ;;  %6620 = vmatpush1.msra.mxu0 %v6609_v51  ;;  %v7620_v21 = vpop.permute.xlu0 %7619 }
 0x430   : > { %6691 = vmatpush1.msra.mxu1 %v6611_v57  ;;  %6786 = vmatprep.subr.mxu0 %v6777_v35  ;;  %v13525_v32 = vld [vmem:[#allocation2 + $0x80] sm:$0xff]  ;;  %v11697_v35 = vld [vmem:[%s14070_s1 + $0x170] sm:$0xff] }
 0x431   : > { %6857 = vmatprep.subr.mxu1 %v13297_v59  ;;  %6683 = vmatprep.mubr.f32.mxu0 %v14094_v27  ;;  %v6954_v59 = vsel %vm5428_vm6, %v13303_v1, %v13318_v48  ;;  %v7622_v1 = vpop.permute.xlu1 %7621  ;;  %v11679_v48 = vld [vmem:[%s14070_s1 + $0x140] sm:$0xff] }
 0x432   : > { %v13499_v44 = vld [vmem:[#allocation2 + $0x68] sm:$0xff]  ;;  %6754 = vmatprep.mubr.f32.mxu1 %v14094_v27  ;;  %v7626_v5 = vsel %vm237_vm0, %v7620_v21, %v7622_v1 }
 0x433   : > { %8628 = vrot.lane.b32.xlu1 %v13499_v44, %s12198_s11  ;;  %8459 = vrot.lane.b32.xlu0 %v13499_v44, %s12196_s30  ;;  %v7618_v14 = vpop.permute.xlu0 %7617 }
 0x434   : > { %v7625_v31 = vsel %vm237_vm0, %v7618_v14, %v7620_v21 }
 0x435   : > { %v7624_v17 = vpop.permute.xlu1 %7623 }
 0x436   : > { %11674 = vmatmul.mubr.msk.f32.vlgmr.msra.gmra.mrb[14].mxu0 %vm245_vm1, %v11673_v42 }
 0x437   : > { %11675 = vmatmul.mubr.msk.f32.vlgmr.msra.gmra.mrb[14].mxu1 %vm245_vm1, %v11673_v42  ;;  %6787 = vmatpush1.msra.mxu0 %v6776_v46  ;;  %v7786_v2 = vpop.permute.xlu0 %7785 }
 0x438   : > { %6858 = vmatpush1.msra.mxu1 %v6778_v19  ;;  %6965 = vmatprep.subr.mxu0 %v6955_v7 }
 0x439   : > { %7036 = vmatprep.subr.mxu1 %v6957_v15  ;;  %8797 = vrot.lane.b32.xlu0 %v13499_v44, %s12199_s7  ;;  %v7788_v26 = vpop.permute.xlu1 %7787 }
 0x43a   : > { %8465 = vrot.lane.b32.xlu1 %v13525_v32, %s12196_s30  ;;  %6850 = vmatprep.mubr.f32.mxu0 %v14094_v27  ;;  %v7792_v50 = vsel %vm6274_vm15, %v7786_v2, %v7788_v26 }
 0x43b   : > { %6921 = vmatprep.mubr.f32.mxu1 %v14094_v27  ;;  %v7784_v49 = vpop.permute.xlu0 %7783 }
 0x43c   : > { %v7791_v22 = vsel %vm6274_vm15, %v7784_v49, %v7786_v2 }
 0x43d   : > { %8634 = vrot.lane.b32.xlu0 %v13525_v32, %s12198_s11  ;;  %v7790_v55 = vpop.permute.xlu1 %7789 }
 0x43e   : > { %8461 = vrot.lane.b32.xlu1 %v13481_v45, %s12196_s30  ;;  %11677 = vmatmul.mubr.msk.f32.vlgmr.msra.gmra.mrb[14].mxu0 %vm245_vm1, %v11676_v58  ;;  %v7793_v29 = vsel %vm6274_vm15, %v7788_v26, %v7790_v55 }
 0x43f   : > { %11678 = vmatmul.mubr.msk.f32.vlgmr.msra.gmra.mrb[14].mxu1 %vm245_vm1, %v11676_v58  ;;  %6966 = vmatpush1.msra.mxu0 %v6954_v59  ;;  %v7952_v10 = vpop.permute.xlu0 %7951  ;;  %v11700_v59 = vld [vmem:[%s14070_s1 + $0x178] sm:$0xff] }
 0x440   : > { %7037 = vmatpush1.msra.mxu1 %v6956_v9  ;;  %7134 = vmatprep.subr.mxu0 %v7124_v53 }
 0x441   : > { %7205 = vmatprep.subr.mxu1 %v7126_v63  ;;  %8463 = vrot.lane.b32.xlu0 %v13484_v37, %s12196_s30  ;;  %v7954_v33 = vpop.permute.xlu1 %7953  ;;  %v11703_v63 = vld [vmem:[%s14070_s1 + $0x180] sm:$0xff] }
 0x442   : > { %8632 = vrot.lane.b32.xlu1 %v13484_v37, %s12198_s11  ;;  %7029 = vmatprep.mubr.f32.mxu0 %v14094_v27  ;;  %v7958_v56 = vsel %vm6441_vm2, %v7952_v10, %v7954_v33 }
 0x443   : > { %7100 = vmatprep.mubr.f32.mxu1 %v14094_v27  ;;  %v7950_v16 = vpop.permute.xlu0 %7949 }
 0x444   : > { %v7957_v38 = vsel %vm6441_vm2, %v7950_v16, %v7952_v10 }
 0x445   : > { %8630 = vrot.lane.b32.xlu0 %v13481_v45, %s12198_s11  ;;  %v7956_v30 = vpop.permute.xlu1 %7955 }
 0x446   : > { %8799 = vrot.lane.b32.xlu1 %v13481_v45, %s12199_s7  ;;  %11680 = vmatmul.mubr.msk.f32.vlgmr.msra.gmra.mrb[14].mxu0 %vm245_vm1, %v11679_v48  ;;  %v7959_v20 = vsel %vm6441_vm2, %v7954_v33, %v7956_v30 }
 0x447   : > { %11681 = vmatmul.mubr.msk.f32.vlgmr.msra.gmra.mrb[14].mxu1 %vm245_vm1, %v11679_v48  ;;  %7135 = vmatpush1.msra.mxu0 %v7123_v11  ;;  %v8118_v3 = vpop.permute.xlu0 %8117 }
 0x448   : > { %7206 = vmatpush1.msra.mxu1 %v7125_v60  ;;  %7303 = vmatprep.subr.mxu0 %v7293_v62 }
 0x449   : > { %7374 = vmatprep.subr.mxu1 %v7295_v23  ;;  %7198 = vmatprep.mubr.f32.mxu0 %v14094_v27  ;;  %v8120_v54 = vpop.permute.xlu1 %8119 }
 0x44a   : > { %7269 = vmatprep.mubr.f32.mxu1 %v14094_v27  ;;  %v8124_v51 = vsel %vm6608_vm3, %v8118_v3, %v8120_v54 }
 0x44b   : > { %v8116_v39 = vpop.permute.xlu0 %8115 }
 0x44c   : > { %v8123_v46 = vsel %vm6608_vm3, %v8116_v39, %v8118_v3  ;;  %v11709_v3 = vld [vmem:[%s14070_s1 + $0x190] sm:$0xff] }
 0x44d   : > { %v8122_v6 = vpop.permute.xlu1 %8121 }
 0x44e   : > { %11683 = vmatmul.mubr.msk.f32.vlgmr.msra.gmra.mrb[14].mxu0 %vm245_vm1, %v11682_v47  ;;  %v8125_v19 = vsel %vm6608_vm3, %v8120_v54, %v8122_v6 }
 0x44f   : > { %11684 = vmatmul.mubr.msk.f32.vlgmr.msra.gmra.mrb[14].mxu1 %vm245_vm1, %v11682_v47  ;;  %7304 = vmatpush1.msra.mxu0 %v7292_v40  ;;  %v8284_v42 = vpop.permute.xlu0 %8283  ;;  %v11706_v47 = vld [vmem:[%s14070_s1 + $0x188] sm:$0xff] }
 0x450   : > { %7375 = vmatpush1.msra.mxu1 %v7294_v0  ;;  %7469 = vmatprep.subr.mxu0 %v7460_v43 }
 0x451   : > { %7540 = vmatprep.subr.mxu1 %v13385_v34  ;;  %7367 = vmatprep.mubr.f32.mxu0 %v14094_v27  ;;  %v7627_v34 = vsel %vm237_vm0, %v7622_v1, %v7624_v17  ;;  %v8286_v57 = vpop.permute.xlu1 %8285 }
 0x452   : > { %7438 = vmatprep.mubr.f32.mxu1 %v14094_v27  ;;  %v8290_v7 = vsel %vm6775_vm9, %v8284_v42, %v8286_v57 }
 0x453   : > { %v8282_v58 = vpop.permute.xlu0 %8281 }
 0x454   : > { %v8289_v9 = vsel %vm6775_vm9, %v8282_v58, %v8284_v42 }
 0x455   : > { %v8288_v15 = vpop.permute.xlu1 %8287 }
 0x456   : > { %11686 = vmatmul.mubr.msk.f32.vlgmr.msra.gmra.mrb[14].mxu0 %vm245_vm1, %v11685_v13  ;;  %v8291_v53 = vsel %vm6775_vm9, %v8286_v57, %v8288_v15 }
 0x457   : > { %11687 = vmatmul.mubr.msk.f32.vlgmr.msra.gmra.mrb[14].mxu1 %vm245_vm1, %v11685_v13  ;;  %7470 = vmatpush1.msra.mxu0 %v7459_v28  ;;  %v8458_v1 = vpop.permute.xlu0 %8457 }
 0x458   : > { %7541 = vmatpush1.msra.mxu1 %v7461_v8  ;;  %7635 = vmatprep.subr.mxu0 %v7626_v5 }
 0x459   : > { %7706 = vmatprep.subr.mxu1 %v7624_v17  ;;  %7533 = vmatprep.mubr.f32.mxu0 %v14094_v27  ;;  %v8627_v48 = vpop.permute.xlu1 %8626 }
 0x45a   : > { %7604 = vmatprep.mubr.f32.mxu1 %v14094_v27 }
 0x45e   : > { %11689 = vmatmul.mubr.msk.f32.vlgmr.msra.gmra.mrb[14].mxu0 %vm245_vm1, %v11688_v36 }
 0x45f   : > { %11690 = vmatmul.mubr.msk.f32.vlgmr.msra.gmra.mrb[14].mxu1 %vm245_vm1, %v11688_v36  ;;  %7636 = vmatpush1.msra.mxu0 %v7625_v31 }
 0x460   : > { %7707 = vmatpush1.msra.mxu1 %v7627_v34  ;;  %7801 = vmatprep.subr.mxu0 %v7792_v50 }
 0x461   : > { %7872 = vmatprep.subr.mxu1 %v7790_v55  ;;  %7699 = vmatprep.mubr.f32.mxu0 %v14094_v27 }
 0x462   : > { %7770 = vmatprep.mubr.f32.mxu1 %v14094_v27 }
 0x466   : > { %11692 = vmatmul.mubr.msk.f32.vlgmr.msra.gmra.mrb[14].mxu0 %vm245_vm1, %v11691_v24 }
 0x467   : > { %11693 = vmatmul.mubr.msk.f32.vlgmr.msra.gmra.mrb[14].mxu1 %vm245_vm1, %v11691_v24  ;;  %7802 = vmatpush1.msra.mxu0 %v7791_v22 }
 0x468   : > { %7873 = vmatpush1.msra.mxu1 %v7793_v29  ;;  %7967 = vmatprep.subr.mxu0 %v7958_v56 }
 0x469   : > { %8038 = vmatprep.subr.mxu1 %v7956_v30  ;;  %7865 = vmatprep.mubr.f32.mxu0 %v14094_v27 }
 0x46a   : > { %7936 = vmatprep.mubr.f32.mxu1 %v14094_v27 }
 0x46e   : > { %11695 = vmatmul.mubr.msk.f32.vlgmr.msra.gmra.mrb[14].mxu0 %vm245_vm1, %v11694_v41 }
 0x46f   : > { %11696 = vmatmul.mubr.msk.f32.vlgmr.msra.gmra.mrb[14].mxu1 %vm245_vm1, %v11694_v41  ;;  %7968 = vmatpush1.msra.mxu0 %v7957_v38 }
 0x470   : > { %8039 = vmatpush1.msra.mxu1 %v7959_v20  ;;  %8133 = vmatprep.subr.mxu0 %v8124_v51 }
 0x471   : > { %8204 = vmatprep.subr.mxu1 %v8122_v6  ;;  %8031 = vmatprep.mubr.f32.mxu0 %v14094_v27 }
 0x472   : > { %8102 = vmatprep.mubr.f32.mxu1 %v14094_v27 }
 0x476   : > { %11698 = vmatmul.mubr.msk.f32.vlgmr.msra.gmra.mrb[14].mxu0 %vm245_vm1, %v11697_v35 }
 0x477   : > { %11699 = vmatmul.mubr.msk.f32.vlgmr.msra.gmra.mrb[14].mxu1 %vm245_vm1, %v11697_v35  ;;  %8134 = vmatpush1.msra.mxu0 %v8123_v46  ;;  %v11712_v46 = vld [vmem:[%s14070_s1 + $0x198] sm:$0xff] }
 0x478   : > { %8205 = vmatpush1.msra.mxu1 %v8125_v19  ;;  %8299 = vmatprep.subr.mxu0 %v8290_v7 }
 0x479   : > { %8370 = vmatprep.subr.mxu1 %v8288_v15  ;;  %8197 = vmatprep.mubr.f32.mxu0 %v14094_v27 }
 0x47a   : > { %8268 = vmatprep.mubr.f32.mxu1 %v14094_v27 }
 0x47e   : > { %11701 = vmatmul.mubr.msk.f32.vlgmr.msra.gmra.mrb[14].mxu0 %vm245_vm1, %v11700_v59 }
 0x47f   : > { %11702 = vmatmul.mubr.msk.f32.vlgmr.msra.gmra.mrb[14].mxu1 %vm245_vm1, %v11700_v59  ;;  %8300 = vmatpush1.msra.mxu0 %v8289_v9 }
 0x480   : > { %8371 = vmatpush1.msra.mxu1 %v8291_v53  ;;  %8434 = vmatprep.mubr.f32.mxu1 %v14094_v27 }
 0x481   : > { %8363 = vmatprep.mubr.f32.mxu0 %v14094_v27 }
 0x486   : > { %11704 = vmatmul.mubr.msk.f32.vlgmr.msra.gmra.mrb[14].mxu0 %vm245_vm1, %v11703_v63 }
 0x487   : > { %11705 = vmatmul.mubr.msk.f32.vlgmr.msra.gmra.mrb[14].mxu1 %vm245_vm1, %v11703_v63  ;;  %8542 = vmatprep.mubr.f32.mxu0 %v14094_v27 }
 0x488   : > { %8613 = vmatprep.mubr.f32.mxu1 %v14094_v27 }
 0x4a5   : > { %v8460_v21 = vpop.permute.xlu0 %8459  ;;  %v8629_v11 = vpop.permute.xlu1 %8628 }
 0x4a6   : > { %v8467_v26 = vsel %vm5428_vm6, %v8458_v1, %v8460_v21  ;;  %v8636_v5 = vsel %vm5603_vm12, %v8627_v48, %v8629_v11  ;;  %v11715_v1 = vld [vmem:[%s14070_s1 + $0x1a0] sm:$0xff] }
 0x4ab   : > { %v13668_v60 = vpop.permute.xlu0 %8797 }
 0x4ac   : > { %v8466_v62 = vpop.permute.xlu1 %8465 }
 0x4af   : > { %v8635_v17 = vpop.permute.xlu0 %8634 }
 0x4b0   : > { %v8462_v23 = vpop.permute.xlu1 %8461 }
 0x4b1   : > { %v8468_v14 = vsel %vm5428_vm6, %v8460_v21, %v8462_v23 }
 0x4b2   : > { %8478 = vmatprep.subr.mxu0 %v8468_v14  ;;  %v11718_v14 = vld [vmem:[%s14070_s1 + $0x1a8] sm:$0xff] }
 0x4b3   : > { %8479 = vmatpush1.msra.mxu0 %v8467_v26  ;;  %v8464_v40 = vpop.permute.xlu0 %8463 }
 0x4b4   : > { %v8633_v0 = vpop.permute.xlu1 %8632  ;;  %v8469_v43 = vsel %vm5428_vm6, %v8462_v23, %v8464_v40  ;;  %v8470_v2 = vsel %vm5428_vm6, %v8464_v40, %v8466_v62  ;;  %11707 = vmatmul.mubr.msk.f32.vlgmr.msra.gmra.mrb[14].mxu0 %vm245_vm1, %v11706_v47 }
 0x4b5   : > { %8549 = vmatprep.subr.mxu1 %v8470_v2  ;;  %8711 = vmatprep.mubr.f32.mxu0 %v14094_v27  ;;  %v8639_v13 = vsel %vm5603_vm12, %v8633_v0, %v8635_v17 }
 0x4b6   : > { %8550 = vmatpush1.msra.mxu1 %v8469_v43 }
 0x4b7   : > { %8718 = vmatprep.subr.mxu1 %v8639_v13  ;;  %v8631_v55 = vpop.permute.xlu0 %8630  ;;  %11708 = vmatmul.mubr.msk.f32.vlgmr.msra.gmra.mrb[14].mxu1 %vm245_vm1, %v11706_v47 }
 0x4b8   : > { %v13681_v49 = vpop.permute.xlu1 %8799  ;;  %v8638_v28 = vsel %vm5603_vm12, %v8631_v55, %v8633_v0  ;;  %v8637_v8 = vsel %vm5603_vm12, %v8629_v11, %v8631_v55  ;;  %8782 = vmatprep.mubr.f32.mxu1 %v14094_v27  ;;  %v11721_v55 = vld [vmem:[%s14070_s1 + $0x1b0] sm:$0xff] }
 0x4b9   : > { %8647 = vmatprep.subr.mxu0 %v8637_v8  ;;  %8719 = vmatpush1.msra.mxu1 %v8638_v28  ;;  %v8806_v33 = vsel %vm5773_vm13, %v13668_v60, %v13681_v49 }
 0x4ba   : > { %8648 = vmatpush1.msra.mxu0 %v8636_v5 }
 0x4bb   : > { %8816 = vmatprep.subr.mxu0 %v8806_v33 }
 0x4bc   : > { %11710 = vmatmul.mubr.msk.f32.vlgmr.msra.gmra.mrb[14].mxu0 %vm245_vm1, %v11709_v3 }
 0x4bd   : > { %8880 = vmatprep.mubr.f32.mxu0 %v14094_v27 }
 0x4bf   : > { %11711 = vmatmul.mubr.msk.f32.vlgmr.msra.gmra.mrb[14].mxu1 %vm245_vm1, %v11709_v3 }
 0x4c0   : > { %8951 = vmatprep.mubr.f32.mxu1 %v14094_v27 }
 0x4cc   : > { %v5297_v36 = vpop.f32.mrb[12].mxu0 }
 0x4cd   : > { %v5368_v10 = vpop.f32.mrb[12].mxu1  ;;  %v5299_v31 = vpop.f32.mrb[13].mxu0  ;;  %v5298_v34 = vadd.f32 %v5297_v36, %v13301_v12 }
 0x4ce   : > { %v5369_v50 = vadd.f32 %v5368_v10, %v13301_v12  ;;  %v5370_v30 = vpop.f32.mrb[13].mxu1  ;;  %v5300_v16 = vadd.f32 %v5299_v31, %v13301_v12  ;;  %v11724_v31 = vld [vmem:[%s14070_s1 + $0x1b8] sm:$0xff] }
 0x4cf   : > { %v5371_v24 = vadd.f32 %v5370_v30, %v13301_v12  ;;  %v5373_v29 = vmax.f32 %v5298_v34, 0.0 }
 0x4d0   : > { %v5375_v22 = vmax.f32 %v5369_v50, 0.0  ;;  %v5374_v41 = vmax.f32 %v5300_v16, 0.0 }
 0x4d1   : > { %v5376_v54 = vmax.f32 %v5371_v24, 0.0 }
 0x4d2   : > { %v5379_v56 = vmul.f32 %v5375_v22, %v12660_v4  ;;  %v5377_v4 = vmul.f32 %v5373_v29, %v12664_v61  ;;  %v5378_v12 = vmul.f32 %v5374_v41, %v12662_v25  ;;  %v13761_v25 = vld [vmem:[#allocation2 + $0x90] sm:$0xff]  ;;  %v11727_v29 = vld [vmem:[%s14070_s1 + $0x1c0] sm:$0xff] }
 0x4d3   : > { %v5380_v6 = vmul.f32 %v5376_v54, %v12670_v18 }
 0x4d4   : > { %5389 = vrot.lane.b32.xlu1 %v5379_v56, %s12195_s29 }
 0x4d5   : > { %5391 = vrot.lane.b32.xlu0 %v5380_v6, %s12195_s29 }
 0x4d8   : > { %5385 = vrot.lane.b32.xlu1 %v5377_v4, %s12195_s29 }
 0x4d9   : > { %5387 = vrot.lane.b32.xlu0 %v5378_v12, %s12195_s29 }
 0x4dc   : > { %8803 = vrot.lane.b32.xlu1 %v13525_v32, %s12199_s7 }
 0x4dd   : > { %8801 = vrot.lane.b32.xlu0 %v13484_v37, %s12199_s7 }
 0x4e0   : > { %8966 = vrot.lane.b32.xlu1 %v13481_v45, %s12200_s20 }
 0x4e1   : > { %8795 = vrot.lane.b32.xlu0 %v13289_v52, %s12199_s7 }
 0x4e4   : > { %8964 = vrot.lane.b32.xlu1 %v13499_v44, %s12200_s20 }
 0x4e5   : > { %8968 = vrot.lane.b32.xlu0 %v13484_v37, %s12200_s20 }
 0x4e8   : > { %9132 = vrot.lane.b32.xlu1 %v13481_v45, %s12173_s6 }
 0x4e9   : > { %8970 = vrot.lane.b32.xlu0 %v13525_v32, %s12200_s20 }
 0x4ec   : > { %9130 = vrot.lane.b32.xlu1 %v13499_v44, %s12173_s6 }
 0x4ed   : > { %9134 = vrot.lane.b32.xlu0 %v13484_v37, %s12173_s6 }
 0x4f0   : > { %9298 = vrot.lane.b32.xlu1 %v13481_v45, %s12201_s27 }
 0x4f1   : > { %9136 = vrot.lane.b32.xlu0 %v13525_v32, %s12173_s6 }
 0x4f4   : > { %9296 = vrot.lane.b32.xlu1 %v13499_v44, %s12201_s27 }
 0x4f5   : > { %9300 = vrot.lane.b32.xlu0 %v13484_v37, %s12201_s27 }
 0x4f8   : > { %9464 = vrot.lane.b32.xlu1 %v13481_v45, %s12203_s8 }
 0x4f9   : > { %9302 = vrot.lane.b32.xlu0 %v13525_v32, %s12201_s27 }
 0x4fc   : > { %9462 = vrot.lane.b32.xlu1 %v13499_v44, %s12203_s8 }
 0x4fd   : > { %9466 = vrot.lane.b32.xlu0 %v13484_v37, %s12203_s8 }
 0x500   : > { %9630 = vrot.lane.b32.xlu1 %v13481_v45, %s12204_s12 }
 0x501   : > { %9468 = vrot.lane.b32.xlu0 %v13525_v32, %s12203_s8 }
 0x504   : > { %9628 = vrot.lane.b32.xlu1 %v13499_v44, %s12204_s12 }
 0x505   : > { %9632 = vrot.lane.b32.xlu0 %v13484_v37, %s12204_s12 }
 0x508   : > { %9796 = vrot.lane.b32.xlu1 %v13481_v45, %s12205_s9 }
 0x509   : > { %9634 = vrot.lane.b32.xlu0 %v13525_v32, %s12204_s12 }
 0x50c   : > { %9794 = vrot.lane.b32.xlu1 %v13499_v44, %s12205_s9 }
 0x50d   : > { %9798 = vrot.lane.b32.xlu0 %v13484_v37, %s12205_s9 }
 0x510   : > { %9970 = vrot.lane.b32.xlu1 %v13761_v25, %s12196_s30 }
 0x511   : > { %9800 = vrot.lane.b32.xlu0 %v13525_v32, %s12205_s9 }
 0x546   : > { %v5390_v61 = vpop.permute.xlu1 %5389 }
 0x547   : > { %v5392_v18 = vpop.permute.xlu0 %5391 }
 0x548   : > { %v5395_v52 = vsel %vm198_vm11, %v5390_v61, %v5392_v18  ;;  %v12206_v18 = vmov 7  }
 0x549   : > { %5404 = vst.msk [vmem:[#allocation2 + $0xb0] sm:$0xff] %vm443_vm8, %v5395_v52  ;;  %12101 = vset.pattern.permute.xlu0 %v12206_v18  ;;  %v5405_v52 = vld [vmem:[%s14071_s2] sm:$0xff] }
 0x54a   : > { %v5386_v45 = vpop.permute.xlu1 %5385  ;;  %v11751_v18 = vld [vmem:[%s14070_s1 + $0x200] sm:$0xff] }
 0x54b   : > { %5401 = vst.msk [vmem:[#allocation2 + $0x98] sm:$0xff] %vm439_vm7, %v5386_v45  ;;  %v5388_v44 = vpop.permute.xlu0 %5387 }
 0x54c   : > { %v13771_v37 = vsel %vm198_vm11, %v5386_v45, %v5388_v44  ;;  %v13774_v38 = vsel %vm198_vm11, %v5388_v44, %v5390_v61 }
 0x54e   : > { %v8804_v39 = vpop.permute.xlu1 %8803 }
 0x54f   : > { %v8802_v20 = vpop.permute.xlu0 %8801 }
 0x550   : > { %v8807_v32 = vsel %vm5773_vm13, %v13681_v49, %v8802_v20  ;;  %v8808_v51 = vsel %vm5773_vm13, %v8802_v20, %v8804_v39  ;;  %v13792_v15 = vld [vmem:[#allocation2 + $0xb0] sm:$0xff] }
 0x551   : > { %8887 = vmatprep.subr.mxu1 %v8808_v51 }
 0x552   : > { %v8967_v57 = vpop.permute.xlu1 %8966  ;;  %8888 = vmatpush1.msra.mxu1 %v8807_v32  ;;  %v13779_v35 = vld [vmem:[#allocation2 + $0x98] sm:$0xff] }
 0x553   : > { %10141 = vrot.lane.b32.xlu0 %v13779_v35, %s12198_s11  ;;  %9972 = vrot.lane.b32.xlu1 %v13779_v35, %s12196_s30  ;;  %v8796_v42 = vpop.permute.xlu0 %8795 }
 0x554   : > { %v8805_v19 = vsel %vm5773_vm13, %v8796_v42, %v13668_v60  ;;  %11714 = vmatmul.mubr.msk.f32.vlgmr.msra.gmra.mrb[14].mxu1 %vm245_vm1, %v11712_v46 }
 0x555   : > { %8817 = vmatpush1.msra.mxu0 %v8805_v19  ;;  %9117 = vmatprep.mubr.f32.mxu1 %v14094_v27 }
 0x556   : > { %v8965_v7 = vpop.permute.xlu1 %8964  ;;  %11713 = vmatmul.mubr.msk.f32.vlgmr.msra.gmra.mrb[14].mxu0 %vm245_vm1, %v11712_v46 }
 0x557   : > { %9978 = vrot.lane.b32.xlu0 %v13792_v15, %s12196_s30  ;;  %9976 = vrot.lane.b32.xlu1 %v13774_v38, %s12196_s30  ;;  %v8969_v58 = vpop.permute.xlu0 %8968  ;;  %v8972_v9 = vsel %vm5941_vm14, %v8965_v7, %v8967_v57 }
 0x558   : > { %v8973_v59 = vsel %vm5941_vm14, %v8967_v57, %v8969_v58  ;;  %9046 = vmatprep.mubr.f32.mxu0 %v14094_v27  ;;  %v11733_v57 = vld [vmem:[%s14070_s1 + $0x1d0] sm:$0xff] }
 0x559   : > { %8982 = vmatprep.subr.mxu0 %v8973_v59 }
 0x55a   : > { %v9133_v53 = vpop.permute.xlu1 %9132  ;;  %8983 = vmatpush1.msra.mxu0 %v8972_v9 }
 0x55b   : > { %10147 = vrot.lane.b32.xlu1 %v13792_v15, %s12198_s11  ;;  %9974 = vrot.lane.b32.xlu0 %v13771_v37, %s12196_s30  ;;  %v8971_v63 = vpop.permute.xlu0 %8970 }
 0x55c   : > { %v8974_v48 = vsel %vm5941_vm14, %v8969_v58, %v8971_v63  ;;  %9053 = vmatprep.subr.mxu1 %v8971_v63 }
 0x55d   : > { %9054 = vmatpush1.msra.mxu1 %v8974_v48 }
 0x55e   : > { %v9131_v21 = vpop.permute.xlu1 %9130  ;;  %11716 = vmatmul.mubr.msk.f32.vlgmr.msra.gmra.mrb[14].mxu0 %vm245_vm1, %v11715_v1  ;;  %11717 = vmatmul.mubr.msk.f32.vlgmr.msra.gmra.mrb[14].mxu1 %vm245_vm1, %v11715_v1  ;;  %v11736_v1 = vld [vmem:[%s14070_s1 + $0x1d8] sm:$0xff] }
 0x55f   : > { %10143 = vrot.lane.b32.xlu1 %v13771_v37, %s12198_s11  ;;  %10139 = vrot.lane.b32.xlu0 %v13761_v25, %s12198_s11  ;;  %v9135_v11 = vpop.permute.xlu0 %9134  ;;  %v9138_v62 = vsel %vm237_vm0, %v9131_v21, %v9133_v53 }
 0x560   : > { %v9139_v60 = vsel %vm237_vm0, %v9133_v53, %v9135_v11  ;;  %9212 = vmatprep.mubr.f32.mxu0 %v14094_v27  ;;  %9283 = vmatprep.mubr.f32.mxu1 %v14094_v27 }
 0x561   : > { %9148 = vmatprep.subr.mxu0 %v9139_v60 }
 0x562   : > { %v9299_v17 = vpop.permute.xlu1 %9298  ;;  %9149 = vmatpush1.msra.mxu0 %v9138_v62 }
 0x563   : > { %10310 = vrot.lane.b32.xlu1 %v13779_v35, %s12199_s7  ;;  %10145 = vrot.lane.b32.xlu0 %v13774_v38, %s12198_s11  ;;  %v9137_v23 = vpop.permute.xlu0 %9136 }
 0x564   : > { %v9140_v47 = vsel %vm237_vm0, %v9135_v11, %v9137_v23  ;;  %9219 = vmatprep.subr.mxu1 %v9137_v23 }
 0x565   : > { %9220 = vmatpush1.msra.mxu1 %v9140_v47 }
 0x566   : > { %v9297_v26 = vpop.permute.xlu1 %9296  ;;  %11719 = vmatmul.mubr.msk.f32.vlgmr.msra.gmra.mrb[14].mxu0 %vm245_vm1, %v11718_v14  ;;  %11720 = vmatmul.mubr.msk.f32.vlgmr.msra.gmra.mrb[14].mxu1 %vm245_vm1, %v11718_v14  ;;  %v11739_v14 = vld [vmem:[%s14070_s1 + $0x1e0] sm:$0xff] }
 0x567   : > { %10314 = vrot.lane.b32.xlu1 %v13774_v38, %s12199_s7  ;;  %10312 = vrot.lane.b32.xlu0 %v13771_v37, %s12199_s7  ;;  %v9301_v40 = vpop.permute.xlu0 %9300  ;;  %v9304_v43 = vsel %vm6274_vm15, %v9297_v26, %v9299_v17 }
 0x568   : > { %v9305_v0 = vsel %vm6274_vm15, %v9299_v17, %v9301_v40  ;;  %9378 = vmatprep.mubr.f32.mxu0 %v14094_v27  ;;  %9449 = vmatprep.mubr.f32.mxu1 %v14094_v27 }
 0x569   : > { %9314 = vmatprep.subr.mxu0 %v9305_v0 }
 0x56a   : > { %v9465_v2 = vpop.permute.xlu1 %9464  ;;  %9315 = vmatpush1.msra.mxu0 %v9304_v43 }
 0x56b   : > { %10308 = vrot.lane.b32.xlu1 %v13761_v25, %s12199_s7  ;;  %10316 = vrot.lane.b32.xlu0 %v13792_v15, %s12199_s7  ;;  %v9303_v13 = vpop.permute.xlu0 %9302  ;;  %v11730_v25 = vld [vmem:[%s14070_s1 + $0x1c8] sm:$0xff] }
 0x56c   : > { %v9306_v49 = vsel %vm6274_vm15, %v9301_v40, %v9303_v13  ;;  %9385 = vmatprep.subr.mxu1 %v9303_v13 }
 0x56d   : > { %9386 = vmatpush1.msra.mxu1 %v9306_v49  ;;  %v11742_v49 = vld [vmem:[%s14070_s1 + $0x1e8] sm:$0xff] }
 0x56e   : > { %v9463_v28 = vpop.permute.xlu1 %9462  ;;  %11722 = vmatmul.mubr.msk.f32.vlgmr.msra.gmra.mrb[14].mxu0 %vm245_vm1, %v11721_v55  ;;  %11723 = vmatmul.mubr.msk.f32.vlgmr.msra.gmra.mrb[14].mxu1 %vm245_vm1, %v11721_v55 }
 0x56f   : > { %10481 = vrot.lane.b32.xlu1 %v13774_v38, %s12200_s20  ;;  %10479 = vrot.lane.b32.xlu0 %v13771_v37, %s12200_s20  ;;  %v9467_v8 = vpop.permute.xlu0 %9466  ;;  %v9470_v33 = vsel %vm6441_vm2, %v9463_v28, %v9465_v2 }
 0x570   : > { %v9471_v5 = vsel %vm6441_vm2, %v9465_v2, %v9467_v8  ;;  %9544 = vmatprep.mubr.f32.mxu0 %v14094_v27  ;;  %9615 = vmatprep.mubr.f32.mxu1 %v14094_v27 }
 0x571   : > { %9480 = vmatprep.subr.mxu0 %v9471_v5 }
 0x572   : > { %v9631_v36 = vpop.permute.xlu1 %9630  ;;  %9481 = vmatpush1.msra.mxu0 %v9470_v33 }
 0x573   : > { %10483 = vrot.lane.b32.xlu1 %v13792_v15, %s12200_s20  ;;  %10477 = vrot.lane.b32.xlu0 %v13779_v35, %s12200_s20  ;;  %v9469_v10 = vpop.permute.xlu0 %9468  ;;  %s12111_s20 = sshll.u32 %s12207_s5, 4  ;;  %s12112_s20 = int_to_ptr.vmem [resolvable:$false] %s12111_s20 }
 0x574   : > { %v9472_v34 = vsel %vm6441_vm2, %v9467_v8, %v9469_v10  ;;  %9551 = vmatprep.subr.mxu1 %v9469_v10  ;;  %s12113_s13 = scalar_lea.vmem %s12112_s20, 1024 }
 0x575   : > { %9552 = vmatpush1.msra.mxu1 %v9472_v34  ;;  %v11745_v34 = vld [vmem:[%s14070_s1 + $0x1f0] sm:$0xff] }
 0x576   : > { %v9629_v50 = vpop.permute.xlu1 %9628  ;;  %11725 = vmatmul.mubr.msk.f32.vlgmr.msra.gmra.mrb[14].mxu0 %vm245_vm1, %v11724_v31  ;;  %11726 = vmatmul.mubr.msk.f32.vlgmr.msra.gmra.mrb[14].mxu1 %vm245_vm1, %v11724_v31 }
 0x577   : > { %10647 = vrot.lane.b32.xlu1 %v13774_v38, %s12173_s6  ;;  %10645 = vrot.lane.b32.xlu0 %v13771_v37, %s12173_s6  ;;  %v9633_v30 = vpop.permute.xlu0 %9632  ;;  %v9636_v24 = vsel %vm6608_vm3, %v9629_v50, %v9631_v36 }
 0x578   : > { %v9637_v16 = vsel %vm6608_vm3, %v9631_v36, %v9633_v30  ;;  %9710 = vmatprep.mubr.f32.mxu0 %v14094_v27  ;;  %9781 = vmatprep.mubr.f32.mxu1 %v14094_v27 }
 0x579   : > { %9646 = vmatprep.subr.mxu0 %v9637_v16 }
 0x57a   : > { %v9797_v22 = vpop.permute.xlu1 %9796  ;;  %9647 = vmatpush1.msra.mxu0 %v9636_v24 }
 0x57b   : > { %10649 = vrot.lane.b32.xlu1 %v13792_v15, %s12173_s6  ;;  %10643 = vrot.lane.b32.xlu0 %v13779_v35, %s12173_s6  ;;  %v9635_v54 = vpop.permute.xlu0 %9634 }
 0x57c   : > { %v9638_v56 = vsel %vm6608_vm3, %v9633_v30, %v9635_v54  ;;  %9717 = vmatprep.subr.mxu1 %v9635_v54 }
 0x57d   : > { %9718 = vmatpush1.msra.mxu1 %v9638_v56  ;;  %v11748_v56 = vld [vmem:[%s14070_s1 + $0x1f8] sm:$0xff] }
 0x57e   : > { %v9795_v3 = vpop.permute.xlu1 %9794  ;;  %11728 = vmatmul.mubr.msk.f32.vlgmr.msra.gmra.mrb[14].mxu0 %vm245_vm1, %v11727_v29  ;;  %11729 = vmatmul.mubr.msk.f32.vlgmr.msra.gmra.mrb[14].mxu1 %vm245_vm1, %v11727_v29 }
 0x57f   : > { %10813 = vrot.lane.b32.xlu1 %v13774_v38, %s12201_s27  ;;  %10811 = vrot.lane.b32.xlu0 %v13771_v37, %s12201_s27  ;;  %v9799_v41 = vpop.permute.xlu0 %9798  ;;  %v9802_v4 = vsel %vm6775_vm9, %v9795_v3, %v9797_v22 }
 0x580   : > { %v9803_v6 = vsel %vm6775_vm9, %v9797_v22, %v9799_v41  ;;  %9876 = vmatprep.mubr.f32.mxu0 %v14094_v27  ;;  %9947 = vmatprep.mubr.f32.mxu1 %v14094_v27 }
 0x581   : > { %9812 = vmatprep.subr.mxu0 %v9803_v6 }
 0x582   : > { %9813 = vmatpush1.msra.mxu0 %v9802_v4  ;;  %v9971_v45 = vpop.permute.xlu1 %9970 }
 0x583   : > { %10815 = vrot.lane.b32.xlu1 %v13792_v15, %s12201_s27  ;;  %10809 = vrot.lane.b32.xlu0 %v13779_v35, %s12201_s27  ;;  %v9801_v12 = vpop.permute.xlu0 %9800 }
 0x584   : > { %v9804_v61 = vsel %vm6775_vm9, %v9799_v41, %v9801_v12  ;;  %9883 = vmatprep.subr.mxu1 %v9801_v12 }
 0x585   : > { %9884 = vmatpush1.msra.mxu1 %v9804_v61 }
 0x586   : > { %11731 = vmatmul.mubr.msk.f32.vlgmr.msra.gmra.mrb[14].mxu0 %vm245_vm1, %v11730_v25  ;;  %11732 = vmatmul.mubr.msk.f32.vlgmr.msra.gmra.mrb[14].mxu1 %vm245_vm1, %v11730_v25 }
 0x587   : > { %10979 = vrot.lane.b32.xlu1 %v13774_v38, %s12203_s8  ;;  %10977 = vrot.lane.b32.xlu0 %v13771_v37, %s12203_s8 }
 0x588   : > { %10055 = vmatprep.mubr.f32.mxu0 %v14094_v27  ;;  %10126 = vmatprep.mubr.f32.mxu1 %v14094_v27 }
 0x58b   : > { %10981 = vrot.lane.b32.xlu1 %v13792_v15, %s12203_s8  ;;  %10975 = vrot.lane.b32.xlu0 %v13779_v35, %s12203_s8 }
 0x58f   : > { %11145 = vrot.lane.b32.xlu1 %v13774_v38, %s12204_s12  ;;  %11143 = vrot.lane.b32.xlu0 %v13771_v37, %s12204_s12 }
 0x593   : > { %11147 = vrot.lane.b32.xlu1 %v13792_v15, %s12204_s12  ;;  %11141 = vrot.lane.b32.xlu0 %v13779_v35, %s12204_s12 }
 0x597   : > { %11311 = vrot.lane.b32.xlu1 %v13774_v38, %s12205_s9  ;;  %11309 = vrot.lane.b32.xlu0 %v13771_v37, %s12205_s9 }
 0x59b   : > { %11313 = vrot.lane.b32.xlu1 %v13792_v15, %s12205_s9  ;;  %11307 = vrot.lane.b32.xlu0 %v13779_v35, %s12205_s9  ;;  %s11558_s9 = sshll.u32 %s188_s14, 5 }
 0x59c   : > { %s190_s10 = scalar_lea.vmem [#allocation3], %s11558_s9 }
 0x59d   : > { %s11495_s30 = sshll.u32 %s190_s10, 4  ;;  %s14029_s30 = int_to_ptr.vmem [resolvable:$true] %s11495_s30 }
 0x59e   : > { %s12107_s7 = scalar_lea.vmem %s14029_s30, 512  ;;  %p12114_p0 = scmp.lt.s32.totalorder %s14029_s30, %s12112_s20 }
 0x59f   : > { %5584 = vperm.xlu0 %12101, %v5405_v52   ;;  %p12108_p11 = scmp.ne.s32.totalorder %s14029_s30, %s12107_s7  ;;  %p12115_p1 = scmp.lt.s32.totalorder %s12113_s13, %s12107_s7 }
 0x5a1   : > { %p12109_p12 = pnand %p12108_p11, %p12271_p5  ;;  %p12116_p2 = por %p12115_p1, %p12114_p0 }
 0x5a3   : > { %p12110_p13 = pneg %p12109_p12 }
 0x5a5   : > { %p12117_p3 = pnand %p12116_p2, %p12110_p13 }
 0x5c5   : > { %v9973_v44 = vpop.permute.xlu1 %9972  ;;  %v10142_v39 = vpop.permute.xlu0 %10141 }
 0x5c6   : > { %v9980_v46 = vsel %vm5428_vm6, %v9971_v45, %v9973_v44 }
 0x5c9   : > { %v9977_v20 = vpop.permute.xlu1 %9976  ;;  %v9979_v32 = vpop.permute.xlu0 %9978 }
 0x5ca   : > { %v9983_v38 = vsel %vm5428_vm6, %v9977_v20, %v9979_v32 }
 0x5cb   : > { %10062 = vmatprep.subr.mxu1 %v9983_v38 }
 0x5cd   : > { %v10148_v37 = vpop.permute.xlu1 %10147  ;;  %v9975_v51 = vpop.permute.xlu0 %9974 }
 0x5ce   : > { %v9982_v35 = vsel %vm5428_vm6, %v9975_v51, %v9977_v20  ;;  %v9981_v42 = vsel %vm5428_vm6, %v9973_v44, %v9975_v51 }
 0x5cf   : > { %9991 = vmatprep.subr.mxu0 %v9981_v42  ;;  %10063 = vmatpush1.msra.mxu1 %v9982_v35 }
 0x5d0   : > { %9992 = vmatpush1.msra.mxu0 %v9980_v46  ;;  %11735 = vmatmul.mubr.msk.f32.vlgmr.msra.gmra.mrb[14].mxu1 %vm245_vm1, %v11733_v57 }
 0x5d1   : > { %v10144_v19 = vpop.permute.xlu1 %10143  ;;  %11734 = vmatmul.mubr.msk.f32.vlgmr.msra.gmra.mrb[14].mxu0 %vm245_vm1, %v11733_v57  ;;  %v10140_v7 = vpop.permute.xlu0 %10139  ;;  %10295 = vmatprep.mubr.f32.mxu1 %v14094_v27 }
 0x5d2   : > { %v10149_v15 = vsel %vm5603_vm12, %v10140_v7, %v10142_v39  ;;  %v10150_v58 = vsel %vm5603_vm12, %v10142_v39, %v10144_v19  ;;  %10224 = vmatprep.mubr.f32.mxu0 %v14094_v27 }
 0x5d3   : > { %10160 = vmatprep.subr.mxu0 %v10150_v58 }
 0x5d4   : > { %10161 = vmatpush1.msra.mxu0 %v10149_v15  ;;  %v11757_v15 = vld [vmem:[%s14070_s1 + $0x210] sm:$0xff] }
 0x5d5   : > { %v10311_v59 = vpop.permute.xlu1 %10310  ;;  %v10146_v9 = vpop.permute.xlu0 %10145 }
 0x5d6   : > { %v10151_v53 = vsel %vm5603_vm12, %v10144_v19, %v10146_v9  ;;  %v10152_v63 = vsel %vm5603_vm12, %v10146_v9, %v10148_v37  ;;  %v11754_v37 = vld [vmem:[%s14070_s1 + $0x208] sm:$0xff] }
 0x5d7   : > { %10231 = vmatprep.subr.mxu1 %v10152_v63 }
 0x5d8   : > { %10232 = vmatpush1.msra.mxu1 %v10151_v53 }
 0x5d9   : > { %v10315_v48 = vpop.permute.xlu1 %10314  ;;  %11737 = vmatmul.mubr.msk.f32.vlgmr.msra.gmra.mrb[14].mxu0 %vm245_vm1, %v11736_v1  ;;  %11738 = vmatmul.mubr.msk.f32.vlgmr.msra.gmra.mrb[14].mxu1 %vm245_vm1, %v11736_v1  ;;  %v10313_v21 = vpop.permute.xlu0 %10312 }
 0x5da   : > { %v10319_v11 = vsel %vm5773_vm13, %v10311_v59, %v10313_v21  ;;  %10393 = vmatprep.mubr.f32.mxu0 %v14094_v27  ;;  %10464 = vmatprep.mubr.f32.mxu1 %v14094_v27  ;;  %v10320_v47 = vsel %vm5773_vm13, %v10313_v21, %v10315_v48 }
 0x5db   : > { %10329 = vmatprep.subr.mxu0 %v10319_v11 }
 0x5dd   : > { %v10309_v60 = vpop.permute.xlu1 %10308  ;;  %v10317_v62 = vpop.permute.xlu0 %10316 }
 0x5de   : > { %v10318_v17 = vsel %vm5773_vm13, %v10309_v60, %v10311_v59  ;;  %v10321_v23 = vsel %vm5773_vm13, %v10315_v48, %v10317_v62 }
 0x5df   : > { %10330 = vmatpush1.msra.mxu0 %v10318_v17  ;;  %10400 = vmatprep.subr.mxu1 %v10321_v23 }
 0x5e0   : > { %10401 = vmatpush1.msra.mxu1 %v10320_v47 }
 0x5e1   : > { %v10482_v26 = vpop.permute.xlu1 %10481  ;;  %11740 = vmatmul.mubr.msk.f32.vlgmr.msra.gmra.mrb[14].mxu0 %vm245_vm1, %v11739_v14  ;;  %11741 = vmatmul.mubr.msk.f32.vlgmr.msra.gmra.mrb[14].mxu1 %vm245_vm1, %v11739_v14  ;;  %v10480_v40 = vpop.permute.xlu0 %10479 }
 0x5e2   : > { %v10486_v0 = vsel %vm5941_vm14, %v10480_v40, %v10482_v26  ;;  %10559 = vmatprep.mubr.f32.mxu0 %v14094_v27  ;;  %10630 = vmatprep.mubr.f32.mxu1 %v14094_v27 }
 0x5e3   : > { %10495 = vmatprep.subr.mxu0 %v10486_v0 }
 0x5e5   : > { %v10484_v43 = vpop.permute.xlu1 %10483  ;;  %v10478_v2 = vpop.permute.xlu0 %10477 }
 0x5e6   : > { %v10487_v13 = vsel %vm5941_vm14, %v10482_v26, %v10484_v43  ;;  %v10485_v55 = vsel %vm5941_vm14, %v10478_v2, %v10480_v40  ;;  %10566 = vmatprep.subr.mxu1 %v10484_v43 }
 0x5e7   : > { %10496 = vmatpush1.msra.mxu0 %v10485_v55  ;;  %10567 = vmatpush1.msra.mxu1 %v10487_v13 }
 0x5e9   : > { %v10648_v28 = vpop.permute.xlu1 %10647  ;;  %11743 = vmatmul.mubr.msk.f32.vlgmr.msra.gmra.mrb[14].mxu0 %vm245_vm1, %v11742_v49  ;;  %11744 = vmatmul.mubr.msk.f32.vlgmr.msra.gmra.mrb[14].mxu1 %vm245_vm1, %v11742_v49  ;;  %v10646_v8 = vpop.permute.xlu0 %10645 }
 0x5ea   : > { %v10652_v5 = vsel %vm237_vm0, %v10646_v8, %v10648_v28  ;;  %10725 = vmatprep.mubr.f32.mxu0 %v14094_v27  ;;  %10796 = vmatprep.mubr.f32.mxu1 %v14094_v27 }
 0x5eb   : > { %10661 = vmatprep.subr.mxu0 %v10652_v5 }
 0x5ed   : > { %v10650_v33 = vpop.permute.xlu1 %10649  ;;  %v10644_v36 = vpop.permute.xlu0 %10643 }
 0x5ee   : > { %v10653_v10 = vsel %vm237_vm0, %v10648_v28, %v10650_v33  ;;  %v10651_v31 = vsel %vm237_vm0, %v10644_v36, %v10646_v8  ;;  %10732 = vmatprep.subr.mxu1 %v10650_v33  ;;  %vm11478_vm0 = vcmask 261120  }
 0x5ef   : > { %10662 = vmatpush1.msra.mxu0 %v10651_v31  ;;  %10733 = vmatpush1.msra.mxu1 %v10653_v10 }
 0x5f1   : > { %v10814_v50 = vpop.permute.xlu1 %10813  ;;  %11746 = vmatmul.mubr.msk.f32.vlgmr.msra.gmra.mrb[14].mxu0 %vm245_vm1, %v11745_v34  ;;  %11747 = vmatmul.mubr.msk.f32.vlgmr.msra.gmra.mrb[14].mxu1 %vm245_vm1, %v11745_v34  ;;  %v10812_v30 = vpop.permute.xlu0 %10811 }
 0x5f2   : > { %v10818_v16 = vsel %vm6274_vm15, %v10812_v30, %v10814_v50  ;;  %10891 = vmatprep.mubr.f32.mxu0 %v14094_v27  ;;  %10962 = vmatprep.mubr.f32.mxu1 %v14094_v27 }
 0x5f3   : > { %10827 = vmatprep.subr.mxu0 %v10818_v16 }
 0x5f5   : > { %v10816_v24 = vpop.permute.xlu1 %10815  ;;  %v10810_v22 = vpop.permute.xlu0 %10809 }
 0x5f6   : > { %v10819_v54 = vsel %vm6274_vm15, %v10814_v50, %v10816_v24  ;;  %v10817_v29 = vsel %vm6274_vm15, %v10810_v22, %v10812_v30  ;;  %10898 = vmatprep.subr.mxu1 %v10816_v24 }
 0x5f7   : > { %10828 = vmatpush1.msra.mxu0 %v10817_v29  ;;  %10899 = vmatpush1.msra.mxu1 %v10819_v54 }
 0x5f9   : > { %v10980_v3 = vpop.permute.xlu1 %10979  ;;  %11749 = vmatmul.mubr.msk.f32.vlgmr.msra.gmra.mrb[14].mxu0 %vm245_vm1, %v11748_v56  ;;  %11750 = vmatmul.mubr.msk.f32.vlgmr.msra.gmra.mrb[14].mxu1 %vm245_vm1, %v11748_v56  ;;  %v10978_v41 = vpop.permute.xlu0 %10977 }
 0x5fa   : > { %v10984_v6 = vsel %vm6441_vm2, %v10978_v41, %v10980_v3  ;;  %11057 = vmatprep.mubr.f32.mxu0 %v14094_v27  ;;  %11128 = vmatprep.mubr.f32.mxu1 %v14094_v27 }
 0x5fb   : > { %10993 = vmatprep.subr.mxu0 %v10984_v6 }
 0x5fd   : > { %v10982_v4 = vpop.permute.xlu1 %10981  ;;  %v10976_v12 = vpop.permute.xlu0 %10975 }
 0x5fe   : > { %v10985_v25 = vsel %vm6441_vm2, %v10980_v3, %v10982_v4  ;;  %v10983_v61 = vsel %vm6441_vm2, %v10976_v12, %v10978_v41  ;;  %11064 = vmatprep.subr.mxu1 %v10982_v4 }
 0x5ff   : > { %10994 = vmatpush1.msra.mxu0 %v10983_v61  ;;  %11065 = vmatpush1.msra.mxu1 %v10985_v25 }
 0x601   : > { %v11146_v52 = vpop.permute.xlu1 %11145  ;;  %11752 = vmatmul.mubr.msk.f32.vlgmr.msra.gmra.mrb[14].mxu0 %vm245_vm1, %v11751_v18  ;;  %11753 = vmatmul.mubr.msk.f32.vlgmr.msra.gmra.mrb[14].mxu1 %vm245_vm1, %v11751_v18  ;;  %v11144_v45 = vpop.permute.xlu0 %11143 }
 0x602   : > { %v11150_v44 = vsel %vm6608_vm3, %v11144_v45, %v11146_v52  ;;  %11223 = vmatprep.mubr.f32.mxu0 %v14094_v27  ;;  %11294 = vmatprep.mubr.f32.mxu1 %v14094_v27 }
 0x603   : > { %11159 = vmatprep.subr.mxu0 %v11150_v44 }
 0x605   : > { %v11148_v39 = vpop.permute.xlu1 %11147  ;;  %v11142_v20 = vpop.permute.xlu0 %11141 }
 0x606   : > { %v11151_v32 = vsel %vm6608_vm3, %v11146_v52, %v11148_v39  ;;  %v11149_v38 = vsel %vm6608_vm3, %v11142_v20, %v11144_v45  ;;  %11230 = vmatprep.subr.mxu1 %v11148_v39 }
 0x607   : > { %11160 = vmatpush1.msra.mxu0 %v11149_v38  ;;  %11231 = vmatpush1.msra.mxu1 %v11151_v32 }
 0x609   : > { %v11312_v51 = vpop.permute.xlu1 %11311  ;;  %11755 = vmatmul.mubr.msk.f32.vlgmr.msra.gmra.mrb[14].mxu0 %vm245_vm1, %v11754_v37  ;;  %11756 = vmatmul.mubr.msk.f32.vlgmr.msra.gmra.mrb[14].mxu1 %vm245_vm1, %v11754_v37  ;;  %v11310_v57 = vpop.permute.xlu0 %11309 }
 0x60a   : > { %v11316_v35 = vsel %vm6775_vm9, %v11310_v57, %v11312_v51  ;;  %11389 = vmatprep.mubr.f32.mxu0 %v14094_v27  ;;  %11460 = vmatprep.mubr.f32.mxu1 %v14094_v27 }
 0x60b   : > { %11325 = vmatprep.subr.mxu0 %v11316_v35 }
 0x60d   : > { %v11314_v42 = vpop.permute.xlu1 %11313  ;;  %v11308_v46 = vpop.permute.xlu0 %11307 }
 0x60e   : > { %v11317_v19 = vsel %vm6775_vm9, %v11312_v51, %v11314_v42  ;;  %v11315_v7 = vsel %vm6775_vm9, %v11308_v46, %v11310_v57  ;;  %11396 = vmatprep.subr.mxu1 %v11314_v42 }
 0x60f   : > { %11326 = vmatpush1.msra.mxu0 %v11315_v7  ;;  %11397 = vmatpush1.msra.mxu1 %v11317_v19 }
 0x611   : > { %11758 = vmatmul.mubr.msk.f32.vlgmr.msra.gmra.mrb[14].mxu0 %vm245_vm1, %v11757_v15  ;;  %11759 = vmatmul.mubr.msk.f32.vlgmr.msra.gmra.mrb[14].mxu1 %vm245_vm1, %v11757_v15 }
 0x61e   : > { %v5585_v27 = vpop.permute.xlu0 %5584 }
 0x6e4   : > { %v11391_v58 = vpop.f32.mrb[14].mxu0  ;;  %v11462_v59 = vpop.f32.mrb[14].mxu1 }
 0x6e5   : > { %v11778_v9 = vadd.f32 %v11391_v58, %v5585_v27  ;;  %v11780_v53 = vadd.f32 %v11462_v59, %v5585_v27  ;;  %v11393_v63 = vpop.f32.mrb[15].mxu0  ;;  %v11464_v1 = vpop.f32.mrb[15].mxu1 }
 0x6e6   : > { %v11779_v48 = vadd.f32 %v11393_v63, %v5585_v27  ;;  %v11781_v21 = vadd.f32 %v11464_v1, %v5585_v27 }
 0x6e7   : > { %v11471_v11 = vmax.f32 %v11778_v9, 0.0  ;;  %v11473_v60 = vmax.f32 %v11780_v53, 0.0 }
 0x6e8   : > { %v11472_v62 = vmax.f32 %v11779_v48, 0.0  ;;  %v11474_v17 = vmax.f32 %v11781_v21, 0.0 }
 0x6e9   : > { %11475 = vst [vmem:[%s190_s10] sm:$0xff] %v11471_v11  ;;  %11477 = vst [vmem:[%s190_s10 + $0x10] sm:$0xff] %v11473_v60 }
 0x6ea   : > { %11476 = vst [vmem:[%s190_s10 + $0x8] sm:$0xff] %v11472_v62  ;;  %11479 = vst.msk [vmem:[%s190_s10 + $0x18] sm:$0xff] %vm11478_vm0, %v11474_v17 }
 0x6eb   : > { %12120 = shalt.err (!%p12117_p3)
}
 0x6ec   : > { %s12121_s6 = scalar_lea.hbm %s14027_s23, 512  ;;  %s12125_s8 = scalar_lea.hbm %s14073_s4, 1024 }
 0x6ed   : > { %p12122_p4 = scmp.ne.s32.totalorder %s14027_s23, %s12121_s6  ;;  %p12126_p9 = scmp.lt.u32.totalorder %s14027_s23, %s14073_s4 }
 0x6ee   : > { %p12127_p10 = scmp.lt.u32.totalorder %s12125_s8, %s12121_s6  ;;  %p12129_p12 = scmp.lt.u32.totalorder %s12121_s6, %s14027_s23 }
 0x6ef   : > { %p12123_p7 = pnand %p12122_p4, %p12271_p5 }
 0x6f0   : > { %p12128_p11 = por %p12127_p10, %p12126_p9 }
 0x6f1   : > { %p12124_p8 = pneg %p12123_p7 }
 0x6f2   : > { %p12130_p13 = por %p12129_p12, %p12128_p11 }
 0x6f4   : > { %p12131_p0 = pnand %p12130_p13, %p12124_p8 }
 0x6f6   : > { %12134 = shalt.err (!%p12131_p0)
}
 0x6f7   : > { %12019 = dma.vmem_to_hbm [thread:$0]  (%p12271_p5), %s14029_s30, 512, %s14027_s23, %s11481_s19  }
 0x6f8 PF: > { %p12025_p1 = scmp.ge.s32.totalorder %s12169_s18, 2  ;;  %s11507_s9 = sand.u32 1, %s12157_s15  }
 0x6f9   : > { %s11508_s28 = scalar_lea.sflag [#allocation4], %s11507_s9 }
 0x6fa   : > { %p12022_p2 = pnand %p12025_p1, %p12275_p6 }
 0x6fc   : > { %12152 = dma.done.wait (!%p12022_p2), %s11508_s28, 512  }
 0x6fd   : > { %12154 = vsyncadd (!%p12022_p2), %s11508_s28, 4294966784  ;;  %p14_p3 = scmp.ge.s32.totalorder %s12258_s21, 4   ;;  %s14103_s15 = smov %s12161_s16 }
 0x6fe   : > { %s14104_s16 = smov %s12165_s17  ;;  %s14105_s17 = smov %s12269_s24 }
 0x6ff   : > { %s14106_s18 = smov %s12258_s21  ;;  %16 = sbr.rel (!%p14_p3) target bundleno = 3 (0x3), region = 140 }
 0x706   :  { %11513 = vsyncpa [#allocation4], 1 }
 0x707   :  { %11515 = vsyncpa [#allocation4 + $0x1], 1 }

</bundles_post_ra>
